<compile_context>
chip_gen: v5e
topology: v5e:2x2
jax: 0.10.0
libtpu: 0.0.40
codegen_flags: <defaults>
</compile_context>

<pallas_src>
import math
import functools

import jax
import jax.numpy as jnp
from jax.experimental import pallas as pl
from jax.experimental.pallas import tpu as pltpu

# Small, self-consistent model dims (module implies d_model / d_ff / num_heads).
D_MODEL = 128
D_FF = 192
NUM_HEADS = 4
HEAD_DIM = D_MODEL // NUM_HEADS
LN_EPS = 1e-5

_DN_CONTRACT_LAST = (((1,), (1,)), ((), ()))  # A[t,d] x B[s,d] -> [t,s]


# --------------------------------------------------------------------------
# In-kernel helpers (operate on VMEM values)
# --------------------------------------------------------------------------
def _layernorm(x, g, b):
    mu = jnp.mean(x, axis=-1, keepdims=True)
    xc = x - mu
    var = jnp.mean(xc * xc, axis=-1, keepdims=True)
    return xc * jax.lax.rsqrt(var + LN_EPS) * g + b


def _rel_shift_rows(p):
    """Transformer-XL relative shift of a (T, T) score block, in-kernel.

    Equivalent to: pad a zero column on the left, reshape (T, T+1)->(T+1, T),
    drop the first row.  Implemented with static slices + selects only
    (reshape-free, so it lowers cleanly in Mosaic):
        out[i, j] = ext[i, (T-1-i) + j],  ext[i] = [p[i, :], 0, p[i+1, :]]
    """
    T = p.shape[0]
    zero_col = jnp.zeros((T, 1), p.dtype)
    # p_next[i] = p[i+1]; the last row of p_next is never read.
    p_next = jnp.concatenate([p[1:, :], jnp.zeros((1, T), p.dtype)], axis=0)
    ext = jnp.concatenate([p, zero_col, p_next], axis=-1)          # (T, 2T+1)
    row = jax.lax.broadcasted_iota(jnp.int32, (T, T), 0)
    out = jnp.zeros_like(p)
    for i in range(T):                    # static unroll (T is small)
        s = T - 1 - i
        out = jnp.where(row == i, ext[:, s:s + T], out)
    return out


# --------------------------------------------------------------------------
# Fused encoder-layer kernel (one grid step = one batch element)
# --------------------------------------------------------------------------
def _encoder_layer_kernel(
    x_ref, pe_ref,
    w_qkv_ref, b_qkv_ref, w_p_ref, ub_ref, vb_ref, w_o_ref, b_o_ref,
    g1_ref, b1_ref,
    w_ff1_ref, b_ff1_ref, w_ff2_ref, b_ff2_ref,
    g2_ref, b2_ref,
    o_ref,
    *, num_heads, head_dim,
):
    T, D = x_ref.shape
    H, dh = num_heads, head_dim
    scale = 1.0 / math.sqrt(dh)

    x = x_ref[...]                                                   # (T, D)

    # ---- fused q/k/v projection + positional projection (MXU) -------------
    qkv = jnp.dot(x, w_qkv_ref[...], preferred_element_type=jnp.float32)
    qkv = qkv + b_qkv_ref[...]                                       # (T, 3D)
    pe = jnp.dot(pe_ref[...], w_p_ref[...],
                 preferred_element_type=jnp.float32)                 # (T, D)

    q = qkv[:, :D]
    k = qkv[:, D:2 * D]
    v = qkv[:, 2 * D:]
    qu = q + ub_ref[...]            # content bias  (u), hoisted once
    qv = q + vb_ref[...]            # positional bias (v), hoisted once

    # ---- per-head relative attention; scores never leave VMEM -------------
    ctx_heads = []
    for h in range(H):              # static unroll over heads
        sl = slice(h * dh, (h + 1) * dh)
        k_h, v_h, p_h = k[:, sl], v[:, sl], pe[:, sl]
        content = jax.lax.dot_general(qu[:, sl], k_h, _DN_CONTRACT_LAST,
                                      preferred_element_type=jnp.float32)
        pos = jax.lax.dot_general(qv[:, sl], p_h, _DN_CONTRACT_LAST,
                                  preferred_element_type=jnp.float32)
        s = (content + _rel_shift_rows(pos)) * scale                 # (T, T)
        m = jnp.max(s, axis=-1, keepdims=True)
        e = jnp.exp(s - m)
        attn = e * pl.reciprocal(jnp.sum(e, axis=-1, keepdims=True),
                                 approx=True)
        ctx_heads.append(jnp.dot(attn, v_h,
                                 preferred_element_type=jnp.float32))
    ctx = jnp.concatenate(ctx_heads, axis=-1)                        # (T, D)

    attn_out = (jnp.dot(ctx, w_o_ref[...],
                        preferred_element_type=jnp.float32) + b_o_ref[...])

    # ---- residual + norm1 --------------------------------------------------
    x1 = _layernorm(attn_out + x, g1_ref[...], b1_ref[...])

    # ---- feed-forward: norm2(gelu(ff2(ff1(x1))) + x1); 192-wide stays in VMEM
    y = (jnp.dot(x1, w_ff1_ref[...],
                 preferred_element_type=jnp.float32) + b_ff1_ref[...])
    y = (jnp.dot(y, w_ff2_ref[...],
                 preferred_element_type=jnp.float32) + b_ff2_ref[...])
    y = 0.5 * y * (1.0 + jax.lax.erf(y * (1.0 / math.sqrt(2.0))))    # exact GELU
    o_ref[...] = _layernorm(y + x1, g2_ref[...], b2_ref[...])


def encoder_layer(x, pos_enc, p):
    B, T, D = x.shape
    H, dh = NUM_HEADS, HEAD_DIM
    F = p["w_ff1"].shape[1]

    # Fuse q/k/v projections into one (D, 3D) matmul.
    w_qkv = jnp.concatenate([p["wq"], p["wk"], p["wv"]], axis=1)     # (D, 3D)
    b_qkv = jnp.concatenate([p["bq"], p["bk"], p["bv"]]).reshape(1, 3 * D)
    row = lambda a: a.reshape(1, -1)

    kernel = functools.partial(_encoder_layer_kernel,
                               num_heads=H, head_dim=dh)

    def full(shape):
        return pl.BlockSpec(shape, lambda b, _n=len(shape): (0,) * _n)

    act_spec = pl.BlockSpec((None, T, D), lambda b: (b, 0, 0))

    return pl.pallas_call(
        kernel,
        out_shape=jax.ShapeDtypeStruct((B, T, D), jnp.float32),
        grid=(B,),
        in_specs=[
            act_spec,                        # x
            act_spec,                        # pos_enc
            full((D, 3 * D)),                # w_qkv
            full((1, 3 * D)),                # b_qkv
            full((D, D)),                    # w_pos
            full((1, D)),                    # u bias (flattened per head)
            full((1, D)),                    # v bias (flattened per head)
            full((D, D)),                    # w_o
            full((1, D)),                    # b_o
            full((1, D)), full((1, D)),      # ln1 gamma / beta
            full((D, F)), full((1, F)),      # ff1
            full((F, D)), full((1, D)),      # ff2
            full((1, D)), full((1, D)),      # ln2 gamma / beta
        ],
        out_specs=act_spec,
        compiler_params=pltpu.CompilerParams(
            dimension_semantics=("parallel",)),
    )(x, pos_enc, w_qkv, b_qkv, p["wp"], row(p["u"]), row(p["v"]),
      p["wo"], row(p["bo"]), row(p["g1"]), row(p["b1"]),
      p["w_ff1"], row(p["b_ff1"]), p["w_ff2"], row(p["b_ff2"]),
      row(p["g2"]), row(p["b2"]))


# --------------------------------------------------------------------------
# Parameters + pure-JAX reference (for sanity check)
# --------------------------------------------------------------------------
def init_params(key):
    D, F, H, dh = D_MODEL, D_FF, NUM_HEADS, HEAD_DIM
    ks = jax.random.split(key, 20)

    def w(k, shape, scale=0.02):
        return scale * jax.random.normal(k, shape, jnp.float32)

    return dict(
        wq=w(ks[0], (D, D)), bq=w(ks[1], (D,)),
        wk=w(ks[2], (D, D)), bk=w(ks[3], (D,)),
        wv=w(ks[4], (D, D)), bv=w(ks[5], (D,)),
        wp=w(ks[6], (D, D)),
        u=w(ks[7], (H, dh)), v=w(ks[8], (H, dh)),
        wo=w(ks[9], (D, D)), bo=w(ks[10], (D,)),
        g1=1.0 + w(ks[11], (D,), 0.05), b1=w(ks[12], (D,), 0.05),
        g2=1.0 + w(ks[13], (D,), 0.05), b2=w(ks[14], (D,), 0.05),
        w_ff1=w(ks[15], (D, F)), b_ff1=w(ks[16], (F,)),
        w_ff2=w(ks[17], (F, D)), b_ff2=w(ks[18], (D,)),
    )


def relative_shift(pos_score):
    """Transformer-XL relative shift (reference: pad/reshape/slice)."""
    B, H, T1, T2 = pos_score.shape
    zeros = jnp.zeros((B, H, T1, 1), pos_score.dtype)
    padded = jnp.concatenate([zeros, pos_score], axis=-1)
    padded = padded.reshape(B, H, T2 + 1, T1)
    return padded[:, :, 1:].reshape(B, H, T1, T2)


def _layernorm_ref(x, g, b):
    mu = jnp.mean(x, -1, keepdims=True)
    var = jnp.mean((x - mu) ** 2, -1, keepdims=True)
    return (x - mu) * jax.lax.rsqrt(var + LN_EPS) * g + b


def reference_forward(x, pos_enc, p):
    B, T, D = x.shape
    H, dh = NUM_HEADS, HEAD_DIM
    hp = jax.lax.Precision.HIGHEST

    def lin(z, w, b):
        return jnp.einsum("btd,de->bte", z, w, precision=hp) + b

    def heads(z):
        return z.reshape(B, T, H, dh).transpose(0, 2, 1, 3)

    q = heads(lin(x, p["wq"], p["bq"]))
    k = heads(lin(x, p["wk"], p["bk"]))
    v = heads(lin(x, p["wv"], p["bv"]))
    pe = heads(jnp.einsum("btd,de->bte", pos_enc, p["wp"], precision=hp))

    content = jnp.einsum("bhtd,bhsd->bhts", q + p["u"][None, :, None, :], k,
                         precision=hp)
    pos_score = jnp.einsum("bhtd,bhsd->bhts", q + p["v"][None, :, None, :], pe,
                           precision=hp)
    pos_score = relative_shift(pos_score)
    score = (content + pos_score) / math.sqrt(dh)
    attn = jax.nn.softmax(score, axis=-1)
    ctx = jnp.einsum("bhts,bhsd->bhtd", attn, v, precision=hp)
    ctx = ctx.transpose(0, 2, 1, 3).reshape(B, T, D)
    attn_out = lin(ctx, p["wo"], p["bo"])

    x1 = _layernorm_ref(attn_out + x, p["g1"], p["b1"])
    y = lin(x1, p["w_ff1"], p["b_ff1"])
    y = lin(y, p["w_ff2"], p["b_ff2"])
    y = jax.nn.gelu(y, approximate=False)
    return _layernorm_ref(y + x1, p["g2"], p["b2"])


# --------------------------------------------------------------------------
if __name__ == "__main__":
    key = jax.random.PRNGKey(0)
    B, T = 2, 16
    kx, kp, kparams = jax.random.split(key, 3)
    x = jax.random.normal(kx, (B, T, D_MODEL), jnp.float32)
    pos_enc = jax.random.normal(kp, (B, T, D_MODEL), jnp.float32)
    params = init_params(kparams)

    out = jax.block_until_ready(encoder_layer(x, pos_enc, params))
    ref = jax.block_until_ready(reference_forward(x, pos_enc, params))

    assert out.shape == (B, T, D_MODEL)
    assert bool(jnp.all(jnp.isfinite(out)))
    max_err = float(jnp.max(jnp.abs(out - ref)))
    if max_err > 5e-2:
        raise AssertionError(f"Pallas output mismatch vs reference: {max_err}")
    print("KERNEL_OK")
</pallas_src>

<mosaic_0001>
module attributes {stable_mosaic.version = 11 : i64} {
  func.func @_encoder_layer_kernel(%arg0: i32, %arg1: memref<1x16x128xf32, #tpu.memory_space<vmem>>, %arg2: memref<1x16x128xf32, #tpu.memory_space<vmem>>, %arg3: memref<128x384xf32, #tpu.memory_space<vmem>>, %arg4: memref<1x384xf32, #tpu.memory_space<vmem>>, %arg5: memref<128x128xf32, #tpu.memory_space<vmem>>, %arg6: memref<1x128xf32, #tpu.memory_space<vmem>>, %arg7: memref<1x128xf32, #tpu.memory_space<vmem>>, %arg8: memref<128x128xf32, #tpu.memory_space<vmem>>, %arg9: memref<1x128xf32, #tpu.memory_space<vmem>>, %arg10: memref<1x128xf32, #tpu.memory_space<vmem>>, %arg11: memref<1x128xf32, #tpu.memory_space<vmem>>, %arg12: memref<128x192xf32, #tpu.memory_space<vmem>>, %arg13: memref<1x192xf32, #tpu.memory_space<vmem>>, %arg14: memref<192x128xf32, #tpu.memory_space<vmem>>, %arg15: memref<1x128xf32, #tpu.memory_space<vmem>>, %arg16: memref<1x128xf32, #tpu.memory_space<vmem>>, %arg17: memref<1x128xf32, #tpu.memory_space<vmem>>, %arg18: memref<1x16x128xf32, #tpu.memory_space<vmem>>) attributes {dimension_semantics = [#tpu.dimension_semantics<parallel>], iteration_bounds = array<i64: 2>, scalar_prefetch = 0 : i64, scratch_operands = 0 : i64, tpu.core_type = #tpu.core_type<tc>, window_params = [{transform_indices = @transform_0, window_bounds = array<i64: 1, 16, 128>}, {transform_indices = @transform_1, window_bounds = array<i64: 1, 16, 128>}, {pipeline_mode = #tpu.pipeline_mode<synchronous>, transform_indices = @transform_2, window_bounds = array<i64: 128, 384>}, {pipeline_mode = #tpu.pipeline_mode<synchronous>, transform_indices = @transform_3, window_bounds = array<i64: 1, 384>}, {pipeline_mode = #tpu.pipeline_mode<synchronous>, transform_indices = @transform_4, window_bounds = array<i64: 128, 128>}, {pipeline_mode = #tpu.pipeline_mode<synchronous>, transform_indices = @transform_5, window_bounds = array<i64: 1, 128>}, {pipeline_mode = #tpu.pipeline_mode<synchronous>, transform_indices = @transform_6, window_bounds = array<i64: 1, 128>}, {pipeline_mode = #tpu.pipeline_mode<synchronous>, transform_indices = @transform_7, window_bounds = array<i64: 128, 128>}, {pipeline_mode = #tpu.pipeline_mode<synchronous>, transform_indices = @transform_8, window_bounds = array<i64: 1, 128>}, {pipeline_mode = #tpu.pipeline_mode<synchronous>, transform_indices = @transform_9, window_bounds = array<i64: 1, 128>}, {pipeline_mode = #tpu.pipeline_mode<synchronous>, transform_indices = @transform_10, window_bounds = array<i64: 1, 128>}, {pipeline_mode = #tpu.pipeline_mode<synchronous>, transform_indices = @transform_11, window_bounds = array<i64: 128, 192>}, {pipeline_mode = #tpu.pipeline_mode<synchronous>, transform_indices = @transform_12, window_bounds = array<i64: 1, 192>}, {pipeline_mode = #tpu.pipeline_mode<synchronous>, transform_indices = @transform_13, window_bounds = array<i64: 192, 128>}, {pipeline_mode = #tpu.pipeline_mode<synchronous>, transform_indices = @transform_14, window_bounds = array<i64: 1, 128>}, {pipeline_mode = #tpu.pipeline_mode<synchronous>, transform_indices = @transform_15, window_bounds = array<i64: 1, 128>}, {pipeline_mode = #tpu.pipeline_mode<synchronous>, transform_indices = @transform_16, window_bounds = array<i64: 1, 128>}, {transform_indices = @transform_17, window_bounds = array<i64: 1, 16, 128>}]} {
    %c0 = arith.constant 0 : index
    %c0_0 = arith.constant 0 : index
    %c0_1 = arith.constant 0 : index
    %0 = vector.load %arg1[%c0, %c0_0, %c0_1] : memref<1x16x128xf32, #tpu.memory_space<vmem>>, vector<1x16x128xf32>
    %1 = vector.shape_cast %0 : vector<1x16x128xf32> to vector<16x128xf32>
    %c0_2 = arith.constant 0 : index
    %c0_3 = arith.constant 0 : index
    %2 = vector.load %arg3[%c0_2, %c0_3] : memref<128x384xf32, #tpu.memory_space<vmem>>, vector<128x384xf32>
    %cst = arith.constant dense<0.000000e+00> : vector<16x384xf32>
    %3 = tpu.matmul %1, %2, %cst {dimension_numbers = #tpu.dot_dimension_numbers<[1], [0], [0], [1], [0, 0, 1, 1], [], []>} : vector<16x128xf32>, vector<128x384xf32>, vector<16x384xf32> -> vector<16x384xf32>
    %c0_4 = arith.constant 0 : index
    %c0_5 = arith.constant 0 : index
    %4 = vector.load %arg4[%c0_4, %c0_5] : memref<1x384xf32, #tpu.memory_space<vmem>>, vector<1x384xf32>
    %5 = vector.broadcast %4 : vector<1x384xf32> to vector<16x384xf32>
    %6 = arith.addf %3, %5 : vector<16x384xf32>
    %c0_6 = arith.constant 0 : index
    %c0_7 = arith.constant 0 : index
    %c0_8 = arith.constant 0 : index
    %7 = vector.load %arg2[%c0_6, %c0_7, %c0_8] : memref<1x16x128xf32, #tpu.memory_space<vmem>>, vector<1x16x128xf32>
    %8 = vector.shape_cast %7 : vector<1x16x128xf32> to vector<16x128xf32>
    %c0_9 = arith.constant 0 : index
    %c0_10 = arith.constant 0 : index
    %9 = vector.load %arg5[%c0_9, %c0_10] : memref<128x128xf32, #tpu.memory_space<vmem>>, vector<128x128xf32>
    %cst_11 = arith.constant dense<0.000000e+00> : vector<16x128xf32>
    %10 = tpu.matmul %8, %9, %cst_11 {dimension_numbers = #tpu.dot_dimension_numbers<[1], [0], [0], [1], [0, 0, 1, 1], [], []>} : vector<16x128xf32>, vector<128x128xf32>, vector<16x128xf32> -> vector<16x128xf32>
    %11 = vector.extract_strided_slice %6 {offsets = [0, 0], sizes = [16, 128], strides = [1, 1]} : vector<16x384xf32> to vector<16x128xf32>
    %12 = vector.extract_strided_slice %6 {offsets = [0, 128], sizes = [16, 128], strides = [1, 1]} : vector<16x384xf32> to vector<16x128xf32>
    %13 = vector.extract_strided_slice %6 {offsets = [0, 256], sizes = [16, 128], strides = [1, 1]} : vector<16x384xf32> to vector<16x128xf32>
    %c0_12 = arith.constant 0 : index
    %c0_13 = arith.constant 0 : index
    %14 = vector.load %arg6[%c0_12, %c0_13] : memref<1x128xf32, #tpu.memory_space<vmem>>, vector<1x128xf32>
    %15 = vector.broadcast %14 : vector<1x128xf32> to vector<16x128xf32>
    %16 = arith.addf %11, %15 : vector<16x128xf32>
    %c0_14 = arith.constant 0 : index
    %c0_15 = arith.constant 0 : index
    %17 = vector.load %arg7[%c0_14, %c0_15] : memref<1x128xf32, #tpu.memory_space<vmem>>, vector<1x128xf32>
    %18 = vector.broadcast %17 : vector<1x128xf32> to vector<16x128xf32>
    %19 = arith.addf %11, %18 : vector<16x128xf32>
    %20 = vector.extract_strided_slice %12 {offsets = [0, 0], sizes = [16, 32], strides = [1, 1]} : vector<16x128xf32> to vector<16x32xf32>
    %21 = vector.extract_strided_slice %13 {offsets = [0, 0], sizes = [16, 32], strides = [1, 1]} : vector<16x128xf32> to vector<16x32xf32>
    %22 = vector.extract_strided_slice %10 {offsets = [0, 0], sizes = [16, 32], strides = [1, 1]} : vector<16x128xf32> to vector<16x32xf32>
    %23 = vector.extract_strided_slice %16 {offsets = [0, 0], sizes = [16, 32], strides = [1, 1]} : vector<16x128xf32> to vector<16x32xf32>
    %cst_16 = arith.constant dense<0.000000e+00> : vector<16x16xf32>
    %24 = tpu.matmul %23, %20, %cst_16 {dimension_numbers = #tpu.dot_dimension_numbers<[1], [1], [0], [0], [0, 0, 1, 0], [], []>} : vector<16x32xf32>, vector<16x32xf32>, vector<16x16xf32> -> vector<16x16xf32>
    %25 = vector.extract_strided_slice %19 {offsets = [0, 0], sizes = [16, 32], strides = [1, 1]} : vector<16x128xf32> to vector<16x32xf32>
    %cst_17 = arith.constant dense<0.000000e+00> : vector<16x16xf32>
    %26 = tpu.matmul %25, %22, %cst_17 {dimension_numbers = #tpu.dot_dimension_numbers<[1], [1], [0], [0], [0, 0, 1, 0], [], []>} : vector<16x32xf32>, vector<16x32xf32>, vector<16x16xf32> -> vector<16x16xf32>
    %cst_18 = arith.constant 0.000000e+00 : f32
    %27 = vector.broadcast %cst_18 : f32 to vector<16x1xf32>
    %28 = vector.extract_strided_slice %26 {offsets = [1, 0], sizes = [15, 16], strides = [1, 1]} : vector<16x16xf32> to vector<15x16xf32>
    %cst_19 = arith.constant 0.000000e+00 : f32
    %29 = vector.broadcast %cst_19 : f32 to vector<1x16xf32>
    %30 = tpu.concatenate %28, %29 in 0 : vector<15x16xf32>, vector<1x16xf32> -> vector<16x16xf32>
    %31 = tpu.concatenate %26, %27, %30 in 1 : vector<16x16xf32>, vector<16x1xf32>, vector<16x16xf32> -> vector<16x33xf32>
    %32 = tpu.iota {dimensions = array<i32: 0>} : vector<16x16xi32>
    %cst_20 = arith.constant 0.000000e+00 : f32
    %33 = vector.broadcast %cst_20 : f32 to vector<16x16xf32>
    %c0_i32 = arith.constant 0 : i32
    %34 = vector.broadcast %c0_i32 : i32 to vector<16x16xi32>
    %35 = arith.cmpi eq, %32, %34 : vector<16x16xi32>
    %36 = vector.extract_strided_slice %31 {offsets = [0, 15], sizes = [16, 16], strides = [1, 1]} : vector<16x33xf32> to vector<16x16xf32>
    %37 = arith.select %35, %36, %33 : vector<16x16xi1>, vector<16x16xf32>
    %c1_i32 = arith.constant 1 : i32
    %38 = vector.broadcast %c1_i32 : i32 to vector<16x16xi32>
    %39 = arith.cmpi eq, %32, %38 : vector<16x16xi32>
    %40 = vector.extract_strided_slice %31 {offsets = [0, 14], sizes = [16, 16], strides = [1, 1]} : vector<16x33xf32> to vector<16x16xf32>
    %41 = arith.select %39, %40, %37 : vector<16x16xi1>, vector<16x16xf32>
    %c2_i32 = arith.constant 2 : i32
    %42 = vector.broadcast %c2_i32 : i32 to vector<16x16xi32>
    %43 = arith.cmpi eq, %32, %42 : vector<16x16xi32>
    %44 = vector.extract_strided_slice %31 {offsets = [0, 13], sizes = [16, 16], strides = [1, 1]} : vector<16x33xf32> to vector<16x16xf32>
    %45 = arith.select %43, %44, %41 : vector<16x16xi1>, vector<16x16xf32>
    %c3_i32 = arith.constant 3 : i32
    %46 = vector.broadcast %c3_i32 : i32 to vector<16x16xi32>
    %47 = arith.cmpi eq, %32, %46 : vector<16x16xi32>
    %48 = vector.extract_strided_slice %31 {offsets = [0, 12], sizes = [16, 16], strides = [1, 1]} : vector<16x33xf32> to vector<16x16xf32>
    %49 = arith.select %47, %48, %45 : vector<16x16xi1>, vector<16x16xf32>
    %c4_i32 = arith.constant 4 : i32
    %50 = vector.broadcast %c4_i32 : i32 to vector<16x16xi32>
    %51 = arith.cmpi eq, %32, %50 : vector<16x16xi32>
    %52 = vector.extract_strided_slice %31 {offsets = [0, 11], sizes = [16, 16], strides = [1, 1]} : vector<16x33xf32> to vector<16x16xf32>
    %53 = arith.select %51, %52, %49 : vector<16x16xi1>, vector<16x16xf32>
    %c5_i32 = arith.constant 5 : i32
    %54 = vector.broadcast %c5_i32 : i32 to vector<16x16xi32>
    %55 = arith.cmpi eq, %32, %54 : vector<16x16xi32>
    %56 = vector.extract_strided_slice %31 {offsets = [0, 10], sizes = [16, 16], strides = [1, 1]} : vector<16x33xf32> to vector<16x16xf32>
    %57 = arith.select %55, %56, %53 : vector<16x16xi1>, vector<16x16xf32>
    %c6_i32 = arith.constant 6 : i32
    %58 = vector.broadcast %c6_i32 : i32 to vector<16x16xi32>
    %59 = arith.cmpi eq, %32, %58 : vector<16x16xi32>
    %60 = vector.extract_strided_slice %31 {offsets = [0, 9], sizes = [16, 16], strides = [1, 1]} : vector<16x33xf32> to vector<16x16xf32>
    %61 = arith.select %59, %60, %57 : vector<16x16xi1>, vector<16x16xf32>
    %c7_i32 = arith.constant 7 : i32
    %62 = vector.broadcast %c7_i32 : i32 to vector<16x16xi32>
    %63 = arith.cmpi eq, %32, %62 : vector<16x16xi32>
    %64 = vector.extract_strided_slice %31 {offsets = [0, 8], sizes = [16, 16], strides = [1, 1]} : vector<16x33xf32> to vector<16x16xf32>
    %65 = arith.select %63, %64, %61 : vector<16x16xi1>, vector<16x16xf32>
    %c8_i32 = arith.constant 8 : i32
    %66 = vector.broadcast %c8_i32 : i32 to vector<16x16xi32>
    %67 = arith.cmpi eq, %32, %66 : vector<16x16xi32>
    %68 = vector.extract_strided_slice %31 {offsets = [0, 7], sizes = [16, 16], strides = [1, 1]} : vector<16x33xf32> to vector<16x16xf32>
    %69 = arith.select %67, %68, %65 : vector<16x16xi1>, vector<16x16xf32>
    %c9_i32 = arith.constant 9 : i32
    %70 = vector.broadcast %c9_i32 : i32 to vector<16x16xi32>
    %71 = arith.cmpi eq, %32, %70 : vector<16x16xi32>
    %72 = vector.extract_strided_slice %31 {offsets = [0, 6], sizes = [16, 16], strides = [1, 1]} : vector<16x33xf32> to vector<16x16xf32>
    %73 = arith.select %71, %72, %69 : vector<16x16xi1>, vector<16x16xf32>
    %c10_i32 = arith.constant 10 : i32
    %74 = vector.broadcast %c10_i32 : i32 to vector<16x16xi32>
    %75 = arith.cmpi eq, %32, %74 : vector<16x16xi32>
    %76 = vector.extract_strided_slice %31 {offsets = [0, 5], sizes = [16, 16], strides = [1, 1]} : vector<16x33xf32> to vector<16x16xf32>
    %77 = arith.select %75, %76, %73 : vector<16x16xi1>, vector<16x16xf32>
    %c11_i32 = arith.constant 11 : i32
    %78 = vector.broadcast %c11_i32 : i32 to vector<16x16xi32>
    %79 = arith.cmpi eq, %32, %78 : vector<16x16xi32>
    %80 = vector.extract_strided_slice %31 {offsets = [0, 4], sizes = [16, 16], strides = [1, 1]} : vector<16x33xf32> to vector<16x16xf32>
    %81 = arith.select %79, %80, %77 : vector<16x16xi1>, vector<16x16xf32>
    %c12_i32 = arith.constant 12 : i32
    %82 = vector.broadcast %c12_i32 : i32 to vector<16x16xi32>
    %83 = arith.cmpi eq, %32, %82 : vector<16x16xi32>
    %84 = vector.extract_strided_slice %31 {offsets = [0, 3], sizes = [16, 16], strides = [1, 1]} : vector<16x33xf32> to vector<16x16xf32>
    %85 = arith.select %83, %84, %81 : vector<16x16xi1>, vector<16x16xf32>
    %c13_i32 = arith.constant 13 : i32
    %86 = vector.broadcast %c13_i32 : i32 to vector<16x16xi32>
    %87 = arith.cmpi eq, %32, %86 : vector<16x16xi32>
    %88 = vector.extract_strided_slice %31 {offsets = [0, 2], sizes = [16, 16], strides = [1, 1]} : vector<16x33xf32> to vector<16x16xf32>
    %89 = arith.select %87, %88, %85 : vector<16x16xi1>, vector<16x16xf32>
    %c14_i32 = arith.constant 14 : i32
    %90 = vector.broadcast %c14_i32 : i32 to vector<16x16xi32>
    %91 = arith.cmpi eq, %32, %90 : vector<16x16xi32>
    %92 = vector.extract_strided_slice %31 {offsets = [0, 1], sizes = [16, 16], strides = [1, 1]} : vector<16x33xf32> to vector<16x16xf32>
    %93 = arith.select %91, %92, %89 : vector<16x16xi1>, vector<16x16xf32>
    %c15_i32 = arith.constant 15 : i32
    %94 = vector.broadcast %c15_i32 : i32 to vector<16x16xi32>
    %95 = arith.cmpi eq, %32, %94 : vector<16x16xi32>
    %96 = vector.extract_strided_slice %31 {offsets = [0, 0], sizes = [16, 16], strides = [1, 1]} : vector<16x33xf32> to vector<16x16xf32>
    %97 = arith.select %95, %96, %93 : vector<16x16xi1>, vector<16x16xf32>
    %98 = arith.addf %24, %97 : vector<16x16xf32>
    %cst_21 = arith.constant 0.176776692 : f32
    %99 = vector.broadcast %cst_21 : f32 to vector<16x16xf32>
    %100 = arith.mulf %98, %99 : vector<16x16xf32>
    %cst_22 = arith.constant dense<0xFF800000> : vector<16xf32>
    %101 = vector.multi_reduction <maximumf>, %100, %cst_22 [1] : vector<16x16xf32> to vector<16xf32>
    %102 = vector.shape_cast %101 : vector<16xf32> to vector<16x1xf32>
    %103 = vector.broadcast %102 : vector<16x1xf32> to vector<16x16xf32>
    %104 = arith.subf %100, %103 : vector<16x16xf32>
    %105 = math.exp %104 : vector<16x16xf32>
    %cst_23 = arith.constant dense<0.000000e+00> : vector<16xf32>
    %106 = vector.multi_reduction <add>, %105, %cst_23 [1] : vector<16x16xf32> to vector<16xf32>
    %107 = vector.shape_cast %106 : vector<16xf32> to vector<16x1xf32>
    %108 = tpu.reciprocal %107 {approx = true} : vector<16x1xf32> -> vector<16x1xf32>
    %109 = vector.broadcast %108 : vector<16x1xf32> to vector<16x16xf32>
    %110 = arith.mulf %105, %109 : vector<16x16xf32>
    %cst_24 = arith.constant dense<0.000000e+00> : vector<16x32xf32>
    %111 = tpu.matmul %110, %21, %cst_24 {dimension_numbers = #tpu.dot_dimension_numbers<[1], [0], [0], [1], [0, 0, 1, 1], [], []>} : vector<16x16xf32>, vector<16x32xf32>, vector<16x32xf32> -> vector<16x32xf32>
    %112 = vector.extract_strided_slice %12 {offsets = [0, 32], sizes = [16, 32], strides = [1, 1]} : vector<16x128xf32> to vector<16x32xf32>
    %113 = vector.extract_strided_slice %13 {offsets = [0, 32], sizes = [16, 32], strides = [1, 1]} : vector<16x128xf32> to vector<16x32xf32>
    %114 = vector.extract_strided_slice %10 {offsets = [0, 32], sizes = [16, 32], strides = [1, 1]} : vector<16x128xf32> to vector<16x32xf32>
    %115 = vector.extract_strided_slice %16 {offsets = [0, 32], sizes = [16, 32], strides = [1, 1]} : vector<16x128xf32> to vector<16x32xf32>
    %cst_25 = arith.constant dense<0.000000e+00> : vector<16x16xf32>
    %116 = tpu.matmul %115, %112, %cst_25 {dimension_numbers = #tpu.dot_dimension_numbers<[1], [1], [0], [0], [0, 0, 1, 0], [], []>} : vector<16x32xf32>, vector<16x32xf32>, vector<16x16xf32> -> vector<16x16xf32>
    %117 = vector.extract_strided_slice %19 {offsets = [0, 32], sizes = [16, 32], strides = [1, 1]} : vector<16x128xf32> to vector<16x32xf32>
    %cst_26 = arith.constant dense<0.000000e+00> : vector<16x16xf32>
    %118 = tpu.matmul %117, %114, %cst_26 {dimension_numbers = #tpu.dot_dimension_numbers<[1], [1], [0], [0], [0, 0, 1, 0], [], []>} : vector<16x32xf32>, vector<16x32xf32>, vector<16x16xf32> -> vector<16x16xf32>
    %cst_27 = arith.constant 0.000000e+00 : f32
    %119 = vector.broadcast %cst_27 : f32 to vector<16x1xf32>
    %120 = vector.extract_strided_slice %118 {offsets = [1, 0], sizes = [15, 16], strides = [1, 1]} : vector<16x16xf32> to vector<15x16xf32>
    %cst_28 = arith.constant 0.000000e+00 : f32
    %121 = vector.broadcast %cst_28 : f32 to vector<1x16xf32>
    %122 = tpu.concatenate %120, %121 in 0 : vector<15x16xf32>, vector<1x16xf32> -> vector<16x16xf32>
    %123 = tpu.concatenate %118, %119, %122 in 1 : vector<16x16xf32>, vector<16x1xf32>, vector<16x16xf32> -> vector<16x33xf32>
    %124 = tpu.iota {dimensions = array<i32: 0>} : vector<16x16xi32>
    %cst_29 = arith.constant 0.000000e+00 : f32
    %125 = vector.broadcast %cst_29 : f32 to vector<16x16xf32>
    %c0_i32_30 = arith.constant 0 : i32
    %126 = vector.broadcast %c0_i32_30 : i32 to vector<16x16xi32>
    %127 = arith.cmpi eq, %124, %126 : vector<16x16xi32>
    %128 = vector.extract_strided_slice %123 {offsets = [0, 15], sizes = [16, 16], strides = [1, 1]} : vector<16x33xf32> to vector<16x16xf32>
    %129 = arith.select %127, %128, %125 : vector<16x16xi1>, vector<16x16xf32>
    %c1_i32_31 = arith.constant 1 : i32
    %130 = vector.broadcast %c1_i32_31 : i32 to vector<16x16xi32>
    %131 = arith.cmpi eq, %124, %130 : vector<16x16xi32>
    %132 = vector.extract_strided_slice %123 {offsets = [0, 14], sizes = [16, 16], strides = [1, 1]} : vector<16x33xf32> to vector<16x16xf32>
    %133 = arith.select %131, %132, %129 : vector<16x16xi1>, vector<16x16xf32>
    %c2_i32_32 = arith.constant 2 : i32
    %134 = vector.broadcast %c2_i32_32 : i32 to vector<16x16xi32>
    %135 = arith.cmpi eq, %124, %134 : vector<16x16xi32>
    %136 = vector.extract_strided_slice %123 {offsets = [0, 13], sizes = [16, 16], strides = [1, 1]} : vector<16x33xf32> to vector<16x16xf32>
    %137 = arith.select %135, %136, %133 : vector<16x16xi1>, vector<16x16xf32>
    %c3_i32_33 = arith.constant 3 : i32
    %138 = vector.broadcast %c3_i32_33 : i32 to vector<16x16xi32>
    %139 = arith.cmpi eq, %124, %138 : vector<16x16xi32>
    %140 = vector.extract_strided_slice %123 {offsets = [0, 12], sizes = [16, 16], strides = [1, 1]} : vector<16x33xf32> to vector<16x16xf32>
    %141 = arith.select %139, %140, %137 : vector<16x16xi1>, vector<16x16xf32>
    %c4_i32_34 = arith.constant 4 : i32
    %142 = vector.broadcast %c4_i32_34 : i32 to vector<16x16xi32>
    %143 = arith.cmpi eq, %124, %142 : vector<16x16xi32>
    %144 = vector.extract_strided_slice %123 {offsets = [0, 11], sizes = [16, 16], strides = [1, 1]} : vector<16x33xf32> to vector<16x16xf32>
    %145 = arith.select %143, %144, %141 : vector<16x16xi1>, vector<16x16xf32>
    %c5_i32_35 = arith.constant 5 : i32
    %146 = vector.broadcast %c5_i32_35 : i32 to vector<16x16xi32>
    %147 = arith.cmpi eq, %124, %146 : vector<16x16xi32>
    %148 = vector.extract_strided_slice %123 {offsets = [0, 10], sizes = [16, 16], strides = [1, 1]} : vector<16x33xf32> to vector<16x16xf32>
    %149 = arith.select %147, %148, %145 : vector<16x16xi1>, vector<16x16xf32>
    %c6_i32_36 = arith.constant 6 : i32
    %150 = vector.broadcast %c6_i32_36 : i32 to vector<16x16xi32>
    %151 = arith.cmpi eq, %124, %150 : vector<16x16xi32>
    %152 = vector.extract_strided_slice %123 {offsets = [0, 9], sizes = [16, 16], strides = [1, 1]} : vector<16x33xf32> to vector<16x16xf32>
    %153 = arith.select %151, %152, %149 : vector<16x16xi1>, vector<16x16xf32>
    %c7_i32_37 = arith.constant 7 : i32
    %154 = vector.broadcast %c7_i32_37 : i32 to vector<16x16xi32>
    %155 = arith.cmpi eq, %124, %154 : vector<16x16xi32>
    %156 = vector.extract_strided_slice %123 {offsets = [0, 8], sizes = [16, 16], strides = [1, 1]} : vector<16x33xf32> to vector<16x16xf32>
    %157 = arith.select %155, %156, %153 : vector<16x16xi1>, vector<16x16xf32>
    %c8_i32_38 = arith.constant 8 : i32
    %158 = vector.broadcast %c8_i32_38 : i32 to vector<16x16xi32>
    %159 = arith.cmpi eq, %124, %158 : vector<16x16xi32>
    %160 = vector.extract_strided_slice %123 {offsets = [0, 7], sizes = [16, 16], strides = [1, 1]} : vector<16x33xf32> to vector<16x16xf32>
    %161 = arith.select %159, %160, %157 : vector<16x16xi1>, vector<16x16xf32>
    %c9_i32_39 = arith.constant 9 : i32
    %162 = vector.broadcast %c9_i32_39 : i32 to vector<16x16xi32>
    %163 = arith.cmpi eq, %124, %162 : vector<16x16xi32>
    %164 = vector.extract_strided_slice %123 {offsets = [0, 6], sizes = [16, 16], strides = [1, 1]} : vector<16x33xf32> to vector<16x16xf32>
    %165 = arith.select %163, %164, %161 : vector<16x16xi1>, vector<16x16xf32>
    %c10_i32_40 = arith.constant 10 : i32
    %166 = vector.broadcast %c10_i32_40 : i32 to vector<16x16xi32>
    %167 = arith.cmpi eq, %124, %166 : vector<16x16xi32>
    %168 = vector.extract_strided_slice %123 {offsets = [0, 5], sizes = [16, 16], strides = [1, 1]} : vector<16x33xf32> to vector<16x16xf32>
    %169 = arith.select %167, %168, %165 : vector<16x16xi1>, vector<16x16xf32>
    %c11_i32_41 = arith.constant 11 : i32
    %170 = vector.broadcast %c11_i32_41 : i32 to vector<16x16xi32>
    %171 = arith.cmpi eq, %124, %170 : vector<16x16xi32>
    %172 = vector.extract_strided_slice %123 {offsets = [0, 4], sizes = [16, 16], strides = [1, 1]} : vector<16x33xf32> to vector<16x16xf32>
    %173 = arith.select %171, %172, %169 : vector<16x16xi1>, vector<16x16xf32>
    %c12_i32_42 = arith.constant 12 : i32
    %174 = vector.broadcast %c12_i32_42 : i32 to vector<16x16xi32>
    %175 = arith.cmpi eq, %124, %174 : vector<16x16xi32>
    %176 = vector.extract_strided_slice %123 {offsets = [0, 3], sizes = [16, 16], strides = [1, 1]} : vector<16x33xf32> to vector<16x16xf32>
    %177 = arith.select %175, %176, %173 : vector<16x16xi1>, vector<16x16xf32>
    %c13_i32_43 = arith.constant 13 : i32
    %178 = vector.broadcast %c13_i32_43 : i32 to vector<16x16xi32>
    %179 = arith.cmpi eq, %124, %178 : vector<16x16xi32>
    %180 = vector.extract_strided_slice %123 {offsets = [0, 2], sizes = [16, 16], strides = [1, 1]} : vector<16x33xf32> to vector<16x16xf32>
    %181 = arith.select %179, %180, %177 : vector<16x16xi1>, vector<16x16xf32>
    %c14_i32_44 = arith.constant 14 : i32
    %182 = vector.broadcast %c14_i32_44 : i32 to vector<16x16xi32>
    %183 = arith.cmpi eq, %124, %182 : vector<16x16xi32>
    %184 = vector.extract_strided_slice %123 {offsets = [0, 1], sizes = [16, 16], strides = [1, 1]} : vector<16x33xf32> to vector<16x16xf32>
    %185 = arith.select %183, %184, %181 : vector<16x16xi1>, vector<16x16xf32>
    %c15_i32_45 = arith.constant 15 : i32
    %186 = vector.broadcast %c15_i32_45 : i32 to vector<16x16xi32>
    %187 = arith.cmpi eq, %124, %186 : vector<16x16xi32>
    %188 = vector.extract_strided_slice %123 {offsets = [0, 0], sizes = [16, 16], strides = [1, 1]} : vector<16x33xf32> to vector<16x16xf32>
    %189 = arith.select %187, %188, %185 : vector<16x16xi1>, vector<16x16xf32>
    %190 = arith.addf %116, %189 : vector<16x16xf32>
    %cst_46 = arith.constant 0.176776692 : f32
    %191 = vector.broadcast %cst_46 : f32 to vector<16x16xf32>
    %192 = arith.mulf %190, %191 : vector<16x16xf32>
    %cst_47 = arith.constant dense<0xFF800000> : vector<16xf32>
    %193 = vector.multi_reduction <maximumf>, %192, %cst_47 [1] : vector<16x16xf32> to vector<16xf32>
    %194 = vector.shape_cast %193 : vector<16xf32> to vector<16x1xf32>
    %195 = vector.broadcast %194 : vector<16x1xf32> to vector<16x16xf32>
    %196 = arith.subf %192, %195 : vector<16x16xf32>
    %197 = math.exp %196 : vector<16x16xf32>
    %cst_48 = arith.constant dense<0.000000e+00> : vector<16xf32>
    %198 = vector.multi_reduction <add>, %197, %cst_48 [1] : vector<16x16xf32> to vector<16xf32>
    %199 = vector.shape_cast %198 : vector<16xf32> to vector<16x1xf32>
    %200 = tpu.reciprocal %199 {approx = true} : vector<16x1xf32> -> vector<16x1xf32>
    %201 = vector.broadcast %200 : vector<16x1xf32> to vector<16x16xf32>
    %202 = arith.mulf %197, %201 : vector<16x16xf32>
    %cst_49 = arith.constant dense<0.000000e+00> : vector<16x32xf32>
    %203 = tpu.matmul %202, %113, %cst_49 {dimension_numbers = #tpu.dot_dimension_numbers<[1], [0], [0], [1], [0, 0, 1, 1], [], []>} : vector<16x16xf32>, vector<16x32xf32>, vector<16x32xf32> -> vector<16x32xf32>
    %204 = vector.extract_strided_slice %12 {offsets = [0, 64], sizes = [16, 32], strides = [1, 1]} : vector<16x128xf32> to vector<16x32xf32>
    %205 = vector.extract_strided_slice %13 {offsets = [0, 64], sizes = [16, 32], strides = [1, 1]} : vector<16x128xf32> to vector<16x32xf32>
    %206 = vector.extract_strided_slice %10 {offsets = [0, 64], sizes = [16, 32], strides = [1, 1]} : vector<16x128xf32> to vector<16x32xf32>
    %207 = vector.extract_strided_slice %16 {offsets = [0, 64], sizes = [16, 32], strides = [1, 1]} : vector<16x128xf32> to vector<16x32xf32>
    %cst_50 = arith.constant dense<0.000000e+00> : vector<16x16xf32>
    %208 = tpu.matmul %207, %204, %cst_50 {dimension_numbers = #tpu.dot_dimension_numbers<[1], [1], [0], [0], [0, 0, 1, 0], [], []>} : vector<16x32xf32>, vector<16x32xf32>, vector<16x16xf32> -> vector<16x16xf32>
    %209 = vector.extract_strided_slice %19 {offsets = [0, 64], sizes = [16, 32], strides = [1, 1]} : vector<16x128xf32> to vector<16x32xf32>
    %cst_51 = arith.constant dense<0.000000e+00> : vector<16x16xf32>
    %210 = tpu.matmul %209, %206, %cst_51 {dimension_numbers = #tpu.dot_dimension_numbers<[1], [1], [0], [0], [0, 0, 1, 0], [], []>} : vector<16x32xf32>, vector<16x32xf32>, vector<16x16xf32> -> vector<16x16xf32>
    %cst_52 = arith.constant 0.000000e+00 : f32
    %211 = vector.broadcast %cst_52 : f32 to vector<16x1xf32>
    %212 = vector.extract_strided_slice %210 {offsets = [1, 0], sizes = [15, 16], strides = [1, 1]} : vector<16x16xf32> to vector<15x16xf32>
    %cst_53 = arith.constant 0.000000e+00 : f32
    %213 = vector.broadcast %cst_53 : f32 to vector<1x16xf32>
    %214 = tpu.concatenate %212, %213 in 0 : vector<15x16xf32>, vector<1x16xf32> -> vector<16x16xf32>
    %215 = tpu.concatenate %210, %211, %214 in 1 : vector<16x16xf32>, vector<16x1xf32>, vector<16x16xf32> -> vector<16x33xf32>
    %216 = tpu.iota {dimensions = array<i32: 0>} : vector<16x16xi32>
    %cst_54 = arith.constant 0.000000e+00 : f32
    %217 = vector.broadcast %cst_54 : f32 to vector<16x16xf32>
    %c0_i32_55 = arith.constant 0 : i32
    %218 = vector.broadcast %c0_i32_55 : i32 to vector<16x16xi32>
    %219 = arith.cmpi eq, %216, %218 : vector<16x16xi32>
    %220 = vector.extract_strided_slice %215 {offsets = [0, 15], sizes = [16, 16], strides = [1, 1]} : vector<16x33xf32> to vector<16x16xf32>
    %221 = arith.select %219, %220, %217 : vector<16x16xi1>, vector<16x16xf32>
    %c1_i32_56 = arith.constant 1 : i32
    %222 = vector.broadcast %c1_i32_56 : i32 to vector<16x16xi32>
    %223 = arith.cmpi eq, %216, %222 : vector<16x16xi32>
    %224 = vector.extract_strided_slice %215 {offsets = [0, 14], sizes = [16, 16], strides = [1, 1]} : vector<16x33xf32> to vector<16x16xf32>
    %225 = arith.select %223, %224, %221 : vector<16x16xi1>, vector<16x16xf32>
    %c2_i32_57 = arith.constant 2 : i32
    %226 = vector.broadcast %c2_i32_57 : i32 to vector<16x16xi32>
    %227 = arith.cmpi eq, %216, %226 : vector<16x16xi32>
    %228 = vector.extract_strided_slice %215 {offsets = [0, 13], sizes = [16, 16], strides = [1, 1]} : vector<16x33xf32> to vector<16x16xf32>
    %229 = arith.select %227, %228, %225 : vector<16x16xi1>, vector<16x16xf32>
    %c3_i32_58 = arith.constant 3 : i32
    %230 = vector.broadcast %c3_i32_58 : i32 to vector<16x16xi32>
    %231 = arith.cmpi eq, %216, %230 : vector<16x16xi32>
    %232 = vector.extract_strided_slice %215 {offsets = [0, 12], sizes = [16, 16], strides = [1, 1]} : vector<16x33xf32> to vector<16x16xf32>
    %233 = arith.select %231, %232, %229 : vector<16x16xi1>, vector<16x16xf32>
    %c4_i32_59 = arith.constant 4 : i32
    %234 = vector.broadcast %c4_i32_59 : i32 to vector<16x16xi32>
    %235 = arith.cmpi eq, %216, %234 : vector<16x16xi32>
    %236 = vector.extract_strided_slice %215 {offsets = [0, 11], sizes = [16, 16], strides = [1, 1]} : vector<16x33xf32> to vector<16x16xf32>
    %237 = arith.select %235, %236, %233 : vector<16x16xi1>, vector<16x16xf32>
    %c5_i32_60 = arith.constant 5 : i32
    %238 = vector.broadcast %c5_i32_60 : i32 to vector<16x16xi32>
    %239 = arith.cmpi eq, %216, %238 : vector<16x16xi32>
    %240 = vector.extract_strided_slice %215 {offsets = [0, 10], sizes = [16, 16], strides = [1, 1]} : vector<16x33xf32> to vector<16x16xf32>
    %241 = arith.select %239, %240, %237 : vector<16x16xi1>, vector<16x16xf32>
    %c6_i32_61 = arith.constant 6 : i32
    %242 = vector.broadcast %c6_i32_61 : i32 to vector<16x16xi32>
    %243 = arith.cmpi eq, %216, %242 : vector<16x16xi32>
    %244 = vector.extract_strided_slice %215 {offsets = [0, 9], sizes = [16, 16], strides = [1, 1]} : vector<16x33xf32> to vector<16x16xf32>
    %245 = arith.select %243, %244, %241 : vector<16x16xi1>, vector<16x16xf32>
    %c7_i32_62 = arith.constant 7 : i32
    %246 = vector.broadcast %c7_i32_62 : i32 to vector<16x16xi32>
    %247 = arith.cmpi eq, %216, %246 : vector<16x16xi32>
    %248 = vector.extract_strided_slice %215 {offsets = [0, 8], sizes = [16, 16], strides = [1, 1]} : vector<16x33xf32> to vector<16x16xf32>
    %249 = arith.select %247, %248, %245 : vector<16x16xi1>, vector<16x16xf32>
    %c8_i32_63 = arith.constant 8 : i32
    %250 = vector.broadcast %c8_i32_63 : i32 to vector<16x16xi32>
    %251 = arith.cmpi eq, %216, %250 : vector<16x16xi32>
    %252 = vector.extract_strided_slice %215 {offsets = [0, 7], sizes = [16, 16], strides = [1, 1]} : vector<16x33xf32> to vector<16x16xf32>
    %253 = arith.select %251, %252, %249 : vector<16x16xi1>, vector<16x16xf32>
    %c9_i32_64 = arith.constant 9 : i32
    %254 = vector.broadcast %c9_i32_64 : i32 to vector<16x16xi32>
    %255 = arith.cmpi eq, %216, %254 : vector<16x16xi32>
    %256 = vector.extract_strided_slice %215 {offsets = [0, 6], sizes = [16, 16], strides = [1, 1]} : vector<16x33xf32> to vector<16x16xf32>
    %257 = arith.select %255, %256, %253 : vector<16x16xi1>, vector<16x16xf32>
    %c10_i32_65 = arith.constant 10 : i32
    %258 = vector.broadcast %c10_i32_65 : i32 to vector<16x16xi32>
    %259 = arith.cmpi eq, %216, %258 : vector<16x16xi32>
    %260 = vector.extract_strided_slice %215 {offsets = [0, 5], sizes = [16, 16], strides = [1, 1]} : vector<16x33xf32> to vector<16x16xf32>
    %261 = arith.select %259, %260, %257 : vector<16x16xi1>, vector<16x16xf32>
    %c11_i32_66 = arith.constant 11 : i32
    %262 = vector.broadcast %c11_i32_66 : i32 to vector<16x16xi32>
    %263 = arith.cmpi eq, %216, %262 : vector<16x16xi32>
    %264 = vector.extract_strided_slice %215 {offsets = [0, 4], sizes = [16, 16], strides = [1, 1]} : vector<16x33xf32> to vector<16x16xf32>
    %265 = arith.select %263, %264, %261 : vector<16x16xi1>, vector<16x16xf32>
    %c12_i32_67 = arith.constant 12 : i32
    %266 = vector.broadcast %c12_i32_67 : i32 to vector<16x16xi32>
    %267 = arith.cmpi eq, %216, %266 : vector<16x16xi32>
    %268 = vector.extract_strided_slice %215 {offsets = [0, 3], sizes = [16, 16], strides = [1, 1]} : vector<16x33xf32> to vector<16x16xf32>
    %269 = arith.select %267, %268, %265 : vector<16x16xi1>, vector<16x16xf32>
    %c13_i32_68 = arith.constant 13 : i32
    %270 = vector.broadcast %c13_i32_68 : i32 to vector<16x16xi32>
    %271 = arith.cmpi eq, %216, %270 : vector<16x16xi32>
    %272 = vector.extract_strided_slice %215 {offsets = [0, 2], sizes = [16, 16], strides = [1, 1]} : vector<16x33xf32> to vector<16x16xf32>
    %273 = arith.select %271, %272, %269 : vector<16x16xi1>, vector<16x16xf32>
    %c14_i32_69 = arith.constant 14 : i32
    %274 = vector.broadcast %c14_i32_69 : i32 to vector<16x16xi32>
    %275 = arith.cmpi eq, %216, %274 : vector<16x16xi32>
    %276 = vector.extract_strided_slice %215 {offsets = [0, 1], sizes = [16, 16], strides = [1, 1]} : vector<16x33xf32> to vector<16x16xf32>
    %277 = arith.select %275, %276, %273 : vector<16x16xi1>, vector<16x16xf32>
    %c15_i32_70 = arith.constant 15 : i32
    %278 = vector.broadcast %c15_i32_70 : i32 to vector<16x16xi32>
    %279 = arith.cmpi eq, %216, %278 : vector<16x16xi32>
    %280 = vector.extract_strided_slice %215 {offsets = [0, 0], sizes = [16, 16], strides = [1, 1]} : vector<16x33xf32> to vector<16x16xf32>
    %281 = arith.select %279, %280, %277 : vector<16x16xi1>, vector<16x16xf32>
    %282 = arith.addf %208, %281 : vector<16x16xf32>
    %cst_71 = arith.constant 0.176776692 : f32
    %283 = vector.broadcast %cst_71 : f32 to vector<16x16xf32>
    %284 = arith.mulf %282, %283 : vector<16x16xf32>
    %cst_72 = arith.constant dense<0xFF800000> : vector<16xf32>
    %285 = vector.multi_reduction <maximumf>, %284, %cst_72 [1] : vector<16x16xf32> to vector<16xf32>
    %286 = vector.shape_cast %285 : vector<16xf32> to vector<16x1xf32>
    %287 = vector.broadcast %286 : vector<16x1xf32> to vector<16x16xf32>
    %288 = arith.subf %284, %287 : vector<16x16xf32>
    %289 = math.exp %288 : vector<16x16xf32>
    %cst_73 = arith.constant dense<0.000000e+00> : vector<16xf32>
    %290 = vector.multi_reduction <add>, %289, %cst_73 [1] : vector<16x16xf32> to vector<16xf32>
    %291 = vector.shape_cast %290 : vector<16xf32> to vector<16x1xf32>
    %292 = tpu.reciprocal %291 {approx = true} : vector<16x1xf32> -> vector<16x1xf32>
    %293 = vector.broadcast %292 : vector<16x1xf32> to vector<16x16xf32>
    %294 = arith.mulf %289, %293 : vector<16x16xf32>
    %cst_74 = arith.constant dense<0.000000e+00> : vector<16x32xf32>
    %295 = tpu.matmul %294, %205, %cst_74 {dimension_numbers = #tpu.dot_dimension_numbers<[1], [0], [0], [1], [0, 0, 1, 1], [], []>} : vector<16x16xf32>, vector<16x32xf32>, vector<16x32xf32> -> vector<16x32xf32>
    %296 = vector.extract_strided_slice %12 {offsets = [0, 96], sizes = [16, 32], strides = [1, 1]} : vector<16x128xf32> to vector<16x32xf32>
    %297 = vector.extract_strided_slice %13 {offsets = [0, 96], sizes = [16, 32], strides = [1, 1]} : vector<16x128xf32> to vector<16x32xf32>
    %298 = vector.extract_strided_slice %10 {offsets = [0, 96], sizes = [16, 32], strides = [1, 1]} : vector<16x128xf32> to vector<16x32xf32>
    %299 = vector.extract_strided_slice %16 {offsets = [0, 96], sizes = [16, 32], strides = [1, 1]} : vector<16x128xf32> to vector<16x32xf32>
    %cst_75 = arith.constant dense<0.000000e+00> : vector<16x16xf32>
    %300 = tpu.matmul %299, %296, %cst_75 {dimension_numbers = #tpu.dot_dimension_numbers<[1], [1], [0], [0], [0, 0, 1, 0], [], []>} : vector<16x32xf32>, vector<16x32xf32>, vector<16x16xf32> -> vector<16x16xf32>
    %301 = vector.extract_strided_slice %19 {offsets = [0, 96], sizes = [16, 32], strides = [1, 1]} : vector<16x128xf32> to vector<16x32xf32>
    %cst_76 = arith.constant dense<0.000000e+00> : vector<16x16xf32>
    %302 = tpu.matmul %301, %298, %cst_76 {dimension_numbers = #tpu.dot_dimension_numbers<[1], [1], [0], [0], [0, 0, 1, 0], [], []>} : vector<16x32xf32>, vector<16x32xf32>, vector<16x16xf32> -> vector<16x16xf32>
    %cst_77 = arith.constant 0.000000e+00 : f32
    %303 = vector.broadcast %cst_77 : f32 to vector<16x1xf32>
    %304 = vector.extract_strided_slice %302 {offsets = [1, 0], sizes = [15, 16], strides = [1, 1]} : vector<16x16xf32> to vector<15x16xf32>
    %cst_78 = arith.constant 0.000000e+00 : f32
    %305 = vector.broadcast %cst_78 : f32 to vector<1x16xf32>
    %306 = tpu.concatenate %304, %305 in 0 : vector<15x16xf32>, vector<1x16xf32> -> vector<16x16xf32>
    %307 = tpu.concatenate %302, %303, %306 in 1 : vector<16x16xf32>, vector<16x1xf32>, vector<16x16xf32> -> vector<16x33xf32>
    %308 = tpu.iota {dimensions = array<i32: 0>} : vector<16x16xi32>
    %cst_79 = arith.constant 0.000000e+00 : f32
    %309 = vector.broadcast %cst_79 : f32 to vector<16x16xf32>
    %c0_i32_80 = arith.constant 0 : i32
    %310 = vector.broadcast %c0_i32_80 : i32 to vector<16x16xi32>
    %311 = arith.cmpi eq, %308, %310 : vector<16x16xi32>
    %312 = vector.extract_strided_slice %307 {offsets = [0, 15], sizes = [16, 16], strides = [1, 1]} : vector<16x33xf32> to vector<16x16xf32>
    %313 = arith.select %311, %312, %309 : vector<16x16xi1>, vector<16x16xf32>
    %c1_i32_81 = arith.constant 1 : i32
    %314 = vector.broadcast %c1_i32_81 : i32 to vector<16x16xi32>
    %315 = arith.cmpi eq, %308, %314 : vector<16x16xi32>
    %316 = vector.extract_strided_slice %307 {offsets = [0, 14], sizes = [16, 16], strides = [1, 1]} : vector<16x33xf32> to vector<16x16xf32>
    %317 = arith.select %315, %316, %313 : vector<16x16xi1>, vector<16x16xf32>
    %c2_i32_82 = arith.constant 2 : i32
    %318 = vector.broadcast %c2_i32_82 : i32 to vector<16x16xi32>
    %319 = arith.cmpi eq, %308, %318 : vector<16x16xi32>
    %320 = vector.extract_strided_slice %307 {offsets = [0, 13], sizes = [16, 16], strides = [1, 1]} : vector<16x33xf32> to vector<16x16xf32>
    %321 = arith.select %319, %320, %317 : vector<16x16xi1>, vector<16x16xf32>
    %c3_i32_83 = arith.constant 3 : i32
    %322 = vector.broadcast %c3_i32_83 : i32 to vector<16x16xi32>
    %323 = arith.cmpi eq, %308, %322 : vector<16x16xi32>
    %324 = vector.extract_strided_slice %307 {offsets = [0, 12], sizes = [16, 16], strides = [1, 1]} : vector<16x33xf32> to vector<16x16xf32>
    %325 = arith.select %323, %324, %321 : vector<16x16xi1>, vector<16x16xf32>
    %c4_i32_84 = arith.constant 4 : i32
    %326 = vector.broadcast %c4_i32_84 : i32 to vector<16x16xi32>
    %327 = arith.cmpi eq, %308, %326 : vector<16x16xi32>
    %328 = vector.extract_strided_slice %307 {offsets = [0, 11], sizes = [16, 16], strides = [1, 1]} : vector<16x33xf32> to vector<16x16xf32>
    %329 = arith.select %327, %328, %325 : vector<16x16xi1>, vector<16x16xf32>
    %c5_i32_85 = arith.constant 5 : i32
    %330 = vector.broadcast %c5_i32_85 : i32 to vector<16x16xi32>
    %331 = arith.cmpi eq, %308, %330 : vector<16x16xi32>
    %332 = vector.extract_strided_slice %307 {offsets = [0, 10], sizes = [16, 16], strides = [1, 1]} : vector<16x33xf32> to vector<16x16xf32>
    %333 = arith.select %331, %332, %329 : vector<16x16xi1>, vector<16x16xf32>
    %c6_i32_86 = arith.constant 6 : i32
    %334 = vector.broadcast %c6_i32_86 : i32 to vector<16x16xi32>
    %335 = arith.cmpi eq, %308, %334 : vector<16x16xi32>
    %336 = vector.extract_strided_slice %307 {offsets = [0, 9], sizes = [16, 16], strides = [1, 1]} : vector<16x33xf32> to vector<16x16xf32>
    %337 = arith.select %335, %336, %333 : vector<16x16xi1>, vector<16x16xf32>
    %c7_i32_87 = arith.constant 7 : i32
    %338 = vector.broadcast %c7_i32_87 : i32 to vector<16x16xi32>
    %339 = arith.cmpi eq, %308, %338 : vector<16x16xi32>
    %340 = vector.extract_strided_slice %307 {offsets = [0, 8], sizes = [16, 16], strides = [1, 1]} : vector<16x33xf32> to vector<16x16xf32>
    %341 = arith.select %339, %340, %337 : vector<16x16xi1>, vector<16x16xf32>
    %c8_i32_88 = arith.constant 8 : i32
    %342 = vector.broadcast %c8_i32_88 : i32 to vector<16x16xi32>
    %343 = arith.cmpi eq, %308, %342 : vector<16x16xi32>
    %344 = vector.extract_strided_slice %307 {offsets = [0, 7], sizes = [16, 16], strides = [1, 1]} : vector<16x33xf32> to vector<16x16xf32>
    %345 = arith.select %343, %344, %341 : vector<16x16xi1>, vector<16x16xf32>
    %c9_i32_89 = arith.constant 9 : i32
    %346 = vector.broadcast %c9_i32_89 : i32 to vector<16x16xi32>
    %347 = arith.cmpi eq, %308, %346 : vector<16x16xi32>
    %348 = vector.extract_strided_slice %307 {offsets = [0, 6], sizes = [16, 16], strides = [1, 1]} : vector<16x33xf32> to vector<16x16xf32>
    %349 = arith.select %347, %348, %345 : vector<16x16xi1>, vector<16x16xf32>
    %c10_i32_90 = arith.constant 10 : i32
    %350 = vector.broadcast %c10_i32_90 : i32 to vector<16x16xi32>
    %351 = arith.cmpi eq, %308, %350 : vector<16x16xi32>
    %352 = vector.extract_strided_slice %307 {offsets = [0, 5], sizes = [16, 16], strides = [1, 1]} : vector<16x33xf32> to vector<16x16xf32>
    %353 = arith.select %351, %352, %349 : vector<16x16xi1>, vector<16x16xf32>
    %c11_i32_91 = arith.constant 11 : i32
    %354 = vector.broadcast %c11_i32_91 : i32 to vector<16x16xi32>
    %355 = arith.cmpi eq, %308, %354 : vector<16x16xi32>
    %356 = vector.extract_strided_slice %307 {offsets = [0, 4], sizes = [16, 16], strides = [1, 1]} : vector<16x33xf32> to vector<16x16xf32>
    %357 = arith.select %355, %356, %353 : vector<16x16xi1>, vector<16x16xf32>
    %c12_i32_92 = arith.constant 12 : i32
    %358 = vector.broadcast %c12_i32_92 : i32 to vector<16x16xi32>
    %359 = arith.cmpi eq, %308, %358 : vector<16x16xi32>
    %360 = vector.extract_strided_slice %307 {offsets = [0, 3], sizes = [16, 16], strides = [1, 1]} : vector<16x33xf32> to vector<16x16xf32>
    %361 = arith.select %359, %360, %357 : vector<16x16xi1>, vector<16x16xf32>
    %c13_i32_93 = arith.constant 13 : i32
    %362 = vector.broadcast %c13_i32_93 : i32 to vector<16x16xi32>
    %363 = arith.cmpi eq, %308, %362 : vector<16x16xi32>
    %364 = vector.extract_strided_slice %307 {offsets = [0, 2], sizes = [16, 16], strides = [1, 1]} : vector<16x33xf32> to vector<16x16xf32>
    %365 = arith.select %363, %364, %361 : vector<16x16xi1>, vector<16x16xf32>
    %c14_i32_94 = arith.constant 14 : i32
    %366 = vector.broadcast %c14_i32_94 : i32 to vector<16x16xi32>
    %367 = arith.cmpi eq, %308, %366 : vector<16x16xi32>
    %368 = vector.extract_strided_slice %307 {offsets = [0, 1], sizes = [16, 16], strides = [1, 1]} : vector<16x33xf32> to vector<16x16xf32>
    %369 = arith.select %367, %368, %365 : vector<16x16xi1>, vector<16x16xf32>
    %c15_i32_95 = arith.constant 15 : i32
    %370 = vector.broadcast %c15_i32_95 : i32 to vector<16x16xi32>
    %371 = arith.cmpi eq, %308, %370 : vector<16x16xi32>
    %372 = vector.extract_strided_slice %307 {offsets = [0, 0], sizes = [16, 16], strides = [1, 1]} : vector<16x33xf32> to vector<16x16xf32>
    %373 = arith.select %371, %372, %369 : vector<16x16xi1>, vector<16x16xf32>
    %374 = arith.addf %300, %373 : vector<16x16xf32>
    %cst_96 = arith.constant 0.176776692 : f32
    %375 = vector.broadcast %cst_96 : f32 to vector<16x16xf32>
    %376 = arith.mulf %374, %375 : vector<16x16xf32>
    %cst_97 = arith.constant dense<0xFF800000> : vector<16xf32>
    %377 = vector.multi_reduction <maximumf>, %376, %cst_97 [1] : vector<16x16xf32> to vector<16xf32>
    %378 = vector.shape_cast %377 : vector<16xf32> to vector<16x1xf32>
    %379 = vector.broadcast %378 : vector<16x1xf32> to vector<16x16xf32>
    %380 = arith.subf %376, %379 : vector<16x16xf32>
    %381 = math.exp %380 : vector<16x16xf32>
    %cst_98 = arith.constant dense<0.000000e+00> : vector<16xf32>
    %382 = vector.multi_reduction <add>, %381, %cst_98 [1] : vector<16x16xf32> to vector<16xf32>
    %383 = vector.shape_cast %382 : vector<16xf32> to vector<16x1xf32>
    %384 = tpu.reciprocal %383 {approx = true} : vector<16x1xf32> -> vector<16x1xf32>
    %385 = vector.broadcast %384 : vector<16x1xf32> to vector<16x16xf32>
    %386 = arith.mulf %381, %385 : vector<16x16xf32>
    %cst_99 = arith.constant dense<0.000000e+00> : vector<16x32xf32>
    %387 = tpu.matmul %386, %297, %cst_99 {dimension_numbers = #tpu.dot_dimension_numbers<[1], [0], [0], [1], [0, 0, 1, 1], [], []>} : vector<16x16xf32>, vector<16x32xf32>, vector<16x32xf32> -> vector<16x32xf32>
    %388 = tpu.concatenate %111, %203, %295, %387 in 1 : vector<16x32xf32>, vector<16x32xf32>, vector<16x32xf32>, vector<16x32xf32> -> vector<16x128xf32>
    %c0_100 = arith.constant 0 : index
    %c0_101 = arith.constant 0 : index
    %389 = vector.load %arg8[%c0_100, %c0_101] : memref<128x128xf32, #tpu.memory_space<vmem>>, vector<128x128xf32>
    %cst_102 = arith.constant dense<0.000000e+00> : vector<16x128xf32>
    %390 = tpu.matmul %388, %389, %cst_102 {dimension_numbers = #tpu.dot_dimension_numbers<[1], [0], [0], [1], [0, 0, 1, 1], [], []>} : vector<16x128xf32>, vector<128x128xf32>, vector<16x128xf32> -> vector<16x128xf32>
    %c0_103 = arith.constant 0 : index
    %c0_104 = arith.constant 0 : index
    %391 = vector.load %arg9[%c0_103, %c0_104] : memref<1x128xf32, #tpu.memory_space<vmem>>, vector<1x128xf32>
    %392 = vector.broadcast %391 : vector<1x128xf32> to vector<16x128xf32>
    %393 = arith.addf %390, %392 : vector<16x128xf32>
    %394 = arith.addf %393, %1 : vector<16x128xf32>
    %c0_105 = arith.constant 0 : index
    %c0_106 = arith.constant 0 : index
    %395 = vector.load %arg10[%c0_105, %c0_106] : memref<1x128xf32, #tpu.memory_space<vmem>>, vector<1x128xf32>
    %c0_107 = arith.constant 0 : index
    %c0_108 = arith.constant 0 : index
    %396 = vector.load %arg11[%c0_107, %c0_108] : memref<1x128xf32, #tpu.memory_space<vmem>>, vector<1x128xf32>
    %cst_109 = arith.constant dense<0.000000e+00> : vector<16xf32>
    %397 = vector.multi_reduction <add>, %394, %cst_109 [1] : vector<16x128xf32> to vector<16xf32>
    %398 = vector.shape_cast %397 : vector<16xf32> to vector<16x1xf32>
    %cst_110 = arith.constant 1.280000e+02 : f32
    %399 = vector.broadcast %cst_110 : f32 to vector<16x1xf32>
    %400 = arith.divf %398, %399 : vector<16x1xf32>
    %401 = vector.broadcast %400 : vector<16x1xf32> to vector<16x128xf32>
    %402 = arith.subf %394, %401 : vector<16x128xf32>
    %403 = arith.mulf %402, %402 : vector<16x128xf32>
    %cst_111 = arith.constant dense<0.000000e+00> : vector<16xf32>
    %404 = vector.multi_reduction <add>, %403, %cst_111 [1] : vector<16x128xf32> to vector<16xf32>
    %405 = vector.shape_cast %404 : vector<16xf32> to vector<16x1xf32>
    %cst_112 = arith.constant 1.280000e+02 : f32
    %406 = vector.broadcast %cst_112 : f32 to vector<16x1xf32>
    %407 = arith.divf %405, %406 : vector<16x1xf32>
    %cst_113 = arith.constant 9.99999974E-6 : f32
    %408 = vector.broadcast %cst_113 : f32 to vector<16x1xf32>
    %409 = arith.addf %407, %408 : vector<16x1xf32>
    %410 = math.rsqrt %409 : vector<16x1xf32>
    %411 = vector.broadcast %410 : vector<16x1xf32> to vector<16x128xf32>
    %412 = arith.mulf %402, %411 : vector<16x128xf32>
    %413 = vector.broadcast %395 : vector<1x128xf32> to vector<16x128xf32>
    %414 = arith.mulf %412, %413 : vector<16x128xf32>
    %415 = vector.broadcast %396 : vector<1x128xf32> to vector<16x128xf32>
    %416 = arith.addf %414, %415 : vector<16x128xf32>
    %c0_114 = arith.constant 0 : index
    %c0_115 = arith.constant 0 : index
    %417 = vector.load %arg12[%c0_114, %c0_115] : memref<128x192xf32, #tpu.memory_space<vmem>>, vector<128x192xf32>
    %cst_116 = arith.constant dense<0.000000e+00> : vector<16x192xf32>
    %418 = tpu.matmul %416, %417, %cst_116 {dimension_numbers = #tpu.dot_dimension_numbers<[1], [0], [0], [1], [0, 0, 1, 1], [], []>} : vector<16x128xf32>, vector<128x192xf32>, vector<16x192xf32> -> vector<16x192xf32>
    %c0_117 = arith.constant 0 : index
    %c0_118 = arith.constant 0 : index
    %419 = vector.load %arg13[%c0_117, %c0_118] : memref<1x192xf32, #tpu.memory_space<vmem>>, vector<1x192xf32>
    %420 = vector.broadcast %419 : vector<1x192xf32> to vector<16x192xf32>
    %421 = arith.addf %418, %420 : vector<16x192xf32>
    %c0_119 = arith.constant 0 : index
    %c0_120 = arith.constant 0 : index
    %422 = vector.load %arg14[%c0_119, %c0_120] : memref<192x128xf32, #tpu.memory_space<vmem>>, vector<192x128xf32>
    %cst_121 = arith.constant dense<0.000000e+00> : vector<16x128xf32>
    %423 = tpu.matmul %421, %422, %cst_121 {dimension_numbers = #tpu.dot_dimension_numbers<[1], [0], [0], [1], [0, 0, 1, 1], [], []>} : vector<16x192xf32>, vector<192x128xf32>, vector<16x128xf32> -> vector<16x128xf32>
    %c0_122 = arith.constant 0 : index
    %c0_123 = arith.constant 0 : index
    %424 = vector.load %arg15[%c0_122, %c0_123] : memref<1x128xf32, #tpu.memory_space<vmem>>, vector<1x128xf32>
    %425 = vector.broadcast %424 : vector<1x128xf32> to vector<16x128xf32>
    %426 = arith.addf %423, %425 : vector<16x128xf32>
    %cst_124 = arith.constant 5.000000e-01 : f32
    %427 = vector.broadcast %cst_124 : f32 to vector<16x128xf32>
    %428 = arith.mulf %427, %426 : vector<16x128xf32>
    %cst_125 = arith.constant 0.707106769 : f32
    %429 = vector.broadcast %cst_125 : f32 to vector<16x128xf32>
    %430 = arith.mulf %426, %429 : vector<16x128xf32>
    %431 = math.erf %430 : vector<16x128xf32>
    %cst_126 = arith.constant 1.000000e+00 : f32
    %432 = vector.broadcast %cst_126 : f32 to vector<16x128xf32>
    %433 = arith.addf %432, %431 : vector<16x128xf32>
    %434 = arith.mulf %428, %433 : vector<16x128xf32>
    %435 = arith.addf %434, %416 : vector<16x128xf32>
    %c0_127 = arith.constant 0 : index
    %c0_128 = arith.constant 0 : index
    %436 = vector.load %arg16[%c0_127, %c0_128] : memref<1x128xf32, #tpu.memory_space<vmem>>, vector<1x128xf32>
    %c0_129 = arith.constant 0 : index
    %c0_130 = arith.constant 0 : index
    %437 = vector.load %arg17[%c0_129, %c0_130] : memref<1x128xf32, #tpu.memory_space<vmem>>, vector<1x128xf32>
    %cst_131 = arith.constant dense<0.000000e+00> : vector<16xf32>
    %438 = vector.multi_reduction <add>, %435, %cst_131 [1] : vector<16x128xf32> to vector<16xf32>
    %439 = vector.shape_cast %438 : vector<16xf32> to vector<16x1xf32>
    %cst_132 = arith.constant 1.280000e+02 : f32
    %440 = vector.broadcast %cst_132 : f32 to vector<16x1xf32>
    %441 = arith.divf %439, %440 : vector<16x1xf32>
    %442 = vector.broadcast %441 : vector<16x1xf32> to vector<16x128xf32>
    %443 = arith.subf %435, %442 : vector<16x128xf32>
    %444 = arith.mulf %443, %443 : vector<16x128xf32>
    %cst_133 = arith.constant dense<0.000000e+00> : vector<16xf32>
    %445 = vector.multi_reduction <add>, %444, %cst_133 [1] : vector<16x128xf32> to vector<16xf32>
    %446 = vector.shape_cast %445 : vector<16xf32> to vector<16x1xf32>
    %cst_134 = arith.constant 1.280000e+02 : f32
    %447 = vector.broadcast %cst_134 : f32 to vector<16x1xf32>
    %448 = arith.divf %446, %447 : vector<16x1xf32>
    %cst_135 = arith.constant 9.99999974E-6 : f32
    %449 = vector.broadcast %cst_135 : f32 to vector<16x1xf32>
    %450 = arith.addf %448, %449 : vector<16x1xf32>
    %451 = math.rsqrt %450 : vector<16x1xf32>
    %452 = vector.broadcast %451 : vector<16x1xf32> to vector<16x128xf32>
    %453 = arith.mulf %443, %452 : vector<16x128xf32>
    %454 = vector.broadcast %436 : vector<1x128xf32> to vector<16x128xf32>
    %455 = arith.mulf %453, %454 : vector<16x128xf32>
    %456 = vector.broadcast %437 : vector<1x128xf32> to vector<16x128xf32>
    %457 = arith.addf %455, %456 : vector<16x128xf32>
    %c0_136 = arith.constant 0 : index
    %c0_137 = arith.constant 0 : index
    %c0_138 = arith.constant 0 : index
    %458 = vector.load %arg18[%c0_136, %c0_137, %c0_138] : memref<1x16x128xf32, #tpu.memory_space<vmem>>, vector<1x16x128xf32>
    %459 = vector.shape_cast %458 : vector<1x16x128xf32> to vector<16x128xf32>
    %460 = vector.shape_cast %457 : vector<16x128xf32> to vector<1x16x128xf32>
    tpu.vector_store %arg18[%c0_136, %c0_137, %c0_138], %460 {strides = array<i32>} : memref<1x16x128xf32, #tpu.memory_space<vmem>>, vector<1x16x128xf32>,
    return
  }
  func.func @transform_0(%arg0: i32) -> (i32, i32, i32) {
    %c0_i32 = arith.constant 0 : i32
    %c0_i32_0 = arith.constant 0 : i32
    %c0_i32_1 = arith.constant 0 : i32
    return %arg0, %c0_i32, %c0_i32_0 : i32, i32, i32
  }
  func.func @transform_1(%arg0: i32) -> (i32, i32, i32) {
    %c0_i32 = arith.constant 0 : i32
    %c0_i32_0 = arith.constant 0 : i32
    %c0_i32_1 = arith.constant 0 : i32
    return %arg0, %c0_i32, %c0_i32_0 : i32, i32, i32
  }
  func.func @transform_2(%arg0: i32) -> (i32, i32) {
    %c0_i32 = arith.constant 0 : i32
    %c0_i32_0 = arith.constant 0 : i32
    %c0_i32_1 = arith.constant 0 : i32
    return %c0_i32, %c0_i32_0 : i32, i32
  }
  func.func @transform_3(%arg0: i32) -> (i32, i32) {
    %c0_i32 = arith.constant 0 : i32
    %c0_i32_0 = arith.constant 0 : i32
    %c0_i32_1 = arith.constant 0 : i32
    return %c0_i32, %c0_i32_0 : i32, i32
  }
  func.func @transform_4(%arg0: i32) -> (i32, i32) {
    %c0_i32 = arith.constant 0 : i32
    %c0_i32_0 = arith.constant 0 : i32
    %c0_i32_1 = arith.constant 0 : i32
    return %c0_i32, %c0_i32_0 : i32, i32
  }
  func.func @transform_5(%arg0: i32) -> (i32, i32) {
    %c0_i32 = arith.constant 0 : i32
    %c0_i32_0 = arith.constant 0 : i32
    %c0_i32_1 = arith.constant 0 : i32
    return %c0_i32, %c0_i32_0 : i32, i32
  }
  func.func @transform_6(%arg0: i32) -> (i32, i32) {
    %c0_i32 = arith.constant 0 : i32
    %c0_i32_0 = arith.constant 0 : i32
    %c0_i32_1 = arith.constant 0 : i32
    return %c0_i32, %c0_i32_0 : i32, i32
  }
  func.func @transform_7(%arg0: i32) -> (i32, i32) {
    %c0_i32 = arith.constant 0 : i32
    %c0_i32_0 = arith.constant 0 : i32
    %c0_i32_1 = arith.constant 0 : i32
    return %c0_i32, %c0_i32_0 : i32, i32
  }
  func.func @transform_8(%arg0: i32) -> (i32, i32) {
    %c0_i32 = arith.constant 0 : i32
    %c0_i32_0 = arith.constant 0 : i32
    %c0_i32_1 = arith.constant 0 : i32
    return %c0_i32, %c0_i32_0 : i32, i32
  }
  func.func @transform_9(%arg0: i32) -> (i32, i32) {
    %c0_i32 = arith.constant 0 : i32
    %c0_i32_0 = arith.constant 0 : i32
    %c0_i32_1 = arith.constant 0 : i32
    return %c0_i32, %c0_i32_0 : i32, i32
  }
  func.func @transform_10(%arg0: i32) -> (i32, i32) {
    %c0_i32 = arith.constant 0 : i32
    %c0_i32_0 = arith.constant 0 : i32
    %c0_i32_1 = arith.constant 0 : i32
    return %c0_i32, %c0_i32_0 : i32, i32
  }
  func.func @transform_11(%arg0: i32) -> (i32, i32) {
    %c0_i32 = arith.constant 0 : i32
    %c0_i32_0 = arith.constant 0 : i32
    %c0_i32_1 = arith.constant 0 : i32
    return %c0_i32, %c0_i32_0 : i32, i32
  }
  func.func @transform_12(%arg0: i32) -> (i32, i32) {
    %c0_i32 = arith.constant 0 : i32
    %c0_i32_0 = arith.constant 0 : i32
    %c0_i32_1 = arith.constant 0 : i32
    return %c0_i32, %c0_i32_0 : i32, i32
  }
  func.func @transform_13(%arg0: i32) -> (i32, i32) {
    %c0_i32 = arith.constant 0 : i32
    %c0_i32_0 = arith.constant 0 : i32
    %c0_i32_1 = arith.constant 0 : i32
    return %c0_i32, %c0_i32_0 : i32, i32
  }
  func.func @transform_14(%arg0: i32) -> (i32, i32) {
    %c0_i32 = arith.constant 0 : i32
    %c0_i32_0 = arith.constant 0 : i32
    %c0_i32_1 = arith.constant 0 : i32
    return %c0_i32, %c0_i32_0 : i32, i32
  }
  func.func @transform_15(%arg0: i32) -> (i32, i32) {
    %c0_i32 = arith.constant 0 : i32
    %c0_i32_0 = arith.constant 0 : i32
    %c0_i32_1 = arith.constant 0 : i32
    return %c0_i32, %c0_i32_0 : i32, i32
  }
  func.func @transform_16(%arg0: i32) -> (i32, i32) {
    %c0_i32 = arith.constant 0 : i32
    %c0_i32_0 = arith.constant 0 : i32
    %c0_i32_1 = arith.constant 0 : i32
    return %c0_i32, %c0_i32_0 : i32, i32
  }
  func.func @transform_17(%arg0: i32) -> (i32, i32, i32) {
    %c0_i32 = arith.constant 0 : i32
    %c0_i32_0 = arith.constant 0 : i32
    %c0_i32_1 = arith.constant 0 : i32
    return %arg0, %c0_i32, %c0_i32_0 : i32, i32, i32
  }
}

</mosaic_0001>

<bundles_post_ra>
// kernel: tpu_custom_call.1
= control target key start
LH: loop header
LB: loop body
LE: loop exit
PB: predicated region body
PF: predicated region fallthrough
CT: control target
= control target key end

     0   :  { %s4405_s0 = inlined_call_operand.vmem [shape: f32[2,16,128], index: 0, kind: input, shape index: {}]   ;;  %s4406_s1 = inlined_call_operand.vmem [shape: f32[2,16,128], index: 1, kind: input, shape index: {}]   ;;  %s4407_s2 = inlined_call_operand.vmem [shape: f32[128,384], index: 2, kind: input, shape index: {}]   ;;  %s4408_s3 = inlined_call_operand.hbm [shape: f32[1,384], index: 3, kind: input, shape index: {}]   ;;  %s4409_s4 = inlined_call_operand.hbm [shape: f32[128,128], index: 4, kind: input, shape index: {}]   ;;  %s4410_s5 = inlined_call_operand.vmem [shape: f32[1,128], index: 5, kind: input, shape index: {}]   ;;  %s4411_s6 = inlined_call_operand.vmem [shape: f32[1,128], index: 6, kind: input, shape index: {}]   ;;  %s4412_s7 = inlined_call_operand.hbm [shape: f32[128,128], index: 7, kind: input, shape index: {}]   ;;  %s4413_s8 = inlined_call_operand.hbm [shape: f32[1,128], index: 8, kind: input, shape index: {}]   ;;  %s4414_s9 = inlined_call_operand.hbm [shape: f32[1,128], index: 9, kind: input, shape index: {}]   ;;  %s4415_s10 = inlined_call_operand.vmem [shape: f32[1,128], index: 10, kind: input, shape index: {}]   ;;  %s4416_s11 = inlined_call_operand.vmem [shape: f32[128,192], index: 11, kind: input, shape index: {}]   ;;  %s4417_s12 = inlined_call_operand.vmem [shape: f32[1,192], index: 12, kind: input, shape index: {}]   ;;  %s4418_s13 = inlined_call_operand.hbm [shape: f32[192,128], index: 13, kind: input, shape index: {}]   ;;  %s4419_s14 = inlined_call_operand.vmem [shape: f32[1,128], index: 14, kind: input, shape index: {}]   ;;  %s4420_s15 = inlined_call_operand.vmem [shape: f32[1,128], index: 15, kind: input, shape index: {}]   ;;  %s4421_s16 = inlined_call_operand.vmem [shape: f32[1,128], index: 16, kind: input, shape index: {}]   ;;  %s4422_s17 = inlined_call_operand.hbm [shape: f32[2,16,128], index: 17, kind: output, shape index: {}]  }
   0x1   :  { %4436 = sst [smem:[#allocation26_spill]] %s4405_s0 }
   0x2   :  { %4437 = sst [smem:[#allocation27_spill]] %s4406_s1 }
   0x3   :  { %4438 = sst [smem:[#allocation28_spill]] %s4409_s4 }
   0x4   :  { %4439 = sst [smem:[#allocation29_spill]] %s4413_s8 }
   0x5   :  { %4440 = sst [smem:[#allocation30_spill]] %s4421_s16 }
   0x6   :  { %4441 = sst [smem:[#allocation31_spill]] %s4422_s17 }
   0x7   :  { %22 = vsyncpa [#allocation3], 0 }
   0x8   :  { %23 = vsyncpa [#allocation6], 0 }
   0x9   :  { %24 = vsyncpa [#allocation9], 0 }
   0xa   :  { %25 = vsyncpa [#allocation12], 0 }
   0xb   :  { %26 = vsyncpa [#allocation4], 0 }
   0xc   :  { %28 = vsyncpa [#allocation4 + $0x1], 0  ;;  %s3354_s24 = smov 0   ;;  %s3356_s25 = smov 0  }
   0xd   :  { %s3358_s26 = smov 0   ;;  %s3360_s27 = smov 0  }
   0xe LB: > { %4442 = sst [smem:[#allocation19_spill]] %s3233_s24  ;;  %s3375_s28 = sadd.s32 4294967295, %s3245_s27   ;;  %s3245_s27 = sphi %s3360_s27, %s4471_s27   ;;  %s3241_s26 = sphi %s3358_s26, %s4473_s26   ;;  %s3237_s25 = sphi %s3356_s25, %s4475_s25   ;;  %s3233_s24 = sphi %s3354_s24, %s4474_s24  }
   0xf   : > { %4443 = sst [smem:[#allocation20_spill]] %s3241_s26  ;;  %s2690_s29 = sadd.s32 4294967294, %s3245_s27  }
  0x10   : > { %4444 = sst [smem:[#allocation21_spill]] %s3245_s27  ;;  %s3379_s0 = sadd.s32 1, %s3245_s27  }
  0x11   : > { %4445 = sst [smem:[#allocation22_spill]] %s3379_s0  ;;  %s408_s30 = sadd.s32 1, %s3241_s26 }
  0x12   : > { %s405_s18 = ssub.s32 %s3245_s27, %s3379_s0  ;;  %p418_p0 = scmp.ne.s32.totalorder %s3241_s26, %s3237_s25 }
  0x13   : > { %p406_p1 = scmp.eq.s32.totalorder %s405_s18, 0  ;;  %p419_p2 = scmp.eq.s32.totalorder %s3375_s28, 1 }
  0x14   : > { %p424_p3 = scmp.ne.s32.totalorder %s3237_s25, %s3233_s24  ;;  %p425_p4 = scmp.eq.s32.totalorder %s2690_s29, 1 }
  0x15   : > { %s3390_s19 = scalar_select %p406_p1, %s3241_s26, %s408_s30  }
  0x16   : > { %p3392_p5 = por %p419_p2, %p418_p0  ;;  %p3396_p6 = por %p425_p4, %p424_p3 }
  0x17   : > { %4446 = sst [smem:[#allocation23_spill]] %s3390_s19  ;;  %p2691_p7 = scmp.ge.s32.totalorder %s3245_s27, 1 }
  0x18   : > { %s4447_s1 = scalar_select %p3392_p5, 1, 0 }
  0x19   : > { %s4449_s20 = scalar_select %p3396_p6, 1, 0 }
  0x1a   : > { %4448 = sst [smem:[#allocation24_spill]] %s4447_s1  ;;  %p432_p8 = scmp.lt.s32.totalorder %s3245_s27, 3 }
  0x1b   : > { %4450 = sst [smem:[#allocation25_spill]] %s4449_s20  ;;  %p2814_p9 = scmp.eq.s32.totalorder %s3375_s28, 0 }
  0x1c   : > { %p3403_p10 = pnand %p2691_p7, %p432_p8  ;;  %s4452_s4 = sld [smem:[#allocation28_spill]] }
  0x1d   : > { %s3247_s30 = smov [#allocation5]   ;;  %s4454_s8 = sld [smem:[#allocation29_spill]] }
  0x1e   : > { %p2791_p11 = pneg %p3403_p10  ;;  %s460_s18 = sshll.u32 %s3247_s30, 4  ;;  %s461_s18 = int_to_ptr.vmem [resolvable:$true] %s460_s18 }
  0x1f   : > { %s3248_s22 = smov 128   ;;  %s3249_s23 = smov 8  }
  0x20   : > { %p3414_p12 = pnand %p2814_p9, %p2791_p11  ;;  %s3250_s30 = smov [#allocation8]  }
  0x21   : > { %s447_s1 = sshll.u32 %s4408_s3, 4  ;;  %s3251_s17 = smov [#allocation2]   ;;  %s448_s1 = int_to_ptr.hbm [resolvable:$true] %s447_s1 }
  0x22   : > { %s458_s29 = sshll.u32 %s4452_s4, 4  ;;  %s495_s4 = sshll.u32 %s3250_s30, 4  ;;  %s459_s29 = int_to_ptr.hbm [resolvable:$true] %s458_s29  ;;  %s496_s4 = int_to_ptr.vmem [resolvable:$true] %s495_s4 }
  0x23   : > { %s493_s20 = sshll.u32 %s4454_s8, 4  ;;  %s478_s8 = sshll.u32 %s4412_s7, 4  ;;  %s494_s20 = int_to_ptr.hbm [resolvable:$true] %s493_s20  ;;  %s479_s8 = int_to_ptr.hbm [resolvable:$true] %s478_s8 }
  0x24   : > { %2797 = dma.hbm_to_vmem [thread:$0]  (!%p3414_p12), %s459_s29, 2048, %s461_s18, [#allocation6], %s3248_s22, %s3248_s22, %s3249_s23  }
  0x25   : > { %2803 = dma.hbm_to_vmem [thread:$0]  (!%p3414_p12), %s494_s20, 16, %s496_s4, [#allocation9]  }
  0x26   : > { %s449_s16 = sshll.u32 %s3251_s17, 4  ;;  %s3252_s29 = smov [#allocation7]   ;;  %s450_s16 = int_to_ptr.vmem [resolvable:$true] %s449_s16 }
  0x27   : > { %2794 = dma.hbm_to_vmem [thread:$0]  (!%p3414_p12), %s448_s1, 48, %s450_s16, [#allocation3]  }
  0x28   : > { %s480_s24 = sshll.u32 %s3252_s29, 4  ;;  %s505_s30 = sshll.u32 %s4414_s9, 4  ;;  %s481_s24 = int_to_ptr.vmem [resolvable:$true] %s480_s24  ;;  %s506_s30 = int_to_ptr.hbm [resolvable:$true] %s505_s30 }
  0x29   : > { %2800 = dma.hbm_to_vmem [thread:$0]  (!%p3414_p12), %s479_s8, 2048, %s481_s24, [#allocation6], %s3248_s22, %s3248_s22, %s3249_s23  }
  0x2a   : > { %s525_s20 = sshll.u32 %s4418_s13, 4  ;;  %s3253_s26 = smov [#allocation10]   ;;  %s526_s20 = int_to_ptr.hbm [resolvable:$true] %s525_s20 }
  0x2b   : > { %s507_s16 = sshll.u32 %s3253_s26, 4  ;;  %s3254_s1 = smov [#allocation11]   ;;  %s508_s16 = int_to_ptr.vmem [resolvable:$true] %s507_s16 }
  0x2c   : > { %2806 = dma.hbm_to_vmem [thread:$0]  (!%p3414_p12), %s506_s30, 16, %s508_s16, [#allocation9]  }
  0x2d   : > { %s527_s0 = sshll.u32 %s3254_s1, 4  ;;  %568 = sbr.rel (%p3403_p10) target bundleno = 5980 (0x175c), region = 88  ;;  %s528_s0 = int_to_ptr.vmem [resolvable:$true] %s527_s0 }
  0x2e   : > { %2809 = dma.hbm_to_vmem [thread:$0]  (!%p3414_p12), %s526_s20, 3072, %s528_s0, [#allocation12], %s3248_s22, %s3248_s22, %s3249_s23  }
  0x32   : > { %3212 = dma.done.wait (%p2814_p9), [#allocation3], 48  }
  0x33   : > { %3214 = vsyncadd (%p2814_p9), [#allocation3], 4294967248 }
  0x34   : > { %3216 = dma.done.wait (%p2814_p9), [#allocation6], 4096  }
  0x35   : > { %3218 = vsyncadd (%p2814_p9), [#allocation6], 4294963200 }
  0x36   : > { %3220 = dma.done.wait (%p2814_p9), [#allocation9], 32  }
  0x37   : > { %3222 = vsyncadd (%p2814_p9), [#allocation9], 4294967264 }
  0x38   : > { %3224 = dma.done.wait (%p2814_p9), [#allocation12], 3072  }
  0x39   : > { %3226 = vsyncadd (%p2814_p9), [#allocation12], 4294964224  ;;  %v805_v0 = vld [vmem:[#allocation5 + $0x78] sm:$0xff]  ;;  %v804_v1 = vld [vmem:[#allocation5 + $0x70] sm:$0xff]  ;;  %p651_p13 = scmp.lt.s32.totalorder %s3375_s28, 1  ;;  %s4455_s27 = sld [smem:[#allocation27_spill]] }
  0x3a   : > { %806 = vmatpush.msra.mxu3 %v805_v0  ;;  %v708_v2 = vld [vmem:[%s4407_s2 + $0x168] sm:$0xff]  ;;  %v705_v4 = vld [vmem:[%s4407_s2 + $0x150] sm:$0xff]  ;;  %v702_v5 = vld [vmem:[%s4407_s2 + $0x138] sm:$0xff]  ;;  %s4456_s17 = sld [smem:[#allocation26_spill]]  ;;  %vm841_vm0 = vcmask 261120   ;;  %vm879_vm1 = vcmask 1046528  }
  0x3b   : > { %v803_v3 = vld [vmem:[#allocation5 + $0x68] sm:$0xff]  ;;  %719 = vmatpush.msra.mxu0 %v708_v2  ;;  %v802_v7 = vld [vmem:[#allocation5 + $0x60] sm:$0xff]  ;;  %v706_v8 = vld [vmem:[%s4407_s2 + $0x158] sm:$0xff]  ;;  %s3539_s18 = scalar_select %p651_p13, %s3375_s28, 1  ;;  %vm892_vm2 = vcmask 130048   ;;  %vm895_vm3 = vcmask 138240  }
  0x3c   : > { %807 = vmatpush.msra.mxu3 %v804_v1  ;;  %v709_v6 = vld [vmem:[%s4407_s2 + $0x170] sm:$0xff]  ;;  %v699_v9 = vld [vmem:[%s4407_s2 + $0x120] sm:$0xff]  ;;  %v696_v12 = vld [vmem:[%s4407_s2 + $0x108] sm:$0xff]  ;;  %s3257_s16 = smov 127   ;;  %s3259_s22 = smov 64  }
  0x3d   : > { %720 = vmatpush.msra.mxu0 %v705_v4  ;;  %742 = vmatpush.msra.mxu1 %v709_v6  ;;  %v703_v10 = vld [vmem:[%s4407_s2 + $0x140] sm:$0xff]  ;;  %v700_v13 = vld [vmem:[%s4407_s2 + $0x128] sm:$0xff]  ;;  %v800_v14 = vld [vmem:[#allocation5 + $0x50] sm:$0xff]  ;;  %s2760_s26 = sshll.u32 %s3539_s18, 4  ;;  %s3260_s23 = smov 32  }
  0x3e   : > { %808 = vmatpush.msra.mxu3 %v803_v3  ;;  %v801_v11 = vld [vmem:[#allocation5 + $0x58] sm:$0xff]  ;;  %v693_v15 = vld [vmem:[%s4407_s2 + $0xf0] sm:$0xff]  ;;  %v798_v20 = vld [vmem:[#allocation5 + $0x40] sm:$0xff]  ;;  %s4465_s30 = sld [smem:[#allocation30_spill]]  ;;  %s2762_s0 = sshll.u32 %s3375_s28, 4 }
  0x3f   : > { %721 = vmatpush.msra.mxu0 %v702_v5  ;;  %743 = vmatpush.msra.mxu1 %v706_v8  ;;  %v697_v16 = vld [vmem:[%s4407_s2 + $0x110] sm:$0xff]  ;;  %v690_v18 = vld [vmem:[%s4407_s2 + $0xd8] sm:$0xff]  ;;  %v687_v21 = vld [vmem:[%s4407_s2 + $0xc0] sm:$0xff]  ;;  %s660_s18 = scalar_lea.vmem %s4455_s27, %s2760_s26  ;;  %s4466_s21 = sld [smem:[#allocation31_spill]] }
  0x40   : > { %809 = vmatpush.msra.mxu3 %v802_v7  ;;  %v799_v17 = vld [vmem:[#allocation5 + $0x48] sm:$0xff]  ;;  %v694_v19 = vld [vmem:[%s4407_s2 + $0xf8] sm:$0xff]  ;;  %v691_v22 = vld [vmem:[%s4407_s2 + $0xe0] sm:$0xff]  ;;  %s3566_s20 = scalar_lea.vmem %s4456_s17, %s2760_s26  ;;  %s3256_s17 = smov 17  }
  0x41   : > { %722 = vmatpush.msra.mxu0 %v699_v9  ;;  %744 = vmatpush.msra.mxu1 %v703_v10  ;;  %v797_v23 = vld [vmem:[#allocation5 + $0x38] sm:$0xff]  ;;  %v796_v24 = vld [vmem:[#allocation5 + $0x30] sm:$0xff]  ;;  %v684_v25 = vld [vmem:[%s4407_s2 + $0xa8] sm:$0xff] }
  0x42   : > { %810 = vmatpush.msra.mxu3 %v801_v11  ;;  %v688_v26 = vld [vmem:[%s4407_s2 + $0xc8] sm:$0xff]  ;;  %v681_v28 = vld [vmem:[%s4407_s2 + $0x90] sm:$0xff]  ;;  %v678_v30 = vld [vmem:[%s4407_s2 + $0x78] sm:$0xff] }
  0x43   : > { %723 = vmatpush.msra.mxu0 %v696_v12  ;;  %745 = vmatpush.msra.mxu1 %v700_v13  ;;  %v795_v27 = vld [vmem:[#allocation5 + $0x28] sm:$0xff]  ;;  %v682_v31 = vld [vmem:[%s4407_s2 + $0x98] sm:$0xff]  ;;  %v794_v32 = vld [vmem:[#allocation5 + $0x20] sm:$0xff] }
  0x44   : > { %811 = vmatpush.msra.mxu3 %v800_v14  ;;  %v685_v29 = vld [vmem:[%s4407_s2 + $0xb0] sm:$0xff]  ;;  %v675_v33 = vld [vmem:[%s4407_s2 + $0x60] sm:$0xff]  ;;  %v672_v36 = vld [vmem:[%s4407_s2 + $0x48] sm:$0xff] }
  0x45   : > { %724 = vmatpush.msra.mxu0 %v693_v15  ;;  %746 = vmatpush.msra.mxu1 %v697_v16  ;;  %v679_v34 = vld [vmem:[%s4407_s2 + $0x80] sm:$0xff]  ;;  %v676_v37 = vld [vmem:[%s4407_s2 + $0x68] sm:$0xff]  ;;  %v792_v38 = vld [vmem:[#allocation5 + $0x10] sm:$0xff]  ;;  %v898_v16 = vlaneseq  ;;  %s2552_s26 = scalar_lea.hbm %s4466_s21, %s2762_s0  ;;  %s3187_s27 = scalar_lea.hbm %s4466_s21, 32 }
  0x46   : > { %812 = vmatpush.msra.mxu3 %v799_v17  ;;  %v793_v35 = vld [vmem:[#allocation5 + $0x18] sm:$0xff]  ;;  %v669_v39 = vld [vmem:[%s4407_s2 + $0x30] sm:$0xff]  ;;  %v790_v44 = vld [vmem:[#allocation5] sm:$0xff] }
  0x47   : > { %725 = vmatpush.msra.mxu0 %v690_v18  ;;  %747 = vmatpush.msra.mxu1 %v694_v19  ;;  %v673_v40 = vld [vmem:[%s4407_s2 + $0x50] sm:$0xff]  ;;  %v666_v42 = vld [vmem:[%s4407_s2 + $0x18] sm:$0xff]  ;;  %v788_v45 = vld [vmem:[%s660_s18] sm:$0xff]  ;;  %v3658_v17 = vshrl.u32 %v898_v16, 7 }
  0x48   : > { %813 = vmatpush.msra.mxu3 %v798_v20  ;;  %v791_v41 = vld [vmem:[#allocation5 + $0x8] sm:$0xff]  ;;  %v670_v43 = vld [vmem:[%s4407_s2 + $0x38] sm:$0xff]  ;;  %v663_v46 = vld [vmem:[%s4407_s2] sm:$0xff] }
  0x49   : > { %726 = vmatpush.msra.mxu0 %v687_v21  ;;  %748 = vmatpush.msra.mxu1 %v691_v22  ;;  %v3578_v47 = vld [vmem:[%s3566_s20] sm:$0xff]  ;;  %v664_v49 = vld [vmem:[%s4407_s2 + $0x8] sm:$0xff]  ;;  %vm901_vm4 = vcmp.eq.s32.totalorder %v3658_v17, 0  ;;  %vm905_vm5 = vcmp.eq.s32.totalorder %v3658_v17, 1  ;;  %vm917_vm6 = vcmp.eq.s32.totalorder %v3658_v17, 2  ;;  %vm929_vm7 = vcmp.eq.s32.totalorder %v3658_v17, 3 }
  0x4a   : > { %814 = vmatpush.msra.mxu3 %v797_v23  ;;  %v667_v48 = vld [vmem:[%s4407_s2 + $0x20] sm:$0xff]  ;;  %v789_v50 = vld [vmem:[%s660_s18 + $0x8] sm:$0xff]  ;;  %s3255_s18 = smov 96   ;;  %vm941_vm8 = vcmp.eq.s32.totalorder %v3658_v17, 4  ;;  %vm953_vm9 = vcmp.eq.s32.totalorder %v3658_v17, 5  ;;  %vm965_vm10 = vcmp.eq.s32.totalorder %v3658_v17, 6 }
  0x4b   : > { %727 = vmatpush.msra.mxu0 %v684_v25  ;;  %749 = vmatpush.msra.mxu1 %v688_v26  ;;  %v3589_v51 = vld [vmem:[%s3566_s20 + $0x8] sm:$0xff]  ;;  %v3593_v52 = vld [vmem:[#allocation2] sm:$0x7]  ;;  %vm977_vm11 = vcmp.eq.s32.totalorder %v3658_v17, 7 }
  0x4c   : > { %815 = vmatpush.msra.mxu3 %v796_v24  ;;  %v713_v53 = vperm.slane %v3593_v52, 0  ;;  %v2932_v54 = vld [vmem:[%s4411_s6] ss:$0 sm:$0xff]  ;;  %v714_v63 = vperm.slane %v3593_v52, 1 }
  0x4d   : > { %728 = vmatpush.msra.mxu0 %v681_v28  ;;  %750 = vmatpush.msra.mxu1 %v685_v29  ;;  %v2931_v4 = vld [vmem:[%s4410_s5] ss:$0 sm:$0xff] }
  0x4e   : > { %816 = vmatpush.msra.mxu3 %v795_v27  ;;  %v3258_v27 = vmov 0.0  }
  0x4f   : > { %729 = vmatpush.msra.mxu0 %v678_v30  ;;  %751 = vmatpush.msra.mxu1 %v682_v31 }
  0x50   : > { %817 = vmatpush.msra.mxu3 %v794_v32 }
  0x51   : > { %730 = vmatpush.msra.mxu0 %v675_v33  ;;  %752 = vmatpush.msra.mxu1 %v679_v34 }
  0x52   : > { %818 = vmatpush.msra.mxu3 %v793_v35 }
  0x53   : > { %731 = vmatpush.msra.mxu0 %v672_v36  ;;  %753 = vmatpush.msra.mxu1 %v676_v37 }
  0x54   : > { %819 = vmatpush.msra.mxu3 %v792_v38 }
  0x55   : > { %732 = vmatpush.msra.mxu0 %v669_v39  ;;  %754 = vmatpush.msra.mxu1 %v673_v40 }
  0x56   : > { %820 = vmatpush.msra.mxu3 %v791_v41 }
  0x57   : > { %733 = vmatpush.msra.mxu0 %v666_v42  ;;  %755 = vmatpush.msra.mxu1 %v670_v43 }
  0x58   : > { %821 = vmatpush.msra.mxu3 %v790_v44 }
  0x59   : > { %822 = vmatmul.f32.vlgmr.msra.gmra.mxu3 %v788_v45  ;;  %734 = vmatpush.msra.mxu0 %v663_v46 }
  0x5a   : > { %735 = vmatmul.f32.vlgmr.msra.gmra.mxu0 %v3578_v47  ;;  %756 = vmatpush.msra.mxu1 %v667_v48 }
  0x5c   : > { %757 = vmatpush.msra.mxu1 %v664_v49 }
  0x5d   : > { %758 = vmatmul.f32.vlgmr.msra.gmra.mxu1 %v3578_v47 }
  0x61   : > { %825 = vmatmul.f32.gmra.mxu3 %v789_v50 }
  0x62   : > { %738 = vmatmul.f32.gmra.mxu0 %v3589_v51 }
  0x65   : > { %761 = vmatmul.f32.gmra.mxu1 %v3589_v51 }
  0xd7   : > { %v736_v55 = vpop.f32.mrf.mxu0 }
  0xd8   : > { %v737_v56 = vadd.f32 %v736_v55, %v713_v53 }
  0xda   : > { %v3599_v57 = vadd.f32 %v2932_v54, %v737_v56  ;;  %v759_v58 = vpop.f32.mrf.mxu1  ;;  %v3639_v5 = vadd.f32 %v2931_v4, %v737_v56 }
  0xdb   : > { %v3624_v3 = vadd.f32 %v759_v58, %v714_v63 }
  0xdc   : > { %v3601_v59 = vpop.f32.mrf.mxu3  ;;  %1173 = vrot.lane.b32.xlu1 %v3599_v57, %s3255_s18 }
  0xdf   : > { %v739_v60 = vpop.f32.mrf.mxu0 }
  0xe0   : > { %v740_v61 = vadd.f32 %v739_v60, %v713_v53 }
  0xe2   : > { %v3605_v62 = vadd.f32 %v2932_v54, %v740_v61  ;;  %v762_v1 = vpop.f32.mrf.mxu1  ;;  %v3643_v6 = vadd.f32 %v2931_v4, %v740_v61 }
  0xe3   : > { %v3618_v2 = vadd.f32 %v762_v1, %v714_v63 }
  0xe4   : > { %v3608_v0 = vpop.f32.mrf.mxu3  ;;  %1175 = vrot.lane.b32.xlu1 %v3605_v62, %s3255_s18 }
  0xe5   : > { %1179 = vrot.lane.b32.xlu0 %v3608_v0, %s3255_s18  ;;  %2711 = vmatpush.xpose.msk.msrb.mxu0 %vm841_vm0, %v3608_v0 }
  0xe6   : > { %2763 = vmatpush.xpose.msk.msrb.mxu1 %vm841_vm0, %v3608_v0 }
  0xe9   : > { %2712 = vmatpush.xpose.msk.msrb.mxu0 %vm841_vm0, %v3601_v59 }
  0xea   : > { %2764 = vmatpush.xpose.msk.msrb.mxu1 %vm841_vm0, %v3601_v59 }
  0xec   : > { %2713 = vmatmul.msk.f32.vlgmr.msrb.gmra.mxu0 %vm841_vm0, %v3599_v57 }
  0xed   : > { %2714 = vmatmul.msk.f32.vlgmr.msrb.gmra.mxu1 %vm841_vm0, %v3605_v62  ;;  %1177 = vrot.lane.b32.xlu0 %v3601_v59, %s3255_s18 }
  0xee   : > { %2715 = vmatpush.xpose.msk.msra.mxu1 %vm841_vm0, %v3618_v2 }
  0xf2   : > { %2716 = vmatpush.xpose.msk.msra.mxu1 %vm841_vm0, %v3624_v3 }
  0xf5   : > { %2717 = vmatmul.msk.f32.vlgmr.msra.gmra.mxu1 %vm841_vm0, %v3639_v5 }
  0xfd   : > { %2718 = vmatmul.msk.f32.gmra.mxu1 %vm841_vm0, %v3643_v6 }
 0x14e   : > { %v1174_v8 = vpop.permute.xlu1 %1173 }
 0x156   : > { %v1176_v10 = vpop.permute.xlu1 %1175 }
 0x157   : > { %v1180_v7 = vpop.permute.xlu0 %1179 }
 0x158   : > { %2721 = vmatpush.xpose.msk.msrb.mxu3 %vm841_vm0, %v1180_v7 }
 0x15f   : > { %v1178_v9 = vpop.permute.xlu0 %1177 }
 0x160   : > { %2722 = vmatpush.xpose.msk.msrb.mxu3 %vm841_vm0, %v1178_v9 }
 0x163   : > { %2723 = vmatmul.msk.f32.vlgmr.msrb.gmra.mxu3 %vm841_vm0, %v1174_v8 }
 0x169   : > { %v871_v11 = vpop.f32.mrf.mxu0 }
 0x16a   : > { %v880_v12 = vrot.slane %v871_v11, 1  ;;  %v3650_v13 = vpop.f32.mrf.mxu1  ;;  %v893_v18 = vsel %vm892_vm2, %v871_v11, 0.0 }
 0x16b   : > { %v881_v14 = vrot.slane %v3650_v13, 1  ;;  %2724 = vmatmul.msk.f32.gmra.mxu3 %vm841_vm0, %v1176_v10 }
 0x16d   : > { %v882_v15 = vsel %vm879_vm1, %v880_v12, %v881_v14  ;;  %v884_v63 = vsel %vm879_vm1, %v881_v14, 0.0 }
 0x16e   : > { %886 = vrot.lane.b32.xlu2 %v882_v15, %s3256_s17 }
 0x1c8   : > { %v887_v19 = vpop.permute.xlu2 %886 }
 0x1c9   : > { %v3663_v20 = vsel %vm895_vm3, %v893_v18, %v887_v19  ;;  %v3761_v19 = vadd.s32 8, %v3658_v17 }
 0x1ca   : > { %v903_v21 = vsel %vm901_vm4, %v3663_v20, 0.0 }
 0x1cb   : > { %909 = vrot.lane.b32.xlu0 %v903_v21, %s3257_s16  ;;  %vm990_vm12 = vcmp.eq.s32.totalorder %v3761_v19, 8  ;;  %vm1002_vm13 = vcmp.eq.s32.totalorder %v3761_v19, 9  ;;  %vm4432_vm14 = vcmp.eq.s32.totalorder %v3761_v19, 10  ;;  %vm4433_vm15 = vcmp.eq.s32.totalorder %v3761_v19, 11 }
 0x1e6   : > { %v1206_v22 = vpop.f32.mrf.mxu3 }
 0x1e7   : > { %v1214_v24 = vrot.slane %v1206_v22, 1  ;;  %v1226_v30 = vsel %vm892_vm2, %v1206_v22, 0.0 }
 0x1ee   : > { %v3669_v23 = vpop.f32.mrf.mxu3 }
 0x1ef   : > { %v1215_v25 = vrot.slane %v3669_v23, 1 }
 0x1f1   : > { %v1216_v26 = vsel %vm879_vm1, %v1214_v24, %v1215_v25  ;;  %v1218_v7 = vsel %vm879_vm1, %v1215_v25, 0.0  ;;  %v894_v24 = vsel %vm892_vm2, %v3650_v13, 0.0  ;;  %v1227_v25 = vsel %vm892_vm2, %v3669_v23, 0.0 }
 0x1f2   : > { %1220 = vrot.lane.b32.xlu2 %v1216_v26, %s3256_s17 }
 0x1fa   : > { %2877 = vrot.lane.b32.xlu2 %v3258_v27, %s3257_s16 }
 0x23d   : > { %v910_v28 = vpop.permute.xlu0 %909 }
 0x23e   : > { %v915_v29 = vsel %vm905_vm5, %v3663_v20, %v910_v28 }
 0x23f   : > { %921 = vrot.lane.b32.xlu0 %v915_v29, %s3257_s16 }
 0x24c   : > { %v1221_v31 = vpop.permute.xlu2 %1220 }
 0x24d   : > { %v3683_v32 = vsel %vm895_vm3, %v1226_v30, %v1221_v31 }
 0x24e   : > { %v1230_v33 = vsel %vm901_vm4, %v3683_v32, 0.0 }
 0x24f   : > { %1234 = vrot.lane.b32.xlu1 %v1230_v33, %s3257_s16 }
 0x254   : > { %v2878_v34 = vpop.permute.xlu2 %2877 }
 0x255   : > { %2882 = vrot.lane.b32.xlu2 %v2878_v34, %s3257_s16 }
 0x2af   : > { %v2883_v39 = vpop.permute.xlu2 %2882 }
 0x2b0   : > { %2887 = vrot.lane.b32.xlu2 %v2883_v39, %s3257_s16 }
 0x2b1   : > { %v922_v35 = vpop.permute.xlu0 %921 }
 0x2b2   : > { %v927_v36 = vsel %vm917_vm6, %v3663_v20, %v922_v35 }
 0x2b3   : > { %933 = vrot.lane.b32.xlu0 %v927_v36, %s3257_s16 }
 0x2c1   : > { %v1235_v37 = vpop.permute.xlu1 %1234 }
 0x2c2   : > { %v1240_v38 = vsel %vm905_vm5, %v3683_v32, %v1235_v37 }
 0x2c3   : > { %1244 = vrot.lane.b32.xlu1 %v1240_v38, %s3257_s16 }
 0x30a   : > { %v2888_v44 = vpop.permute.xlu2 %2887 }
 0x30b   : > { %2892 = vrot.lane.b32.xlu2 %v2888_v44, %s3257_s16 }
 0x325   : > { %v934_v40 = vpop.permute.xlu0 %933 }
 0x326   : > { %v939_v41 = vsel %vm929_vm7, %v3663_v20, %v934_v40 }
 0x327   : > { %945 = vrot.lane.b32.xlu0 %v939_v41, %s3257_s16 }
 0x335   : > { %v1245_v42 = vpop.permute.xlu1 %1244 }
 0x336   : > { %v1250_v43 = vsel %vm917_vm6, %v3683_v32, %v1245_v42 }
 0x337   : > { %1254 = vrot.lane.b32.xlu1 %v1250_v43, %s3257_s16 }
 0x365   : > { %v2893_v50 = vpop.permute.xlu2 %2892 }
 0x366   : > { %2897 = vrot.lane.b32.xlu2 %v2893_v50, %s3257_s16 }
 0x399   : > { %v946_v45 = vpop.permute.xlu0 %945 }
 0x39a   : > { %v951_v46 = vsel %vm941_vm8, %v3663_v20, %v946_v45 }
 0x39b   : > { %957 = vrot.lane.b32.xlu0 %v951_v46, %s3257_s16 }
 0x3a9   : > { %v1255_v48 = vpop.permute.xlu1 %1254 }
 0x3aa   : > { %v1260_v49 = vsel %vm929_vm7, %v3683_v32, %v1255_v48 }
 0x3ab   : > { %1264 = vrot.lane.b32.xlu1 %v1260_v49, %s3257_s16 }
 0x3c0   : > { %v2898_v55 = vpop.permute.xlu2 %2897 }
 0x3c1   : > { %2902 = vrot.lane.b32.xlu2 %v2898_v55, %s3257_s16 }
 0x40d   : > { %v958_v53 = vpop.permute.xlu0 %957 }
 0x40e   : > { %v963_v54 = vsel %vm953_vm9, %v3663_v20, %v958_v53 }
 0x40f   : > { %969 = vrot.lane.b32.xlu0 %v963_v54, %s3257_s16 }
 0x41b   : > { %v2903_v1 = vpop.permute.xlu2 %2902 }
 0x41d   : > { %v1265_v56 = vpop.permute.xlu1 %1264 }
 0x41e   : > { %v1270_v58 = vsel %vm941_vm8, %v3683_v32, %v1265_v56 }
 0x41f   : > { %1274 = vrot.lane.b32.xlu1 %v1270_v58, %s3257_s16 }
 0x481   : > { %v970_v60 = vpop.permute.xlu0 %969 }
 0x482   : > { %v975_v61 = vsel %vm965_vm10, %v3663_v20, %v970_v60 }
 0x483   : > { %981 = vrot.lane.b32.xlu0 %v975_v61, %s3257_s16 }
 0x48b   : > { %888 = vrot.lane.b32.xlu0 %v884_v63, %s3256_s17 }
 0x491   : > { %v1275_v4 = vpop.permute.xlu1 %1274 }
 0x492   : > { %v1280_v8 = vsel %vm953_vm9, %v3683_v32, %v1275_v4 }
 0x493   : > { %1222 = vrot.lane.b32.xlu0 %v1218_v7, %s3256_s17  ;;  %1284 = vrot.lane.b32.xlu1 %v1280_v8, %s3257_s16 }
 0x49b   : > { %2907 = vrot.lane.b32.xlu1 %v2903_v1, %s3257_s16 }
 0x4f5   : > { %v982_v9 = vpop.permute.xlu0 %981 }
 0x4f6   : > { %v987_v10 = vsel %vm977_vm11, %v3663_v20, %v982_v9 }
 0x4f7   : > { %993 = vrot.lane.b32.xlu1 %v987_v10, %s3257_s16 }
 0x4fd   : > { %v889_v15 = vpop.permute.xlu0 %888 }
 0x4fe   : > { %v3770_v29 = vsel %vm895_vm3, %v894_v24, %v889_v15  ;;  %v710_v15 = vld [vmem:[%s4407_s2 + $0x178] sm:$0xff]  ;;  %v692_v24 = vld [vmem:[%s4407_s2 + $0xe8] sm:$0xff] }
 0x4ff   : > { %765 = vmatpush.msra.mxu2 %v710_v15 }
 0x505   : > { %v1285_v11 = vpop.permute.xlu1 %1284  ;;  %v1223_v21 = vpop.permute.xlu0 %1222 }
 0x506   : > { %v1290_v12 = vsel %vm965_vm10, %v3683_v32, %v1285_v11  ;;  %v3773_v30 = vsel %vm895_vm3, %v1227_v25, %v1223_v21  ;;  %v698_v21 = vld [vmem:[%s4407_s2 + $0x118] sm:$0xff]  ;;  %v689_v25 = vld [vmem:[%s4407_s2 + $0xd0] sm:$0xff] }
 0x507   : > { %1294 = vrot.lane.b32.xlu2 %v1290_v12, %s3257_s16 }
 0x50d   : > { %v2908_v14 = vpop.permute.xlu1 %2907 }
 0x50f   : > { %2912 = vrot.lane.b32.xlu2 %v2908_v14, %s3257_s16 }
 0x561   : > { %v1295_v16 = vpop.permute.xlu2 %1294 }
 0x562   : > { %v1300_v18 = vsel %vm977_vm11, %v3683_v32, %v1295_v16  ;;  %v707_v16 = vld [vmem:[%s4407_s2 + $0x160] sm:$0xff] }
 0x563   : > { %1304 = vrot.lane.b32.xlu1 %v1300_v18, %s3257_s16  ;;  %v704_v18 = vld [vmem:[%s4407_s2 + $0x148] sm:$0xff]  ;;  %766 = vmatpush.msra.mxu2 %v707_v16 }
 0x565   : > { %767 = vmatpush.msra.mxu2 %v704_v18 }
 0x569   : > { %v994_v20 = vpop.permute.xlu1 %993  ;;  %v2913_v22 = vpop.permute.xlu2 %2912 }
 0x56a   : > { %1005 = vrot.lane.b32.xlu2 %v994_v20, %s3257_s16  ;;  %v2915_v26 = vunpack.i.h.bf16 %v2913_v22  ;;  %v2914_v28 = vunpack.i.l.bf16 %v2913_v22  ;;  %v701_v20 = vld [vmem:[%s4407_s2 + $0x130] sm:$0xff]  ;;  %v695_v22 = vld [vmem:[%s4407_s2 + $0x100] sm:$0xff] }
 0x56b   : > { %768 = vmatpush.msra.mxu2 %v701_v20 }
 0x56c   : > { %v1000_v31 = vsel %vm990_vm12, %v3770_v29, %v2914_v28  ;;  %v1311_v32 = vsel %vm990_vm12, %v3773_v30, %v2915_v26  ;;  %v686_v26 = vld [vmem:[%s4407_s2 + $0xb8] sm:$0xff]  ;;  %v683_v28 = vld [vmem:[%s4407_s2 + $0xa0] sm:$0xff] }
 0x56d   : > { %1007 = vrot.lane.b32.xlu0 %v1000_v31, %s3257_s16  ;;  %769 = vmatpush.msra.mxu2 %v698_v21  ;;  %v680_v31 = vld [vmem:[%s4407_s2 + $0x88] sm:$0xff] }
 0x56f   : > { %770 = vmatpush.msra.mxu2 %v695_v22 }
 0x571   : > { %771 = vmatpush.msra.mxu2 %v692_v24 }
 0x572   : > { %1316 = vrot.lane.b32.xlu2 %v1311_v32, %s3257_s16  ;;  %v677_v32 = vld [vmem:[%s4407_s2 + $0x70] sm:$0xff] }
 0x573   : > { %772 = vmatpush.msra.mxu2 %v689_v25 }
 0x575   : > { %773 = vmatpush.msra.mxu2 %v686_v26 }
 0x577   : > { %774 = vmatpush.msra.mxu2 %v683_v28 }
 0x579   : > { %775 = vmatpush.msra.mxu2 %v680_v31 }
 0x57b   : > { %776 = vmatpush.msra.mxu2 %v677_v32 }
 0x5c4   : > { %v1006_v13 = vpop.permute.xlu2 %1005 }
 0x5c5   : > { %1017 = vrot.lane.b32.xlu0 %v1006_v13, %s3257_s16  ;;  %v674_v13 = vld [vmem:[%s4407_s2 + $0x58] sm:$0xff] }
 0x5c6   : > { %777 = vmatpush.msra.mxu2 %v674_v13 }
 0x5cc   : > { %v1317_v23 = vpop.permute.xlu2 %1316 }
 0x5cd   : > { %v1321_v33 = vsel %vm1002_vm13, %v3773_v30, %v1317_v23 }
 0x5ce   : > { %1326 = vrot.lane.b32.xlu0 %v1321_v33, %s3257_s16 }
 0x5d5   : > { %v1305_v34 = vpop.permute.xlu1 %1304 }
 0x5d6   : > { %1314 = vrot.lane.b32.xlu1 %v1305_v34, %s3257_s16  ;;  %v671_v34 = vld [vmem:[%s4407_s2 + $0x40] sm:$0xff] }
 0x5d7   : > { %778 = vmatpush.msra.mxu2 %v671_v34 }
 0x5df   : > { %v1008_v35 = vpop.permute.xlu0 %1007 }
 0x5e0   : > { %v1012_v36 = vsel %vm1002_vm13, %v3770_v29, %v1008_v35  ;;  %v668_v35 = vld [vmem:[%s4407_s2 + $0x28] sm:$0xff] }
 0x5e1   : > { %1019 = vrot.lane.b32.xlu2 %v1012_v36, %s3257_s16  ;;  %v665_v36 = vld [vmem:[%s4407_s2 + $0x10] sm:$0xff]  ;;  %779 = vmatpush.msra.mxu2 %v668_v35 }
 0x5e3   : > { %780 = vmatpush.msra.mxu2 %v665_v36 }
 0x5e4   : > { %781 = vmatmul.f32.vlgmr.msra.gmra.mxu2 %v3578_v47 }
 0x5ec   : > { %784 = vmatmul.f32.gmra.mxu2 %v3589_v51 }
 0x637   : > { %v1018_v40 = vpop.permute.xlu0 %1017 }
 0x63b   : > { %v1020_v37 = vpop.permute.xlu2 %1019 }
 0x63c   : > { %v1024_v38 = vsel %vm4432_vm14, %v3770_v29, %v1020_v37 }
 0x63d   : > { %1031 = vrot.lane.b32.xlu0 %v1024_v38, %s3257_s16 }
 0x640   : > { %v1327_v41 = vpop.permute.xlu0 %1326 }
 0x641   : > { %v1331_v42 = vsel %vm4432_vm14, %v3773_v30, %v1327_v41  ;;  %vm4435_vm14 = vcmp.eq.s32.totalorder %v3761_v19, 12 }
 0x645   : > { %1386 = vrot.lane.b32.xlu0 %v3624_v3, %s3255_s18 }
 0x648   : > { %v1315_v39 = vpop.permute.xlu1 %1314 }
 0x649   : > { %1324 = vrot.lane.b32.xlu1 %v1315_v39, %s3257_s16 }
 0x64d   : > { %1384 = vrot.lane.b32.xlu0 %v3643_v6, %s3255_s18 }
 0x651   : > { %1029 = vrot.lane.b32.xlu1 %v1018_v40, %s3257_s16  ;;  %v1114_v40 = vpop.f32.mrf.mxu1 }
 0x659   : > { %1336 = vrot.lane.b32.xlu1 %v1331_v42, %s3257_s16  ;;  %v1117_v42 = vpop.f32.mrf.mxu1 }
 0x661   : > { %1382 = vrot.lane.b32.xlu1 %v3639_v5, %s3255_s18 }
 0x6af   : > { %v1032_v48 = vpop.permute.xlu0 %1031 }
 0x6b0   : > { %v1036_v49 = vsel %vm4433_vm15, %v3770_v29, %v1032_v48 }
 0x6b7   : > { %v1387_v54 = vpop.permute.xlu0 %1386 }
 0x6bb   : > { %v1325_v43 = vpop.permute.xlu1 %1324 }
 0x6bc   : > { %1334 = vrot.lane.b32.xlu2 %v1325_v43, %s3257_s16 }
 0x6bf   : > { %v1385_v58 = vpop.permute.xlu0 %1384 }
 0x6c3   : > { %v1030_v44 = vpop.permute.xlu1 %1029 }
 0x6c4   : > { %1388 = vrot.lane.b32.xlu2 %v3618_v2, %s3255_s18 }
 0x6cb   : > { %v1337_v45 = vpop.permute.xlu1 %1336 }
 0x6cc   : > { %1041 = vrot.lane.b32.xlu2 %v1030_v44, %s3257_s16  ;;  %v1341_v46 = vsel %vm4433_vm15, %v3773_v30, %v1337_v45  ;;  %vm4434_vm15 = vcmp.eq.s32.totalorder %v3761_v19, 13 }
 0x6cd   : > { %1346 = vrot.lane.b32.xlu0 %v1341_v46, %s3257_s16 }
 0x6d3   : > { %v1383_v55 = vpop.permute.xlu1 %1382 }
 0x6d4   : > { %1043 = vrot.lane.b32.xlu2 %v1036_v49, %s3257_s16 }
 0x716   : > { %v1335_v50 = vpop.permute.xlu2 %1334 }
 0x717   : > { %1344 = vrot.lane.b32.xlu1 %v1335_v50, %s3257_s16 }
 0x71e   : > { %v1389_v53 = vpop.permute.xlu2 %1388 }
 0x71f   : > { %2725 = vmatpush.xpose.msk.msra.mxu0 %vm841_vm0, %v1389_v53 }
 0x723   : > { %2726 = vmatpush.xpose.msk.msra.mxu0 %vm841_vm0, %v1387_v54 }
 0x726   : > { %v1042_v56 = vpop.permute.xlu2 %1041  ;;  %2727 = vmatmul.msk.f32.vlgmr.msra.gmra.mxu0 %vm841_vm0, %v1383_v55 }
 0x727   : > { %1053 = vrot.lane.b32.xlu1 %v1042_v56, %s3257_s16 }
 0x72e   : > { %v1044_v60 = vpop.permute.xlu2 %1043  ;;  %2728 = vmatmul.msk.f32.gmra.mxu0 %vm841_vm0, %v1385_v58 }
 0x72f   : > { %v1048_v61 = vsel %vm4435_vm14, %v3770_v29, %v1044_v60  ;;  %v782_v60 = vpop.f32.mrf.mxu2 }
 0x730   : > { %1055 = vrot.lane.b32.xlu0 %v1048_v61, %s3257_s16  ;;  %v715_v61 = vperm.slane %v3593_v52, 2 }
 0x73f   : > { %v1347_v63 = vpop.permute.xlu0 %1346 }
 0x740   : > { %v1351_v1 = vsel %vm4435_vm14, %v3773_v30, %v1347_v63  ;;  %vm1074_vm14 = vcmp.eq.s32.totalorder %v3761_v19, 15  ;;  %v783_v63 = vadd.f32 %v782_v60, %v715_v61 }
 0x741   : > { %1356 = vrot.lane.b32.xlu1 %v1351_v1, %s3257_s16  ;;  %v785_v1 = vpop.f32.mrf.mxu2 }
 0x789   : > { %v1345_v4 = vpop.permute.xlu1 %1344 }
 0x78a   : > { %1354 = vrot.lane.b32.xlu2 %v1345_v4, %s3257_s16  ;;  %v786_v4 = vadd.f32 %v785_v1, %v715_v61 }
 0x78c   : > { %1164 = vmatpush.msrb.mxu2 %v786_v4 }
 0x78e   : > { %1165 = vmatpush.msrb.mxu2 %v783_v63 }
 0x799   : > { %v1054_v7 = vpop.permute.xlu1 %1053 }
 0x79a   : > { %1065 = vrot.lane.b32.xlu2 %v1054_v7, %s3257_s16  ;;  %v3923_v7 = vpack.i.bf16 %v783_v63, %v786_v4 }
 0x7a2   : > { %v1056_v8 = vpop.permute.xlu0 %1055 }
 0x7a3   : > { %v1060_v9 = vsel %vm4434_vm15, %v3770_v29, %v1056_v8  ;;  %v1415_v51 = vpop.f32.mrf.mxu0 }
 0x7a4   : > { %1067 = vrot.lane.b32.xlu1 %v1060_v9, %s3257_s16 }
 0x7ab   : > { %v1418_v54 = vpop.f32.mrf.mxu0 }
 0x7b3   : > { %v1357_v10 = vpop.permute.xlu1 %1356 }
 0x7b4   : > { %v1361_v11 = vsel %vm4434_vm15, %v3773_v30, %v1357_v10  ;;  %vm1062_vm15 = vcmp.eq.s32.totalorder %v3761_v19, 14 }
 0x7b5   : > { %1366 = vrot.lane.b32.xlu2 %v1361_v11, %s3257_s16 }
 0x7e4   : > { %v1355_v12 = vpop.permute.xlu2 %1354 }
 0x7e5   : > { %1364 = vrot.lane.b32.xlu0 %v1355_v12, %s3257_s16 }
 0x7f4   : > { %v1066_v14 = vpop.permute.xlu2 %1065 }
 0x7f5   : > { %1077 = vrot.lane.b32.xlu0 %v1066_v14, %s3257_s16 }
 0x80f   : > { %v1367_v23 = vpop.permute.xlu2 %1366 }
 0x810   : > { %v1371_v33 = vsel %vm1062_vm15, %v3773_v30, %v1367_v23 }
 0x811   : > { %1376 = vrot.lane.b32.xlu0 %v1371_v33, %s3257_s16 }
 0x816   : > { %v1068_v37 = vpop.permute.xlu1 %1067 }
 0x817   : > { %v1072_v38 = vsel %vm1062_vm15, %v3770_v29, %v1068_v37 }
 0x818   : > { %1079 = vrot.lane.b32.xlu2 %v1072_v38, %s3257_s16 }
 0x857   : > { %v1365_v39 = vpop.permute.xlu0 %1364 }
 0x858   : > { %1374 = vrot.lane.b32.xlu1 %v1365_v39, %s3257_s16 }
 0x867   : > { %v1078_v45 = vpop.permute.xlu0 %1077 }
 0x868   : > { %v1115_v47 = vadd.f32 %v1114_v40, %v1078_v45 }
 0x86a   : > { %v1120_v49 = vmul.f32 0.17677669, %v1115_v47 }
 0x86c   : > { %v1122_v50 = vsel %vm892_vm2, %v1120_v49, -inf }
 0x872   : > { %v1080_v41 = vpop.permute.xlu2 %1079 }
 0x873   : > { %v1084_v43 = vsel %vm1074_vm14, %v3770_v29, %v1080_v41 }
 0x874   : > { %v1118_v44 = vadd.f32 %v1117_v42, %v1084_v43 }
 0x876   : > { %v1121_v46 = vmul.f32 0.17677669, %v1118_v44 }
 0x878   : > { %v1125_v48 = vsel %vm892_vm2, %v1121_v46, -inf }
 0x879   : > { %1126 = vmax.xlane.f32.xlu0 %v1125_v48 }
 0x882   : > { %1123 = vmax.xlane.f32.xlu1 %v1122_v50 }
 0x883   : > { %v1377_v53 = vpop.permute.xlu0 %1376 }
 0x884   : > { %v1381_v55 = vsel %vm1074_vm14, %v3773_v30, %v1377_v53 }
 0x885   : > { %v1419_v56 = vadd.f32 %v1418_v54, %v1381_v55 }
 0x887   : > { %v1422_v29 = vmul.f32 0.17677669, %v1419_v56 }
 0x889   : > { %v1426_v58 = vsel %vm892_vm2, %v1422_v29, -inf }
 0x88a   : > { %1427 = vmax.xlane.f32.xlu2 %v1426_v58 }
 0x89b   : > { %2917 = vrot.lane.b32.xlu1 %v3923_v7, %s3255_s18 }
 0x8ca   : > { %v1375_v30 = vpop.permute.xlu1 %1374 }
 0x8cb   : > { %v1416_v25 = vadd.f32 %v1415_v51, %v1375_v30 }
 0x8cd   : > { %v1421_v28 = vmul.f32 0.17677669, %v1416_v25 }
 0x8cf   : > { %v1423_v31 = vsel %vm892_vm2, %v1421_v28, -inf }
 0x8ec   : > { %v1127_v8 = vpop.xlane.xlu0 %1126 }
 0x8ed   : > { %v1129_v9 = vsub.f32 %v1121_v46, %v1127_v8 }
 0x8ef   : > { %v1132_v10 = vmul.f32 1.442695, %v1129_v9 }
 0x8f1   : > { %2939 = vpow2.f32 %v1132_v10 }
 0x8f5   : > { %v1124_v11 = vpop.xlane.xlu1 %1123 }
 0x8f6   : > { %v1128_v12 = vsub.f32 %v1120_v49, %v1124_v11 }
 0x8f7   : > { %v2940_v14 = vpop.eup %2939 }
 0x8f8   : > { %v1130_v15 = vmul.f32 1.442695, %v1128_v12  ;;  %v1137_v52 = vsel %vm892_vm2, %v2940_v14, 0.0 }
 0x8f9   : > { %1138 = vadd.xlane.f32.xlu0 %v1137_v52 }
 0x8fa   : > { %2941 = vpow2.f32 %v1130_v15 }
 0x8fd   : > { %v1428_v16 = vpop.xlane.xlu2 %1427 }
 0x8fe   : > { %v1430_v18 = vsub.f32 %v1422_v29, %v1428_v16 }
 0x900   : > { %v2942_v20 = vpop.eup %2941  ;;  %v1433_v21 = vmul.f32 1.442695, %v1430_v18 }
 0x901   : > { %v1134_v22 = vsel %vm892_vm2, %v2942_v20, 0.0 }
 0x902   : > { %2943 = vpow2.f32 %v1433_v21  ;;  %1135 = vadd.xlane.f32.xlu1 %v1134_v22 }
 0x908   : > { %v2944_v24 = vpop.eup %2943 }
 0x909   : > { %v1438_v26 = vsel %vm892_vm2, %v2944_v24, 0.0 }
 0x90a   : > { %1439 = vadd.xlane.f32.xlu2 %v1438_v26 }
 0x90d   : > { %1488 = vrot.lane.b32.xlu0 %v3608_v0, %s3259_s22  ;;  %v2918_v32 = vpop.permute.xlu1 %2917 }
 0x90e   : > { %v2920_v13 = vunpack.i.h.bf16 %v2918_v32  ;;  %v2919_v23 = vunpack.i.l.bf16 %v2918_v32 }
 0x910   : > { %1473 = vmatpush.msrb.mxu1 %v2919_v23 }
 0x912   : > { %1424 = vmax.xlane.f32.xlu2 %v1423_v31  ;;  %1474 = vmatpush.msrb.mxu1 %v2920_v13 }
 0x915   : > { %1793 = vrot.lane.b32.xlu0 %v3601_v59, %s3260_s23 }
 0x91b   : > { %1486 = vrot.lane.b32.xlu1 %v3601_v59, %s3259_s22 }
 0x91d   : > { %1789 = vrot.lane.b32.xlu0 %v3599_v57, %s3260_s23 }
 0x923   : > { %1482 = vrot.lane.b32.xlu1 %v3599_v57, %s3259_s22 }
 0x92a   : > { %1795 = vrot.lane.b32.xlu2 %v3608_v0, %s3260_s23 }
 0x92b   : > { %1791 = vrot.lane.b32.xlu1 %v3605_v62, %s3260_s23 }
 0x96c   : > { %v1139_v59 = vpop.xlane.xlu0 %1138 }
 0x975   : > { %v1136_v33 = vpop.xlane.xlu1 %1135 }
 0x976   : > { %2945 = vrcp.f32 %v1136_v33 }
 0x977   : > { %2947 = vrcp.f32 %v1139_v59 }
 0x97c   : > { %v2946_v34 = vpop.eup %2945 }
 0x97d   : > { %v1440_v35 = vpop.xlane.xlu2 %1439  ;;  %v1142_v36 = vmul.f32 %v2946_v34, %v2942_v20  ;;  %v2948_v57 = vpop.eup %2947 }
 0x97e   : > { %v1143_v38 = vmul.f32 %v2948_v57, %v2940_v14 }
 0x97f   : > { %v1489_v37 = vpop.permute.xlu0 %1488  ;;  %2719 = vmatmul.msk.f32.vlgmr.msrb.gmra.mxu2 %vm892_vm2, %v1142_v36 }
 0x980   : > { %2731 = vmatpush.xpose.msk.msra.mxu2 %vm841_vm0, %v1489_v37 }
 0x985   : > { %v1425_v0 = vpop.xlane.xlu2 %1424 }
 0x986   : > { %v1429_v39 = vsub.f32 %v1421_v28, %v1425_v0 }
 0x987   : > { %2720 = vmatmul.msk.f32.gmra.mxu2 %vm892_vm2, %v1143_v38  ;;  %v1794_v44 = vpop.permute.xlu0 %1793 }
 0x988   : > { %v1431_v40 = vmul.f32 1.442695, %v1429_v39 }
 0x98a   : > { %2949 = vpow2.f32 %v1431_v40 }
 0x98d   : > { %v1796_v41 = vpop.permute.xlu2 %1795  ;;  %v1487_v42 = vpop.permute.xlu1 %1486 }
 0x98e   : > { %2732 = vmatpush.xpose.msk.msra.mxu2 %vm841_vm0, %v1487_v42  ;;  %2741 = vmatpush.xpose.msk.msra.mxu1 %vm841_vm0, %v1796_v41 }
 0x98f   : > { %v1790_v54 = vpop.permute.xlu0 %1789 }
 0x990   : > { %v2950_v43 = vpop.eup %2949 }
 0x991   : > { %v1435_v45 = vsel %vm892_vm2, %v2950_v43, 0.0 }
 0x992   : > { %1436 = vadd.xlane.f32.xlu2 %v1435_v45  ;;  %2742 = vmatpush.xpose.msk.msra.mxu1 %vm841_vm0, %v1794_v44 }
 0x995   : > { %v1483_v46 = vpop.permute.xlu1 %1482 }
 0x996   : > { %2733 = vmatmul.msk.f32.vlgmr.msra.gmra.mxu2 %vm841_vm0, %v1483_v46 }
 0x99d   : > { %v1792_v55 = vpop.permute.xlu1 %1791 }
 0x9aa   : > { %1484 = vrot.lane.b32.xlu2 %v3605_v62, %s3259_s22 }
 0xa02   : > { %v3960_v62 = vpop.f32.mrf.mxu2 }
 0xa05   : > { %v1437_v48 = vpop.xlane.xlu2 %1436 }
 0xa06   : > { %2951 = vrcp.f32 %v1437_v48 }
 0xa07   : > { %2953 = vrcp.f32 %v1440_v35 }
 0xa0a   : > { %v3962_v56 = vpop.f32.mrf.mxu2 }
 0xa0c   : > { %v2952_v47 = vpop.eup %2951 }
 0xa0d   : > { %v1443_v51 = vmul.f32 %v2952_v47, %v2950_v43  ;;  %v1485_v49 = vpop.permute.xlu2 %1484  ;;  %v2954_v50 = vpop.eup %2953 }
 0xa0e   : > { %2734 = vmatmul.msk.f32.gmra.mxu2 %vm841_vm0, %v1485_v49  ;;  %v1444_v53 = vmul.f32 %v2954_v50, %v2944_v24 }
 0xa0f   : > { %2729 = vmatmul.msk.f32.vlgmr.msrb.gmra.mxu1 %vm892_vm2, %v1443_v51 }
 0xa17   : > { %2730 = vmatmul.msk.f32.gmra.mxu1 %vm892_vm2, %v1444_v53 }
 0xa19   : > { %v1515_v29 = vpop.f32.mrf.mxu2 }
 0xa1a   : > { %v1523_v61 = vrot.slane %v1515_v29, 1  ;;  %v1535_v12 = vsel %vm892_vm2, %v1515_v29, 0.0 }
 0xa1f   : > { %2743 = vmatmul.msk.f32.vlgmr.msra.gmra.mxu1 %vm841_vm0, %v1790_v54 }
 0xa27   : > { %2744 = vmatmul.msk.f32.gmra.mxu1 %vm841_vm0, %v1792_v55 }
 0xa8c   : > { %v3964_v58 = vpop.f32.mrf.mxu1 }
 0xa91   : > { %v3966_v60 = vpop.f32.mrf.mxu2 }
 0xa92   : > { %v1524_v63 = vrot.slane %v3966_v60, 1 }
 0xa94   : > { %v3969_v1 = vpop.f32.mrf.mxu1  ;;  %v1525_v4 = vsel %vm879_vm1, %v1523_v61, %v1524_v63  ;;  %v1527_v53 = vsel %vm879_vm1, %v1524_v63, 0.0 }
 0xa95   : > { %1529 = vrot.lane.b32.xlu2 %v1525_v4, %s3256_s17 }
 0xa9c   : > { %v1822_v8 = vpop.f32.mrf.mxu1 }
 0xa9d   : > { %1852 = vrot.lane.b32.xlu2 %v3258_v27, %s3257_s16  ;;  %v1830_v9 = vrot.slane %v1822_v8, 1  ;;  %v1842_v16 = vsel %vm892_vm2, %v1822_v8, 0.0 }
 0xaa4   : > { %v3977_v30 = vpop.f32.mrf.mxu1 }
 0xaa5   : > { %v1831_v10 = vrot.slane %v3977_v30, 1 }
 0xaa7   : > { %v1832_v11 = vsel %vm879_vm1, %v1830_v9, %v1831_v10  ;;  %v1834_v50 = vsel %vm879_vm1, %v1831_v10, 0.0  ;;  %vm4457_vm1 = vcmp.eq.s32.totalorder %v3761_v19, 10 }
 0xaa8   : > { %1836 = vrot.lane.b32.xlu0 %v1832_v11, %s3256_s17 }
 0xaef   : > { %v1530_v14 = vpop.permute.xlu2 %1529 }
 0xaf0   : > { %v3986_v15 = vsel %vm895_vm3, %v1535_v12, %v1530_v14 }
 0xaf1   : > { %v1539_v52 = vsel %vm901_vm4, %v3986_v15, 0.0 }
 0xaf2   : > { %1543 = vrot.lane.b32.xlu0 %v1539_v52, %s3257_s16  ;;  %v1843_v52 = vsel %vm892_vm2, %v3977_v30, 0.0  ;;  %v1536_v30 = vsel %vm892_vm2, %v3966_v60, 0.0 }
 0xaf7   : > { %v1853_v22 = vpop.permute.xlu2 %1852 }
 0xb1a   : > { %v1837_v18 = vpop.permute.xlu0 %1836 }
 0xb1b   : > { %v3994_v20 = vsel %vm895_vm3, %v1842_v16, %v1837_v18 }
 0xb1c   : > { %v1846_v21 = vsel %vm901_vm4, %v3994_v20, 0.0  ;;  %vm4459_vm4 = vcmp.eq.s32.totalorder %v3761_v19, 11 }
 0xb1d   : > { %1850 = vrot.lane.b32.xlu1 %v1846_v21, %s3257_s16 }
 0xb25   : > { %1545 = vrot.lane.b32.xlu1 %v3258_v27, %s3257_s16 }
 0xb2d   : > { %1862 = vrot.lane.b32.xlu1 %v1853_v22, %s3257_s16 }
 0xb64   : > { %v1544_v24 = vpop.permute.xlu0 %1543 }
 0xb65   : > { %v1549_v25 = vsel %vm905_vm5, %v3986_v15, %v1544_v24 }
 0xb66   : > { %1553 = vrot.lane.b32.xlu2 %v1549_v25, %s3257_s16 }
 0xb8f   : > { %v1851_v26 = vpop.permute.xlu1 %1850 }
 0xb90   : > { %v1856_v28 = vsel %vm905_vm5, %v3994_v20, %v1851_v26  ;;  %vm4460_vm5 = vmmov %vm4459_vm4 }
 0xb91   : > { %1860 = vrot.lane.b32.xlu0 %v1856_v28, %s3257_s16 }
 0xb97   : > { %v1546_v31 = vpop.permute.xlu1 %1545 }
 0xb99   : > { %1555 = vrot.lane.b32.xlu0 %v1546_v31, %s3257_s16 }
 0xb9f   : > { %v1863_v27 = vpop.permute.xlu1 %1862 }
 0xba1   : > { %1872 = vrot.lane.b32.xlu0 %v1863_v27, %s3257_s16 }
 0xbc0   : > { %v1554_v32 = vpop.permute.xlu2 %1553 }
 0xbc1   : > { %v1559_v13 = vsel %vm917_vm6, %v3986_v15, %v1554_v32 }
 0xbc2   : > { %1563 = vrot.lane.b32.xlu1 %v1559_v13, %s3257_s16 }
 0xc03   : > { %v1861_v23 = vpop.permute.xlu0 %1860 }
 0xc04   : > { %v1866_v33 = vsel %vm917_vm6, %v3994_v20, %v1861_v23  ;;  %vm4461_vm6 = vcmp.eq.s32.totalorder %v3761_v19, 12 }
 0xc05   : > { %1870 = vrot.lane.b32.xlu2 %v1866_v33, %s3257_s16 }
 0xc0b   : > { %v1556_v59 = vpop.permute.xlu0 %1555 }
 0xc0d   : > { %1565 = vrot.lane.b32.xlu2 %v1556_v59, %s3257_s16 }
 0xc13   : > { %v1873_v34 = vpop.permute.xlu0 %1872 }
 0xc14   : > { %1882 = vrot.lane.b32.xlu0 %v1873_v34, %s3257_s16 }
 0xc34   : > { %v1564_v35 = vpop.permute.xlu1 %1563 }
 0xc35   : > { %v1569_v36 = vsel %vm929_vm7, %v3986_v15, %v1564_v35 }
 0xc36   : > { %1573 = vrot.lane.b32.xlu2 %v1569_v36, %s3257_s16 }
 0xc5f   : > { %v1871_v37 = vpop.permute.xlu2 %1870 }
 0xc60   : > { %v1876_v57 = vsel %vm929_vm7, %v3994_v20, %v1871_v37  ;;  %vm4462_vm7 = vmmov %vm4461_vm6 }
 0xc61   : > { %1880 = vrot.lane.b32.xlu1 %v1876_v57, %s3257_s16 }
 0xc67   : > { %v1566_v0 = vpop.permute.xlu2 %1565 }
 0xc69   : > { %1575 = vrot.lane.b32.xlu1 %v1566_v0, %s3257_s16 }
 0xc86   : > { %v1883_v38 = vpop.permute.xlu0 %1882 }
 0xc87   : > { %1892 = vrot.lane.b32.xlu2 %v1883_v38, %s3257_s16 }
 0xc90   : > { %v1574_v39 = vpop.permute.xlu2 %1573 }
 0xc91   : > { %v1579_v40 = vsel %vm941_vm8, %v3986_v15, %v1574_v39 }
 0xc92   : > { %1583 = vrot.lane.b32.xlu1 %v1579_v40, %s3257_s16 }
 0xcd3   : > { %v1881_v41 = vpop.permute.xlu1 %1880 }
 0xcd4   : > { %v1886_v42 = vsel %vm941_vm8, %v3994_v20, %v1881_v41  ;;  %vm4463_vm8 = vcmp.eq.s32.totalorder %v3761_v19, 13 }
 0xcd5   : > { %1890 = vrot.lane.b32.xlu0 %v1886_v42, %s3257_s16 }
 0xcdb   : > { %v1576_v43 = vpop.permute.xlu1 %1575 }
 0xcdd   : > { %1585 = vrot.lane.b32.xlu0 %v1576_v43, %s3257_s16 }
 0xce1   : > { %v1893_v44 = vpop.permute.xlu2 %1892 }
 0xce2   : > { %1902 = vrot.lane.b32.xlu1 %v1893_v44, %s3257_s16 }
 0xd04   : > { %v1584_v45 = vpop.permute.xlu1 %1583 }
 0xd05   : > { %v1589_v46 = vsel %vm953_vm9, %v3986_v15, %v1584_v45 }
 0xd06   : > { %1593 = vrot.lane.b32.xlu0 %v1589_v46, %s3257_s16 }
 0xd47   : > { %v1891_v48 = vpop.permute.xlu0 %1890 }
 0xd48   : > { %v1896_v47 = vsel %vm953_vm9, %v3994_v20, %v1891_v48  ;;  %vm4464_vm9 = vmmov %vm4463_vm8 }
 0xd49   : > { %1900 = vrot.lane.b32.xlu2 %v1896_v47, %s3257_s16 }
 0xd4f   : > { %v1586_v51 = vpop.permute.xlu0 %1585 }
 0xd51   : > { %1595 = vrot.lane.b32.xlu2 %v1586_v51, %s3257_s16 }
 0xd54   : > { %v1903_v49 = vpop.permute.xlu1 %1902 }
 0xd55   : > { %1912 = vrot.lane.b32.xlu0 %v1903_v49, %s3257_s16 }
 0xd5d   : > { %1838 = vrot.lane.b32.xlu0 %v1834_v50, %s3256_s17 }
 0xd65   : > { %1531 = vrot.lane.b32.xlu0 %v1527_v53, %s3256_s17 }
 0xd78   : > { %v1594_v54 = vpop.permute.xlu0 %1593 }
 0xd79   : > { %v1599_v55 = vsel %vm965_vm10, %v3986_v15, %v1594_v54 }
 0xd7a   : > { %1603 = vrot.lane.b32.xlu2 %v1599_v55, %s3257_s16 }
 0xda3   : > { %v1901_v29 = vpop.permute.xlu2 %1900 }
 0xda4   : > { %v1906_v61 = vsel %vm965_vm10, %v3994_v20, %v1901_v29  ;;  %vm2125_vm10 = vcmask 785408  }
 0xda5   : > { %1910 = vrot.lane.b32.xlu1 %v1906_v61, %s3257_s16 }
 0xdab   : > { %v1596_v4 = vpop.permute.xlu2 %1595 }
 0xdad   : > { %1605 = vrot.lane.b32.xlu1 %v1596_v4, %s3257_s16 }
 0xdc7   : > { %v1913_v63 = vpop.permute.xlu0 %1912 }
 0xdc8   : > { %1922 = vrot.lane.b32.xlu1 %v1913_v63, %s3257_s16 }
 0xdcf   : > { %v1839_v14 = vpop.permute.xlu0 %1838 }
 0xdd0   : > { %v4083_v16 = vsel %vm895_vm3, %v1843_v52, %v1839_v14 }
 0xdd4   : > { %v1604_v10 = vpop.permute.xlu2 %1603 }
 0xdd5   : > { %v1609_v12 = vsel %vm977_vm11, %v3986_v15, %v1604_v10 }
 0xdd7   : > { %v1532_v15 = vpop.permute.xlu0 %1531 }
 0xdd8   : > { %v4094_v22 = vsel %vm895_vm3, %v1536_v30, %v1532_v15  ;;  %vm4458_vm3 = vmmov %vm4457_vm1 }
 0xe17   : > { %v1911_v8 = vpop.permute.xlu1 %1910 }
 0xe18   : > { %v1916_v9 = vsel %vm977_vm11, %v3994_v20, %v1911_v8 }
 0xe19   : > { %1920 = vrot.lane.b32.xlu2 %v1916_v9, %s3257_s16 }
 0xe1f   : > { %v1606_v11 = vpop.permute.xlu1 %1605 }
 0xe20   : > { %1615 = vrot.lane.b32.xlu1 %v1606_v11, %s3257_s16 }
 0xe21   : > { %1613 = vrot.lane.b32.xlu2 %v1609_v12, %s3257_s16 }
 0xe3a   : > { %v1923_v18 = vpop.permute.xlu1 %1922 }
 0xe3b   : > { %v1927_v20 = vsel %vm990_vm12, %v4083_v16, %v1923_v18 }
 0xe3c   : > { %1932 = vrot.lane.b32.xlu2 %v1927_v20, %s3257_s16 }
 0xe73   : > { %v1921_v21 = vpop.permute.xlu2 %1920 }
 0xe74   : > { %1930 = vrot.lane.b32.xlu0 %v1921_v21, %s3257_s16 }
 0xe7b   : > { %v1614_v17 = vpop.permute.xlu2 %1613 }
 0xe7c   : > { %1623 = vrot.lane.b32.xlu1 %v1614_v17, %s3257_s16 }
 0xe92   : > { %v1616_v24 = vpop.permute.xlu1 %1615 }
 0xe93   : > { %v1620_v25 = vsel %vm990_vm12, %v4094_v22, %v1616_v24 }
 0xe94   : > { %1625 = vrot.lane.b32.xlu0 %v1620_v25, %s3257_s16 }
 0xe96   : > { %v1933_v26 = vpop.permute.xlu2 %1932 }
 0xe97   : > { %v1937_v28 = vsel %vm1002_vm13, %v4083_v16, %v1933_v26 }
 0xe98   : > { %1942 = vrot.lane.b32.xlu1 %v1937_v28, %s3257_s16 }
 0xee6   : > { %v1931_v31 = vpop.permute.xlu0 %1930 }
 0xee7   : > { %1940 = vrot.lane.b32.xlu2 %v1931_v31, %s3257_s16 }
 0xeee   : > { %v1624_v60 = vpop.permute.xlu1 %1623 }
 0xeef   : > { %1633 = vrot.lane.b32.xlu0 %v1624_v60, %s3257_s16 }
 0xf06   : > { %v1626_v27 = vpop.permute.xlu0 %1625 }
 0xf07   : > { %v1630_v32 = vsel %vm1002_vm13, %v4094_v22, %v1626_v27 }
 0xf08   : > { %1635 = vrot.lane.b32.xlu2 %v1630_v32, %s3257_s16 }
 0xf0a   : > { %v1943_v13 = vpop.permute.xlu1 %1942 }
 0xf0b   : > { %v1947_v23 = vsel %vm4457_vm1, %v4083_v16, %v1943_v13 }
 0xf0c   : > { %1952 = vrot.lane.b32.xlu0 %v1947_v23, %s3257_s16 }
 0xf14   : > { %2004 = vrot.lane.b32.xlu0 %v3618_v2, %s3260_s23 }
 0xf1c   : > { %1998 = vrot.lane.b32.xlu0 %v3639_v5, %s3260_s23 }
 0xf24   : > { %2000 = vrot.lane.b32.xlu0 %v3643_v6, %s3260_s23 }
 0xf41   : > { %v1941_v33 = vpop.permute.xlu2 %1940 }
 0xf42   : > { %1950 = vrot.lane.b32.xlu1 %v1941_v33, %s3257_s16 }
 0xf61   : > { %v1634_v59 = vpop.permute.xlu0 %1633 }
 0xf62   : > { %v1636_v34 = vpop.permute.xlu2 %1635  ;;  %1643 = vrot.lane.b32.xlu2 %v1634_v59, %s3257_s16 }
 0xf63   : > { %v1640_v35 = vsel %vm4458_vm3, %v4094_v22, %v1636_v34 }
 0xf64   : > { %1645 = vrot.lane.b32.xlu1 %v1640_v35, %s3257_s16 }
 0xf6a   : > { %2002 = vrot.lane.b32.xlu2 %v3624_v3, %s3260_s23 }
 0xf6c   : > { %1697 = vrot.lane.b32.xlu1 %v3618_v2, %s3259_s22 }
 0xf72   : > { %1695 = vrot.lane.b32.xlu2 %v3624_v3, %s3259_s22 }
 0xf74   : > { %1691 = vrot.lane.b32.xlu1 %v3639_v5, %s3259_s22 }
 0xf7a   : > { %1693 = vrot.lane.b32.xlu2 %v3643_v6, %s3259_s22 }
 0xf7e   : > { %v1953_v36 = vpop.permute.xlu0 %1952 }
 0xf7f   : > { %v1957_v37 = vsel %vm4459_vm4, %v4083_v16, %v1953_v36 }
 0xf80   : > { %1962 = vrot.lane.b32.xlu0 %v1957_v37, %s3257_s16 }
 0xf86   : > { %v2005_v57 = vpop.permute.xlu0 %2004 }
 0xf87   : > { %2745 = vmatpush.xpose.msk.msrb.mxu2 %vm841_vm0, %v2005_v57 }
 0xf8e   : > { %v1999_v0 = vpop.permute.xlu0 %1998 }
 0xf96   : > { %v2001_v6 = vpop.permute.xlu0 %2000 }
 0xfb4   : > { %v1951_v2 = vpop.permute.xlu1 %1950 }
 0xfb5   : > { %1960 = vrot.lane.b32.xlu1 %v1951_v2, %s3257_s16 }
 0xfbc   : > { %v1644_v3 = vpop.permute.xlu2 %1643 }
 0xfbd   : > { %1653 = vrot.lane.b32.xlu2 %v1644_v3, %s3257_s16 }
 0xfc4   : > { %v2003_v5 = vpop.permute.xlu2 %2002 }
 0xfc5   : > { %2746 = vmatpush.xpose.msk.msrb.mxu2 %vm841_vm0, %v2003_v5 }
 0xfc8   : > { %2747 = vmatmul.msk.f32.vlgmr.msrb.gmra.mxu2 %vm841_vm0, %v1999_v0 }
 0xfcc   : > { %v1696_v41 = vpop.permute.xlu2 %1695 }
 0xfd0   : > { %2748 = vmatmul.msk.f32.gmra.mxu2 %vm841_vm0, %v2001_v6 }
 0xfd4   : > { %v1694_v43 = vpop.permute.xlu2 %1693 }
 0xfd6   : > { %v1646_v38 = vpop.permute.xlu1 %1645 }
 0xfd7   : > { %v1650_v39 = vsel %vm4460_vm5, %v4094_v22, %v1646_v38 }
 0xfd8   : > { %1655 = vrot.lane.b32.xlu1 %v1650_v39, %s3257_s16 }
 0xfde   : > { %v1698_v40 = vpop.permute.xlu1 %1697 }
 0xfdf   : > { %2735 = vmatpush.xpose.msk.msra.mxu3 %vm841_vm0, %v1698_v40 }
 0xfe3   : > { %2736 = vmatpush.xpose.msk.msra.mxu3 %vm841_vm0, %v1696_v41 }
 0xfe6   : > { %v1692_v42 = vpop.permute.xlu1 %1691 }
 0xfe7   : > { %2737 = vmatmul.msk.f32.vlgmr.msra.gmra.mxu3 %vm841_vm0, %v1692_v42 }
 0xfef   : > { %2738 = vmatmul.msk.f32.gmra.mxu3 %vm841_vm0, %v1694_v43 }
 0xff2   : > { %v1963_v44 = vpop.permute.xlu0 %1962 }
 0xff3   : > { %v1967_v45 = vsel %vm4461_vm6, %v4083_v16, %v1963_v44 }
 0xff4   : > { %1972 = vrot.lane.b32.xlu1 %v1967_v45, %s3257_s16 }
0x1017   : > { %v1654_v46 = vpop.permute.xlu2 %1653 }
0x1018   : > { %1663 = vrot.lane.b32.xlu2 %v1654_v46, %s3257_s16 }
0x1027   : > { %v1961_v48 = vpop.permute.xlu1 %1960 }
0x1028   : > { %1970 = vrot.lane.b32.xlu0 %v1961_v48, %s3257_s16 }
0x104a   : > { %v1656_v47 = vpop.permute.xlu1 %1655 }
0x104b   : > { %v1660_v51 = vsel %vm4462_vm7, %v4094_v22, %v1656_v47  ;;  %v2031_v11 = vpop.f32.mrf.mxu2 }
0x104c   : > { %1665 = vrot.lane.b32.xlu0 %v1660_v51, %s3257_s16 }
0x1053   : > { %v2034_v52 = vpop.f32.mrf.mxu2 }
0x1066   : > { %v1973_v49 = vpop.permute.xlu1 %1972 }
0x1067   : > { %v1977_v50 = vsel %vm4463_vm8, %v4083_v16, %v1973_v49 }
0x1068   : > { %1982 = vrot.lane.b32.xlu0 %v1977_v50, %s3257_s16 }
0x106a   : > { %v1724_v17 = vpop.f32.mrf.mxu3 }
0x1072   : > { %v1664_v53 = vpop.permute.xlu2 %1663  ;;  %v1727_v27 = vpop.f32.mrf.mxu3 }
0x1073   : > { %1673 = vrot.lane.b32.xlu1 %v1664_v53, %s3257_s16 }
0x109a   : > { %v1971_v54 = vpop.permute.xlu0 %1970 }
0x109b   : > { %1980 = vrot.lane.b32.xlu2 %v1971_v54, %s3257_s16 }
0x10be   : > { %v1666_v55 = vpop.permute.xlu0 %1665 }
0x10bf   : > { %v1670_v29 = vsel %vm4464_vm9, %v4094_v22, %v1666_v55 }
0x10c0   : > { %1675 = vrot.lane.b32.xlu2 %v1670_v29, %s3257_s16 }
0x10da   : > { %v1983_v61 = vpop.permute.xlu0 %1982 }
0x10db   : > { %v1987_v4 = vsel %vm1062_vm15, %v4083_v16, %v1983_v61 }
0x10dc   : > { %1992 = vrot.lane.b32.xlu2 %v1987_v4, %s3257_s16 }
0x10e5   : > { %v1674_v63 = vpop.permute.xlu1 %1673 }
0x10e6   : > { %1683 = vrot.lane.b32.xlu0 %v1674_v63, %s3257_s16 }
0x10f5   : > { %v1981_v8 = vpop.permute.xlu2 %1980 }
0x10f6   : > { %1990 = vrot.lane.b32.xlu1 %v1981_v8, %s3257_s16 }
0x111a   : > { %v1676_v9 = vpop.permute.xlu2 %1675 }
0x111b   : > { %v1680_v10 = vsel %vm1062_vm15, %v4094_v22, %v1676_v9 }
0x111c   : > { %1685 = vrot.lane.b32.xlu1 %v1680_v10, %s3257_s16 }
0x1136   : > { %v1993_v12 = vpop.permute.xlu2 %1992 }
0x1137   : > { %v1997_v14 = vsel %vm1074_vm14, %v4083_v16, %v1993_v12  ;;  %v2142_v12 = vld [vmem:[#allocation7 + $0x70] sm:$0xff] }
0x1138   : > { %v2035_v18 = vadd.f32 %v2034_v52, %v1997_v14  ;;  %v2141_v14 = vld [vmem:[#allocation7 + $0x68] sm:$0xff]  ;;  %v2140_v52 = vld [vmem:[#allocation7 + $0x60] sm:$0xff] }
0x113a   : > { %v2038_v20 = vmul.f32 0.17677669, %v2035_v18 }
0x113c   : > { %v2042_v21 = vsel %vm892_vm2, %v2038_v20, -inf }
0x1146   : > { %2043 = vmax.xlane.f32.xlu1 %v2042_v21  ;;  %v2138_v21 = vld [vmem:[#allocation7 + $0x50] sm:$0xff] }
0x1158   : > { %v1684_v15 = vpop.permute.xlu0 %1683 }
0x1159   : > { %v1725_v30 = vadd.f32 %v1724_v17, %v1684_v15  ;;  %v2137_v17 = vld [vmem:[#allocation7 + $0x48] sm:$0xff]  ;;  %v2136_v15 = vld [vmem:[#allocation7 + $0x40] sm:$0xff] }
0x115b   : > { %v1730_v24 = vmul.f32 0.17677669, %v1725_v30  ;;  %v2135_v30 = vld [vmem:[#allocation7 + $0x38] sm:$0xff] }
0x115d   : > { %v1732_v25 = vsel %vm892_vm2, %v1730_v24, -inf }
0x115e   : > { %1733 = vmax.xlane.f32.xlu2 %v1732_v25  ;;  %v2133_v25 = vld [vmem:[#allocation7 + $0x28] sm:$0xff] }
0x1168   : > { %v1991_v26 = vpop.permute.xlu1 %1990 }
0x1169   : > { %v2032_v28 = vadd.f32 %v2031_v11, %v1991_v26  ;;  %v2143_v11 = vld [vmem:[#allocation7 + $0x78] sm:$0xff] }
0x116b   : > { %v2037_v31 = vmul.f32 0.17677669, %v2032_v28  ;;  %v2132_v28 = vld [vmem:[#allocation7 + $0x20] sm:$0xff] }
0x116d   : > { %v2039_v60 = vsel %vm892_vm2, %v2037_v31, -inf }
0x116e   : > { %2040 = vmax.xlane.f32.xlu0 %v2039_v60  ;;  %v2130_v60 = vld [vmem:[#allocation7 + $0x10] sm:$0xff] }
0x118e   : > { %v1686_v16 = vpop.permute.xlu1 %1685 }
0x118f   : > { %v1690_v32 = vsel %vm1074_vm14, %v4094_v22, %v1686_v16  ;;  %v2129_v16 = vld [vmem:[#allocation7 + $0x8] sm:$0xff] }
0x1190   : > { %v1728_v13 = vadd.f32 %v1727_v27, %v1690_v32  ;;  %v2128_v27 = vld [vmem:[#allocation7] sm:$0xff] }
0x1192   : > { %v1731_v23 = vmul.f32 0.17677669, %v1728_v13 }
0x1194   : > { %v1735_v33 = vsel %vm892_vm2, %v1731_v23, -inf }
0x1195   : > { %1736 = vmax.xlane.f32.xlu0 %v1735_v33 }
0x11a9   : > { %2922 = vrot.lane.b32.xlu0 %v3923_v7, %s3260_s23 }
0x11b9   : > { %v2044_v57 = vpop.xlane.xlu1 %2043 }
0x11ba   : > { %v2046_v22 = vsub.f32 %v2038_v20, %v2044_v57  ;;  %v2139_v20 = vld [vmem:[#allocation7 + $0x58] sm:$0xff] }
0x11bc   : > { %v2049_v5 = vmul.f32 1.442695, %v2046_v22  ;;  %v2933_v22 = vld [vmem:[#allocation8] ss:$0 sm:$0xff] }
0x11d1   : > { %v1734_v59 = vpop.xlane.xlu2 %1733 }
0x11d2   : > { %v1738_v34 = vsub.f32 %v1730_v24, %v1734_v59  ;;  %v2134_v24 = vld [vmem:[#allocation7 + $0x30] sm:$0xff] }
0x11d4   : > { %v1740_v35 = vmul.f32 1.442695, %v1738_v34 }
0x11d6   : > { %2955 = vpow2.f32 %v1740_v35 }
0x11dc   : > { %v2956_v36 = vpop.eup %2955 }
0x11dd   : > { %v1744_v37 = vsel %vm892_vm2, %v2956_v36, 0.0 }
0x11de   : > { %1745 = vadd.xlane.f32.xlu1 %v1744_v37 }
0x11e1   : > { %v2041_v2 = vpop.xlane.xlu0 %2040 }
0x11e2   : > { %v2045_v19 = vsub.f32 %v2037_v31, %v2041_v2  ;;  %v2131_v31 = vld [vmem:[#allocation7 + $0x18] sm:$0xff] }
0x11e4   : > { %v2047_v3 = vmul.f32 1.442695, %v2045_v19 }
0x11e6   : > { %2957 = vpow2.f32 %v2047_v3 }
0x11e7   : > { %2959 = vpow2.f32 %v2049_v5 }
0x11ec   : > { %v2958_v0 = vpop.eup %2957 }
0x11ed   : > { %v2051_v6 = vsel %vm892_vm2, %v2958_v0, 0.0  ;;  %v2960_v38 = vpop.eup %2959 }
0x11ee   : > { %2052 = vadd.xlane.f32.xlu2 %v2051_v6  ;;  %v2054_v39 = vsel %vm892_vm2, %v2960_v38, 0.0 }
0x11f6   : > { %2055 = vadd.xlane.f32.xlu2 %v2054_v39  ;;  %v2986_v39 = vld [vmem:[%s3566_s20 + $0x8] sm:$0xff] }
0x11f7   : > { %2927 = vrot.lane.b32.xlu1 %v3923_v7, %s3259_s22 }
0x11ff   : > { %2100 = vrot.lane.b32.xlu1 %v3969_v1, %s3260_s23 }
0x1208   : > { %v1737_v40 = vpop.xlane.xlu0 %1736 }
0x1209   : > { %v1739_v41 = vsub.f32 %v1731_v23, %v1737_v40 }
0x120b   : > { %v1742_v42 = vmul.f32 1.442695, %v1739_v41  ;;  %v3261_v41 = vmov 128.0  }
0x120d   : > { %2961 = vpow2.f32 %v1742_v42 }
0x1213   : > { %v2962_v43 = vpop.eup %2961 }
0x1214   : > { %v1747_v44 = vsel %vm892_vm2, %v2962_v43, 0.0 }
0x1215   : > { %1748 = vadd.xlane.f32.xlu2 %v1747_v44 }
0x121b   : > { %v2923_v45 = vpop.permute.xlu0 %2922 }
0x121c   : > { %v2924_v46 = vunpack.i.l.bf16 %v2923_v45  ;;  %v2925_v48 = vunpack.i.h.bf16 %v2923_v45 }
0x121e   : > { %2087 = vmatpush.msrb.mxu3 %v2924_v46 }
0x1220   : > { %2088 = vmatpush.msrb.mxu3 %v2925_v48 }
0x122d   : > { %2098 = vrot.lane.b32.xlu2 %v3964_v58, %s3260_s23 }
0x1251   : > { %v1746_v7 = vpop.xlane.xlu1 %1745 }
0x1261   : > { %v2053_v47 = vpop.xlane.xlu2 %2052 }
0x1262   : > { %2963 = vrcp.f32 %v2053_v47 }
0x1263   : > { %2965 = vrcp.f32 %v1746_v7 }
0x1268   : > { %v2964_v1 = vpop.eup %2963 }
0x1269   : > { %v2059_v51 = vmul.f32 %v2964_v1, %v2958_v0  ;;  %v2928_v49 = vpop.permute.xlu1 %2927  ;;  %v2056_v50 = vpop.xlane.xlu2 %2055  ;;  %v2262_v1 = vld [vmem:[%s4416_s11 + $0xf0] sm:$0xff] }
0x126a   : > { %v2966_v53 = vpop.eup %2965  ;;  %v2929_v54 = vunpack.i.l.bf16 %v2928_v49  ;;  %2967 = vrcp.f32 %v2056_v50  ;;  %v2930_v55 = vunpack.i.h.bf16 %v2928_v49  ;;  %v2260_v49 = vld [vmem:[%s4416_s11 + $0xe0] sm:$0xff]  ;;  %2270 = vmatpush.msrb.mxu1 %v2262_v1  ;;  %v2261_v50 = vld [vmem:[%s4416_s11 + $0xe8] sm:$0xff]  ;;  %v2326_v1 = vld [vmem:[#allocation11 + $0x50] sm:$0xff] }
0x126b   : > { %2749 = vmatmul.msk.f32.vlgmr.msrb.gmra.mxu3 %vm892_vm2, %v2059_v51  ;;  %v1752_v29 = vmul.f32 %v2966_v53, %v2956_v36  ;;  %v2263_v51 = vld [vmem:[%s4416_s11 + $0xf8] sm:$0xff] }
0x126c   : > { %1780 = vmatpush.msrb.mxu0 %v2929_v54  ;;  %2293 = vmatpush.msra.mxu2 %v2263_v51  ;;  %v2325_v51 = vld [vmem:[#allocation11 + $0x48] sm:$0xff] }
0x126d   : > { %2271 = vmatpush.msrb.mxu1 %v2260_v49  ;;  %v2324_v49 = vld [vmem:[#allocation11 + $0x40] sm:$0xff] }
0x126e   : > { %1781 = vmatpush.msrb.mxu0 %v2930_v55  ;;  %2294 = vmatpush.msra.mxu2 %v2261_v50 }
0x126f   : > { %2739 = vmatmul.msk.f32.vlgmr.msrb.gmra.mxu0 %vm892_vm2, %v1752_v29 }
0x1270   : > { %v2968_v58 = vpop.eup %2967  ;;  %2148 = vmatpush.msra.mxu0 %v2143_v11  ;;  %v2252_v11 = vld [vmem:[%s4416_s11 + $0xa0] sm:$0xff] }
0x1271   : > { %v2060_v61 = vmul.f32 %v2968_v58, %v2960_v38  ;;  %v2101_v35 = vpop.permute.xlu1 %2100 }
0x1272   : > { %2149 = vmatpush.msra.mxu0 %v2142_v12  ;;  %v2121_v36 = vsel %vm841_vm0, %v3962_v56, %v2101_v35  ;;  %v2253_v12 = vld [vmem:[%s4416_s11 + $0xa8] sm:$0xff] }
0x1273   : > { %2750 = vmatmul.msk.f32.gmra.mxu3 %vm892_vm2, %v2060_v61  ;;  %v2258_v61 = vld [vmem:[%s4416_s11 + $0xd0] sm:$0xff] }
0x1274   : > { %2150 = vmatpush.msra.mxu0 %v2141_v14  ;;  %2272 = vmatpush.msrb.mxu1 %v2258_v61  ;;  %v2250_v14 = vld [vmem:[%s4416_s11 + $0x90] sm:$0xff] }
0x1275   : > { %v2321_v61 = vld [vmem:[#allocation11 + $0x28] sm:$0xff] }
0x1276   : > { %2151 = vmatpush.msra.mxu0 %v2140_v52  ;;  %v2251_v52 = vld [vmem:[%s4416_s11 + $0x98] sm:$0xff] }
0x1278   : > { %2152 = vmatpush.msra.mxu0 %v2139_v20  ;;  %v2249_v20 = vld [vmem:[%s4416_s11 + $0x88] sm:$0xff] }
0x127a   : > { %2153 = vmatpush.msra.mxu0 %v2138_v21  ;;  %v2246_v21 = vld [vmem:[%s4416_s11 + $0x70] sm:$0xff] }
0x127c   : > { %2154 = vmatpush.msra.mxu0 %v2137_v17  ;;  %v2247_v17 = vld [vmem:[%s4416_s11 + $0x78] sm:$0xff] }
0x127e   : > { %2155 = vmatpush.msra.mxu0 %v2136_v15  ;;  %v2244_v15 = vld [vmem:[%s4416_s11 + $0x60] sm:$0xff] }
0x1280   : > { %2156 = vmatpush.msra.mxu0 %v2135_v30  ;;  %v2245_v30 = vld [vmem:[%s4416_s11 + $0x68] sm:$0xff] }
0x1282   : > { %2157 = vmatpush.msra.mxu0 %v2134_v24  ;;  %v2242_v24 = vld [vmem:[%s4416_s11 + $0x50] sm:$0xff] }
0x1284   : > { %2158 = vmatpush.msra.mxu0 %v2133_v25  ;;  %v2243_v25 = vld [vmem:[%s4416_s11 + $0x58] sm:$0xff] }
0x1286   : > { %2159 = vmatpush.msra.mxu0 %v2132_v28  ;;  %v2241_v28 = vld [vmem:[%s4416_s11 + $0x48] sm:$0xff] }
0x1288   : > { %v1749_v4 = vpop.xlane.xlu2 %1748  ;;  %2160 = vmatpush.msra.mxu0 %v2131_v31  ;;  %v2238_v31 = vld [vmem:[%s4416_s11 + $0x30] sm:$0xff] }
0x1289   : > { %2969 = vrcp.f32 %v1749_v4  ;;  %v2259_v4 = vld [vmem:[%s4416_s11 + $0xd8] sm:$0xff] }
0x128a   : > { %2161 = vmatpush.msra.mxu0 %v2130_v60  ;;  %2971 = vrcp.f32 %v3261_v41  ;;  %2295 = vmatpush.msra.mxu2 %v2259_v4  ;;  %v2239_v60 = vld [vmem:[%s4416_s11 + $0x38] sm:$0xff]  ;;  %v2329_v41 = vld [vmem:[#allocation11 + $0x68] sm:$0xff] }
0x128c   : > { %2162 = vmatpush.msra.mxu0 %v2129_v16  ;;  %v2236_v16 = vld [vmem:[%s4416_s11 + $0x20] sm:$0xff] }
0x128e   : > { %2163 = vmatpush.msra.mxu0 %v2128_v27  ;;  %v2237_v27 = vld [vmem:[%s4416_s11 + $0x28] sm:$0xff] }
0x128f   : > { %v2970_v63 = vpop.eup %2969 }
0x1290   : > { %v1753_v8 = vmul.f32 %v2970_v63, %v2962_v43  ;;  %v2099_v13 = vpop.permute.xlu2 %2098  ;;  %v2972_v56 = vpop.eup %2971  ;;  %v2256_v63 = vld [vmem:[%s4416_s11 + $0xc0] sm:$0xff] }
0x1291   : > { %v2120_v23 = vsel %vm841_vm0, %v3960_v62, %v2099_v13  ;;  %v2985_v62 = vld [vmem:[%s3566_s20] sm:$0xff]  ;;  %v2180_v42 = vmul.f32 128.0, %v2972_v56  ;;  %vm2184_vm0 = vweird.f32 %v2972_v56  ;;  %2273 = vmatpush.msrb.mxu1 %v2256_v63  ;;  %v2235_v13 = vld [vmem:[%s4416_s11 + $0x18] sm:$0xff]  ;;  %v2320_v63 = vld [vmem:[#allocation11 + $0x20] sm:$0xff]  ;;  %s648_s20 = sand.u32 1, %s3237_s25  }
0x1292   : > { %2740 = vmatmul.msk.f32.gmra.mxu0 %vm892_vm2, %v1753_v8  ;;  %vm2122_vm2 = vcmask 523264   ;;  %v2257_v8 = vld [vmem:[%s4416_s11 + $0xc8] sm:$0xff]  ;;  %s2706_s4 = sshll.u32 %s648_s20, 4  ;;  %s2541_s28 = scalar_lea.sflag [#allocation4], %s648_s20 }
0x1293   : > { %v2181_v43 = vsub.f32 1.0, %v2180_v42  ;;  %2296 = vmatpush.msra.mxu2 %v2257_v8  ;;  %s650_s1 = scalar_lea.vmem [#allocation13], %s2706_s4 }
0x1294   : > { %s2553_s23 = sshll.u32 %s650_s1, 4  ;;  %s2554_s23 = int_to_ptr.vmem [resolvable:$true] %s2553_s23 }
0x1295   : > { %v2182_v44 = vmul.f32 %v2972_v56, %v2181_v43  ;;  %v2328_v43 = vld [vmem:[#allocation11 + $0x60] sm:$0xff] }
0x1297   : > { %v2183_v45 = vadd.f32 %v2972_v56, %v2182_v44  ;;  %v2339_v44 = vld [vmem:[#allocation11 + $0xb8] sm:$0xff] }
0x1298   : > { %2381 = vmatpush.msrb.mxu0 %v2339_v44 }
0x1299   : > { %v4222_v46 = vsel %vm2184_vm0, %v2972_v56, %v2183_v45  ;;  %v2338_v45 = vld [vmem:[#allocation11 + $0xb0] sm:$0xff] }
0x129a   : > { %2382 = vmatpush.msrb.mxu0 %v2338_v45 }
0x12ec   : > { %v1783_v9 = vpop.f32.mrf.mxu0 }
0x12ed   : > { %2106 = vrot.lane.b32.xlu0 %v1783_v9, %s3259_s22  ;;  %v2254_v9 = vld [vmem:[%s4416_s11 + $0xb0] sm:$0xff] }
0x12ee   : > { %v2090_v10 = vpop.f32.mrf.mxu3  ;;  %2274 = vmatpush.msrb.mxu1 %v2254_v9  ;;  %v2319_v9 = vld [vmem:[#allocation11 + $0x18] sm:$0xff] }
0x12f0   : > { %2275 = vmatpush.msrb.mxu1 %v2252_v11  ;;  %v2318_v11 = vld [vmem:[#allocation11 + $0x10] sm:$0xff] }
0x12f2   : > { %2276 = vmatpush.msrb.mxu1 %v2250_v14 }
0x12f5   : > { %2114 = vrot.lane.b32.xlu0 %v2090_v10, %s3255_s18  ;;  %v2255_v10 = vld [vmem:[%s4416_s11 + $0xb8] sm:$0xff] }
0x12f6   : > { %v2093_v18 = vpop.f32.mrf.mxu3  ;;  %2297 = vmatpush.msra.mxu2 %v2255_v10 }
0x12f7   : > { %2116 = vrot.lane.b32.xlu1 %v2093_v18, %s3255_s18  ;;  %v2248_v18 = vld [vmem:[%s4416_s11 + $0x80] sm:$0xff]  ;;  %s2555_s18 = sshll.u32 %s2552_s26, 4  ;;  %s2556_s18 = int_to_ptr.hbm [resolvable:$true] %s2555_s18 }
0x12f8   : > { %2298 = vmatpush.msra.mxu2 %v2253_v12  ;;  %2277 = vmatpush.msrb.mxu1 %v2248_v18  ;;  %s3181_s17 = sshra.s32 %s2556_s18, 4  ;;  %s3182_s17 = int_to_ptr.hbm [resolvable:$true] %s3181_s17 }
0x12f9   : > { %s3183_s16 = scalar_lea.hbm %s3182_s17, 16  ;;  %p3188_p3 = scmp.lt.s32.totalorder %s3182_s17, %s4466_s21 }
0x12fa   : > { %2299 = vmatpush.msra.mxu2 %v2251_v52  ;;  %2278 = vmatpush.msrb.mxu1 %v2246_v21  ;;  %v2336_v21 = vld [vmem:[#allocation11 + $0xa0] sm:$0xff]  ;;  %p3184_p0 = scmp.ne.s32.totalorder %s3182_s17, %s3183_s16  ;;  %p3189_p4 = scmp.lt.s32.totalorder %s3187_s27, %s3183_s16 }
0x12fc   : > { %2300 = vmatpush.msra.mxu2 %v2249_v20  ;;  %2279 = vmatpush.msrb.mxu1 %v2244_v15  ;;  %v2317_v20 = vld [vmem:[#allocation11 + $0x8] sm:$0xff]  ;;  %v2335_v15 = vld [vmem:[#allocation11 + $0x98] sm:$0xff]  ;;  %p3185_p1 = pnand %p3184_p0, %p3392_p5  ;;  %p3190_p7 = por %p3189_p4, %p3188_p3 }
0x12fe   : > { %2301 = vmatpush.msra.mxu2 %v2247_v17  ;;  %2280 = vmatpush.msrb.mxu1 %v2242_v24  ;;  %v2316_v17 = vld [vmem:[#allocation11] sm:$0xff]  ;;  %v2333_v24 = vld [vmem:[#allocation11 + $0x88] sm:$0xff]  ;;  %p3186_p2 = pneg %p3185_p1 }
0x1300   : > { %2302 = vmatpush.msra.mxu2 %v2245_v30  ;;  %v2334_v30 = vld [vmem:[#allocation11 + $0x90] sm:$0xff]  ;;  %p3191_p8 = pnand %p3190_p7, %p3186_p2 }
0x1302   : > { %2303 = vmatpush.msra.mxu2 %v2243_v25  ;;  %v2264_v25 = vld [vmem:[%s4417_s12] sm:$0x3] }
0x1304   : > { %2304 = vmatpush.msra.mxu2 %v2241_v28 }
0x1306   : > { %2305 = vmatpush.msra.mxu2 %v2239_v60  ;;  %v2267_v60 = vperm.slane %v2264_v25, 1 }
0x1308   : > { %2306 = vmatpush.msra.mxu2 %v2237_v27 }
0x130a   : > { %2307 = vmatpush.msra.mxu2 %v2235_v13 }
0x130f   : > { %v1786_v26 = vpop.f32.mrf.mxu0 }
0x1310   : > { %2108 = vrot.lane.b32.xlu0 %v1786_v26, %s3259_s22  ;;  %v2240_v26 = vld [vmem:[%s4416_s11 + $0x40] sm:$0xff] }
0x1311   : > { %2281 = vmatpush.msrb.mxu1 %v2240_v26  ;;  %v2266_v26 = vperm.slane %v2264_v25, 0 }
0x1313   : > { %2282 = vmatpush.msrb.mxu1 %v2238_v31 }
0x1315   : > { %2283 = vmatpush.msrb.mxu1 %v2236_v16 }
0x135f   : > { %v2107_v32 = vpop.permute.xlu0 %2106 }
0x1360   : > { %v2123_v33 = vsel %vm2122_vm2, %v2120_v23, %v2107_v32  ;;  %v2234_v32 = vld [vmem:[%s4416_s11 + $0x10] sm:$0xff]  ;;  %v2232_v23 = vld [vmem:[%s4416_s11] sm:$0xff] }
0x1361   : > { %2284 = vmatpush.msrb.mxu1 %v2234_v32 }
0x1363   : > { %2285 = vmatpush.msrb.mxu1 %v2232_v23 }
0x1367   : > { %v2115_v59 = vpop.permute.xlu0 %2114 }
0x1368   : > { %v2126_v34 = vsel %vm2125_vm10, %v2123_v33, %v2115_v59  ;;  %v2233_v33 = vld [vmem:[%s4416_s11 + $0x8] sm:$0xff] }
0x1369   : > { %2164 = vmatmul.f32.vlgmr.msra.gmra.mxu0 %v2126_v34  ;;  %v2117_v57 = vpop.permute.xlu1 %2116  ;;  %2308 = vmatpush.msra.mxu2 %v2233_v33 }
0x1382   : > { %v2109_v37 = vpop.permute.xlu0 %2108 }
0x1383   : > { %v2124_v2 = vsel %vm2122_vm2, %v2121_v36, %v2109_v37 }
0x1384   : > { %v2127_v19 = vsel %vm2125_vm10, %v2124_v2, %v2117_v57 }
0x1385   : > { %2167 = vmatmul.f32.gmra.mxu0 %v2127_v19 }
0x13e6   : > { %v2165_v3 = vpop.f32.mrf.mxu0 }
0x13e7   : > { %v2166_v5 = vadd.f32 %v2933_v22, %v2165_v3  ;;  %v2934_v3 = vld [vmem:[#allocation10] ss:$0 sm:$0xff] }
0x13e9   : > { %v2171_v0 = vadd.f32 %v2985_v62, %v2166_v5 }
0x13eb   : > { %2175 = vadd.xlane.f32.xlu2 %v2171_v0 }
0x1402   : > { %v2168_v6 = vpop.f32.mrf.mxu0 }
0x1403   : > { %v2169_v38 = vadd.f32 %v2933_v22, %v2168_v6 }
0x1405   : > { %v2172_v40 = vadd.f32 %v2986_v39, %v2169_v38  ;;  %v2331_v38 = vld [vmem:[#allocation11 + $0x78] sm:$0xff]  ;;  %v2330_v39 = vld [vmem:[#allocation11 + $0x70] sm:$0xff] }
0x1406   : > { %2350 = vmatpush.msra.mxu3 %v2331_v38 }
0x1407   : > { %2177 = vadd.xlane.f32.xlu0 %v2172_v40 }
0x1408   : > { %2351 = vmatpush.msra.mxu3 %v2330_v39 }
0x140a   : > { %2352 = vmatpush.msra.mxu3 %v2329_v41 }
0x140c   : > { %2353 = vmatpush.msra.mxu3 %v2328_v43 }
0x145e   : > { %v2176_v48 = vpop.xlane.xlu2 %2175 }
0x145f   : > { %v2186_v7 = vmul.f32 %v4222_v46, %v2176_v48 }
0x1461   : > { %v4225_v47 = vsub.f32 %v2171_v0, %v2186_v7  ;;  %v2935_v0 = vld [vmem:[%s4415_s10] ss:$0 sm:$0xff] }
0x1462   : > { %v2327_v7 = vld [vmem:[#allocation11 + $0x58] sm:$0xff] }
0x1463   : > { %v2190_v53 = vmul.f32 %v4225_v47, %v4225_v47  ;;  %2354 = vmatpush.msra.mxu3 %v2327_v7 }
0x1465   : > { %2192 = vadd.xlane.f32.xlu1 %v2190_v53  ;;  %2355 = vmatpush.msra.mxu3 %v2326_v1  ;;  %v2323_v53 = vld [vmem:[#allocation11 + $0x38] sm:$0xff] }
0x1467   : > { %2356 = vmatpush.msra.mxu3 %v2325_v51 }
0x1469   : > { %2357 = vmatpush.msra.mxu3 %v2324_v49 }
0x146b   : > { %2358 = vmatpush.msra.mxu3 %v2323_v53 }
0x147a   : > { %v2178_v54 = vpop.xlane.xlu0 %2177 }
0x147b   : > { %v2187_v55 = vmul.f32 %v4222_v46, %v2178_v54 }
0x147d   : > { %v4242_v29 = vsub.f32 %v2172_v40, %v2187_v55  ;;  %v2322_v55 = vld [vmem:[#allocation11 + $0x30] sm:$0xff] }
0x147e   : > { %2359 = vmatpush.msra.mxu3 %v2322_v55 }
0x147f   : > { %v2191_v58 = vmul.f32 %v4242_v29, %v4242_v29 }
0x1480   : > { %2360 = vmatpush.msra.mxu3 %v2321_v61 }
0x1481   : > { %2194 = vadd.xlane.f32.xlu2 %v2191_v58 }
0x1482   : > { %2361 = vmatpush.msra.mxu3 %v2320_v63 }
0x1484   : > { %2362 = vmatpush.msra.mxu3 %v2319_v9 }
0x1486   : > { %2363 = vmatpush.msra.mxu3 %v2318_v11 }
0x1488   : > { %2364 = vmatpush.msra.mxu3 %v2317_v20 }
0x148a   : > { %2365 = vmatpush.msra.mxu3 %v2316_v17 }
0x14d8   : > { %v2193_v59 = vpop.xlane.xlu1 %2192 }
0x14d9   : > { %v2196_v34 = vmul.f32 %v2193_v59, %v4222_v46  ;;  %v2936_v59 = vld [vmem:[%s4419_s14] ss:$0 sm:$0xff] }
0x14db   : > { %v2198_v35 = vadd.f32 1e-05, %v2196_v34 }
0x14dd   : > { %2973 = vrsqrt.f32 %v2198_v35  ;;  %vm2206_vm12 = vweird.f32 %v2198_v35 }
0x14e3   : > { %v2974_v36 = vpop.eup %2973 }
0x14e4   : > { %v2201_v37 = vmul.f32 %v2974_v36, %v2198_v35  ;;  %vm2207_vm11 = vweird.f32 %v2974_v36 }
0x14e5   : > { %vm2208_vm13 = vmor %vm2206_vm12, %vm2207_vm11 }
0x14e6   : > { %v2202_v57 = vmul.f32 %v2974_v36, %v2201_v37 }
0x14e8   : > { %v2203_v2 = vmul.f32 0.5, %v2202_v57 }
0x14ea   : > { %v2204_v19 = vsub.f32 1.5, %v2203_v2 }
0x14ec   : > { %v2205_v22 = vmul.f32 %v2974_v36, %v2204_v19 }
0x14ee   : > { %v2209_v5 = vsel %vm2208_vm13, %v2974_v36, %v2205_v22 }
0x14ef   : > { %v2220_v62 = vmul.f32 %v2209_v5, %v4225_v47  ;;  %v2337_v47 = vld [vmem:[#allocation11 + $0xa8] sm:$0xff] }
0x14f0   : > { %2383 = vmatpush.msrb.mxu0 %v2337_v47 }
0x14f1   : > { %v2225_v6 = vmul.f32 %v2934_v3, %v2220_v62 }
0x14f2   : > { %2384 = vmatpush.msrb.mxu0 %v2336_v21 }
0x14f3   : > { %v4335_v40 = vadd.f32 %v2935_v0, %v2225_v6 }
0x14f4   : > { %v2195_v56 = vpop.xlane.xlu2 %2194  ;;  %2385 = vmatpush.msrb.mxu0 %v2335_v15 }
0x14f5   : > { %v2197_v42 = vmul.f32 %v2195_v56, %v4222_v46  ;;  %2286 = vmatmul.f32.vlgmr.msrb.gmra.mxu1 %v4335_v40  ;;  %2309 = vmatmul.f32.vlgmr.msra.gmra.mxu2 %v4335_v40 }
0x14f6   : > { %2386 = vmatpush.msrb.mxu0 %v2334_v30 }
0x14f7   : > { %v2199_v48 = vadd.f32 1e-05, %v2197_v42 }
0x14f8   : > { %2387 = vmatpush.msrb.mxu0 %v2333_v24 }
0x14f9   : > { %2975 = vrsqrt.f32 %v2199_v48  ;;  %vm2216_vm15 = vweird.f32 %v2199_v48 }
0x14ff   : > { %v2976_v50 = vpop.eup %2975 }
0x1500   : > { %v2211_v54 = vmul.f32 %v2976_v50, %v2199_v48  ;;  %vm2217_vm14 = vweird.f32 %v2976_v50 }
0x1501   : > { %vm2218_vm1 = vmor %vm2216_vm15, %vm2217_vm14 }
0x1502   : > { %v2212_v58 = vmul.f32 %v2976_v50, %v2211_v54 }
0x1504   : > { %v2213_v4 = vmul.f32 0.5, %v2212_v58 }
0x1506   : > { %v2214_v8 = vsub.f32 1.5, %v2213_v4 }
0x1508   : > { %v2215_v10 = vmul.f32 %v2976_v50, %v2214_v8 }
0x150a   : > { %v2219_v12 = vsel %vm2218_vm1, %v2976_v50, %v2215_v10 }
0x150b   : > { %v2221_v14 = vmul.f32 %v2219_v12, %v4242_v29  ;;  %v2332_v29 = vld [vmem:[#allocation11 + $0x80] sm:$0xff] }
0x150c   : > { %2388 = vmatpush.msrb.mxu0 %v2332_v29 }
0x150d   : > { %v2226_v52 = vmul.f32 %v2934_v3, %v2221_v14 }
0x150f   : > { %v4341_v18 = vadd.f32 %v2935_v0, %v2226_v52 }
0x1511   : > { %2289 = vmatmul.f32.gmra.mxu1 %v4341_v18  ;;  %2312 = vmatmul.f32.gmra.mxu2 %v4341_v18 }
0x1572   : > { %v2287_v28 = vpop.f32.mrf.mxu1 }
0x1573   : > { %v2288_v31 = vadd.f32 %v2287_v28, %v2266_v26 }
0x1575   : > { %2366 = vmatmul.f32.vlgmr.msra.gmra.mxu3 %v2288_v31 }
0x1578   : > { %v2310_v16 = vpop.f32.mrf.mxu2 }
0x1579   : > { %v2311_v27 = vadd.f32 %v2310_v16, %v2267_v60 }
0x157b   : > { %2751 = vmatmul.msk.f32.vlgmr.msrb.gmra.mxu0 %vm2122_vm2, %v2311_v27 }
0x158e   : > { %v2290_v32 = vpop.f32.mrf.mxu1 }
0x158f   : > { %v2291_v13 = vadd.f32 %v2290_v32, %v2266_v26 }
0x1591   : > { %2369 = vmatmul.f32.gmra.mxu3 %v2291_v13 }
0x1594   : > { %v2313_v23 = vpop.f32.mrf.mxu2 }
0x1595   : > { %v2314_v33 = vadd.f32 %v2313_v23, %v2267_v60 }
0x1597   : > { %2752 = vmatmul.msk.f32.gmra.mxu0 %vm2122_vm2, %v2314_v33 }
0x15f8   : > { %v2367_v34 = vpop.f32.mrf.mxu3  ;;  %v2390_v36 = vpop.f32.mrf.mxu0 }
0x15f9   : > { %v2368_v35 = vadd.f32 %v2936_v59, %v2367_v34 }
0x15fb   : > { %v2391_v37 = vadd.f32 %v2390_v36, %v2368_v35 }
0x15fd   : > { %v2398_v57 = vmul.f32 0.70710677, %v2391_v37  ;;  %v2396_v23 = vmul.f32 0.5, %v2391_v37 }
0x15ff   : > { %v2400_v2 = vmul.f32 %v2398_v57, %v2398_v57 }
0x1601   : > { %v2401_v19 = vmin.f32 %v2400_v2, 16.0 }
0x1603   : > { %v2402_v22 = vmul.f32 2.1237322e-06, %v2401_v19  ;;  %v2413_v3 = vmul.f32 3.8918573e-05, %v2401_v19 }
0x1605   : > { %v2403_v5 = vadd.f32 0.00028619796, %v2402_v22  ;;  %v2414_v62 = vadd.f32 0.001143296, %v2413_v3 }
0x1607   : > { %v2404_v0 = vmul.f32 %v2403_v5, %v2401_v19  ;;  %v2415_v6 = vmul.f32 %v2414_v62, %v2401_v19 }
0x1609   : > { %v2405_v38 = vadd.f32 0.0036580483, %v2404_v0  ;;  %v2416_v39 = vadd.f32 0.014752088, %v2415_v6 }
0x160b   : > { %v2417_v41 = vmul.f32 %v2416_v39, %v2401_v19  ;;  %v2406_v56 = vmul.f32 %v2405_v38, %v2401_v19 }
0x160d   : > { %v2418_v42 = vadd.f32 0.112945676, %v2417_v41  ;;  %v2407_v44 = vadd.f32 0.05243302, %v2406_v56 }
0x160f   : > { %v2419_v43 = vmul.f32 %v2418_v42, %v2401_v19  ;;  %v2408_v47 = vmul.f32 %v2407_v44, %v2401_v19 }
0x1611   : > { %v2420_v45 = vadd.f32 0.4994258, %v2419_v43  ;;  %v2409_v53 = vadd.f32 0.18741608, %v2408_v47 }
0x1613   : > { %v2421_v48 = vmul.f32 %v2420_v45, %v2401_v19  ;;  %v2410_v61 = vmul.f32 %v2409_v53, %v2401_v19 }
0x1614   : > { %v2370_v7 = vpop.f32.mrf.mxu3  ;;  %v2393_v49 = vpop.f32.mrf.mxu0 }
0x1615   : > { %v2422_v1 = vadd.f32 1.0, %v2421_v48  ;;  %v2371_v51 = vadd.f32 %v2936_v59, %v2370_v7  ;;  %v2411_v11 = vadd.f32 1.1283791, %v2410_v61 }
0x1617   : > { %2977 = vrcp.f32 %v2422_v1  ;;  %v4353_v50 = vadd.f32 %v2393_v49, %v2371_v51  ;;  %v2432_v12 = vand.u32 2147483647, %v2422_v1  ;;  %v2434_v14 = vand.u32 2147483648, %v2422_v1 }
0x1618   : > { %vm2428_vm4 = vweird.f32 %v2422_v1  ;;  %v2412_v29 = vmul.f32 %v2411_v11, %v2398_v57 }
0x1619   : > { %v2399_v54 = vmul.f32 0.70710677, %v4353_v50  ;;  %v2435_v24 = vor.u32 1.1754944e-38, %v2434_v14  ;;  %vm2433_vm6 = vcmp.eq.f32.partialorder %v2432_v12, 8.507059e+37  ;;  %v2397_v7 = vmul.f32 0.5, %v4353_v50 }
0x161b   : > { %v2440_v55 = vmul.f32 %v2399_v54, %v2399_v54 }
0x161d   : > { %v2978_v58 = vpop.eup %2977  ;;  %v2441_v63 = vmin.f32 %v2440_v55, 16.0 }
0x161e   : > { %v2424_v4 = vmul.f32 %v2978_v58, %v2422_v1  ;;  %vm2429_vm3 = vweird.f32 %v2978_v58 }
0x161f   : > { %v2442_v9 = vmul.f32 2.1237322e-06, %v2441_v63  ;;  %v2453_v10 = vmul.f32 3.8918573e-05, %v2441_v63  ;;  %vm2430_vm5 = vmor %vm2428_vm4, %vm2429_vm3 }
0x1620   : > { %v2425_v8 = vsub.f32 1.0, %v2424_v4 }
0x1621   : > { %v2443_v20 = vadd.f32 0.00028619796, %v2442_v9  ;;  %v2454_v21 = vadd.f32 0.001143296, %v2453_v10 }
0x1622   : > { %v2426_v52 = vmul.f32 %v2978_v58, %v2425_v8 }
0x1623   : > { %v2444_v15 = vmul.f32 %v2443_v20, %v2441_v63  ;;  %v2455_v30 = vmul.f32 %v2454_v21, %v2441_v63  ;;  %v2937_v20 = vld [vmem:[%s4420_s15] ss:$0 sm:$0xff] }
0x1624   : > { %v2427_v17 = vadd.f32 %v2978_v58, %v2426_v52 }
0x1625   : > { %v2456_v26 = vadd.f32 0.014752088, %v2455_v30  ;;  %v2445_v31 = vadd.f32 0.0036580483, %v2444_v15 }
0x1626   : > { %v2431_v25 = vsel %vm2430_vm5, %v2978_v58, %v2427_v17  ;;  %v2938_v17 = vld [vmem:[%s4465_s30] ss:$0 sm:$0xff] }
0x1627   : > { %v2436_v28 = vsel %vm2433_vm6, %v2435_v24, %v2431_v25  ;;  %v2457_v16 = vmul.f32 %v2456_v26, %v2441_v63  ;;  %v2446_v13 = vmul.f32 %v2445_v31, %v2441_v63 }
0x1628   : > { %v2437_v60 = vmul.f32 %v2436_v28, %v2412_v29 }
0x1629   : > { %v2458_v32 = vadd.f32 0.112945676, %v2457_v16  ;;  %v2447_v36 = vadd.f32 0.05243302, %v2446_v13 }
0x162a   : > { %v2753_v27 = vclamps-f32 %v2437_v60, 1.0 }
0x162b   : > { %v2459_v59 = vmul.f32 %v2458_v32, %v2441_v63  ;;  %v2448_v22 = vmul.f32 %v2447_v36, %v2441_v63 }
0x162c   : > { %v2480_v33 = vadd.f32 1.0, %v2753_v27 }
0x162d   : > { %v2460_v35 = vadd.f32 0.4994258, %v2459_v59  ;;  %v2449_v3 = vadd.f32 0.18741608, %v2448_v22 }
0x162e   : > { %v2482_v34 = vmul.f32 %v2480_v33, %v2396_v23 }
0x162f   : > { %v2461_v2 = vmul.f32 %v2460_v35, %v2441_v63  ;;  %v2450_v62 = vmul.f32 %v2449_v3, %v2441_v63 }
0x1630   : > { %v2484_v19 = vadd.f32 %v2482_v34, %v4335_v40 }
0x1631   : > { %v2462_v57 = vadd.f32 1.0, %v2461_v2  ;;  %v2451_v39 = vadd.f32 1.1283791, %v2450_v62 }
0x1632   : > { %2488 = vadd.xlane.f32.xlu0 %v2484_v19 }
0x1633   : > { %2979 = vrcp.f32 %v2462_v57  ;;  %v2474_v38 = vand.u32 2147483648, %v2462_v57  ;;  %v2472_v41 = vand.u32 2147483647, %v2462_v57  ;;  %vm2468_vm8 = vweird.f32 %v2462_v57 }
0x1634   : > { %v2452_v43 = vmul.f32 %v2451_v39, %v2399_v54 }
0x1635   : > { %v2475_v42 = vor.u32 1.1754944e-38, %v2474_v38  ;;  %vm2473_vm2 = vcmp.eq.f32.partialorder %v2472_v41, 8.507059e+37 }
0x1639   : > { %v2980_v5 = vpop.eup %2979 }
0x163a   : > { %v2464_v0 = vmul.f32 %v2980_v5, %v2462_v57  ;;  %vm2469_vm7 = vweird.f32 %v2980_v5 }
0x163b   : > { %vm2470_vm9 = vmor %vm2468_vm8, %vm2469_vm7 }
0x163c   : > { %v2465_v6 = vsub.f32 1.0, %v2464_v0 }
0x163e   : > { %v2466_v37 = vmul.f32 %v2980_v5, %v2465_v6 }
0x1640   : > { %v2467_v56 = vadd.f32 %v2980_v5, %v2466_v37 }
0x1642   : > { %v2471_v40 = vsel %vm2470_vm9, %v2980_v5, %v2467_v56 }
0x1643   : > { %v2476_v44 = vsel %vm2473_vm2, %v2475_v42, %v2471_v40 }
0x1644   : > { %v2477_v45 = vmul.f32 %v2476_v44, %v2452_v43 }
0x1646   : > { %v2754_v48 = vclamps-f32 %v2477_v45, 1.0 }
0x1648   : > { %v2481_v47 = vadd.f32 1.0, %v2754_v48 }
0x164a   : > { %v2483_v1 = vmul.f32 %v2481_v47, %v2397_v7 }
0x164c   : > { %v2485_v51 = vadd.f32 %v2483_v1, %v4341_v18 }
0x164e   : > { %2490 = vadd.xlane.f32.xlu1 %v2485_v51 }
0x16a5   : > { %v2489_v49 = vpop.xlane.xlu0 %2488 }
0x16a6   : > { %v2492_v53 = vmul.f32 %v2489_v49, %v4222_v46 }
0x16a8   : > { %v2494_v55 = vsub.f32 %v2484_v19, %v2492_v53 }
0x16aa   : > { %v2496_v58 = vmul.f32 %v2494_v55, %v2494_v55 }
0x16ac   : > { %2498 = vadd.xlane.f32.xlu2 %v2496_v58 }
0x16c1   : > { %v2491_v61 = vpop.xlane.xlu1 %2490 }
0x16c2   : > { %v2493_v54 = vmul.f32 %v2491_v61, %v4222_v46 }
0x16c4   : > { %v2495_v4 = vsub.f32 %v2485_v51, %v2493_v54 }
0x16c6   : > { %v2497_v63 = vmul.f32 %v2495_v4, %v2495_v4 }
0x16c8   : > { %2500 = vadd.xlane.f32.xlu0 %v2497_v63 }
0x171f   : > { %v2499_v8 = vpop.xlane.xlu2 %2498 }
0x1720   : > { %v2502_v50 = vmul.f32 %v2499_v8, %v4222_v46 }
0x1722   : > { %v2504_v9 = vadd.f32 1e-05, %v2502_v50 }
0x1724   : > { %2981 = vrsqrt.f32 %v2504_v9  ;;  %vm2512_vm0 = vweird.f32 %v2504_v9 }
0x172a   : > { %v2982_v18 = vpop.eup %2981 }
0x172b   : > { %v2507_v10 = vmul.f32 %v2982_v18, %v2504_v9  ;;  %vm2513_vm10 = vweird.f32 %v2982_v18 }
0x172c   : > { %vm2514_vm11 = vmor %vm2512_vm0, %vm2513_vm10 }
0x172d   : > { %v2508_v11 = vmul.f32 %v2982_v18, %v2507_v10 }
0x172f   : > { %v2509_v12 = vmul.f32 0.5, %v2508_v11 }
0x1731   : > { %v2510_v14 = vsub.f32 1.5, %v2509_v12 }
0x1733   : > { %v2511_v52 = vmul.f32 %v2982_v18, %v2510_v14 }
0x1735   : > { %v2515_v21 = vsel %vm2514_vm11, %v2982_v18, %v2511_v52 }
0x1736   : > { %v2526_v15 = vmul.f32 %v2515_v21, %v2494_v55 }
0x1738   : > { %v2531_v30 = vmul.f32 %v2937_v20, %v2526_v15 }
0x173a   : > { %v2536_v24 = vadd.f32 %v2938_v17, %v2531_v30 }
0x173b   : > { %v2501_v29 = vpop.xlane.xlu0 %2500 }
0x173c   : > { %2538 = vst [vmem:[%s650_s1] sm:$0xff] %v2536_v24  ;;  %v2503_v25 = vmul.f32 %v2501_v29, %v4222_v46 }
0x173e   : > { %v2505_v26 = vadd.f32 1e-05, %v2503_v25 }
0x1740   : > { %2983 = vrsqrt.f32 %v2505_v26  ;;  %vm2522_vm13 = vweird.f32 %v2505_v26 }
0x1746   : > { %v2984_v28 = vpop.eup %2983 }
0x1747   : > { %v2517_v31 = vmul.f32 %v2984_v28, %v2505_v26  ;;  %vm2523_vm12 = vweird.f32 %v2984_v28 }
0x1748   : > { %vm2524_vm14 = vmor %vm2522_vm13, %vm2523_vm12 }
0x1749   : > { %v2518_v60 = vmul.f32 %v2984_v28, %v2517_v31 }
0x174b   : > { %v2519_v16 = vmul.f32 0.5, %v2518_v60 }
0x174d   : > { %v2520_v27 = vsub.f32 1.5, %v2519_v16 }
0x174f   : > { %v2521_v32 = vmul.f32 %v2984_v28, %v2520_v27 }
0x1751   : > { %v2525_v13 = vsel %vm2524_vm14, %v2984_v28, %v2521_v32 }
0x1752   : > { %v2527_v46 = vmul.f32 %v2525_v13, %v2495_v4 }
0x1754   : > { %v2532_v23 = vmul.f32 %v2937_v20, %v2527_v46 }
0x1756   : > { %v2537_v33 = vadd.f32 %v2938_v17, %v2532_v23 }
0x1758   : > { %2539 = vst [vmem:[%s650_s1 + $0x8] sm:$0xff] %v2537_v33 }
0x1759   : > { %3194 = shalt.err (!%p3191_p8)
}
0x175a   : > { %s3262_s20 = smov 128   ;;  %s3263_s1 = smov 8  }
0x175b   : > { %2789 = dma.vmem_to_hbm [thread:$0]  (%p3392_p5), %s2554_s23, 256, %s2556_s18, %s2541_s28, %s3262_s20, %s3262_s20, %s3263_s1  }
0x175c PF: > { %s4468_s0 = sld [smem:[#allocation21_spill]] }
0x175d   : > { %s4469_s8 = sld [smem:[#allocation19_spill]] }
0x1762   : > { %p2826_p9 = scmp.ge.s32.totalorder %s4468_s0, 2 }
0x1763   : > { %s2570_s26 = sand.u32 1, %s4469_s8  }
0x1764   : > { %p2811_p10 = pnand %p2826_p9, %p3396_p6  ;;  %s2571_s29 = scalar_lea.sflag [#allocation4], %s2570_s26 }
0x1766   : > { %p2812_p11 = pneg %p2811_p10 }
0x1768   : > { %3228 = dma.done.wait (%p2812_p11), %s2571_s29, 256  }
0x1769   : > { %3230 = vsyncadd (%p2812_p11), %s2571_s29, 4294967040  ;;  %s4471_s27 = sld [smem:[#allocation22_spill]]  ;;  %s4474_s24 = smov %s3237_s25 }
0x176a   : > { %s4472_s17 = sld [smem:[#allocation20_spill]] }
0x176b   : > { %s4473_s26 = sld [smem:[#allocation23_spill]] }
0x176f   : > { %p31_p12 = scmp.ge.s32.totalorder %s4471_s27, 4  }
0x1770   : > { %s4475_s25 = smov %s4472_s17 }
0x1771   :  { %33 = sbr.rel (!%p31_p12) target bundleno = 14 (0xe), region = 151 }
0x1776   :  { %2577 = vsyncpa [#allocation3], 1 }
0x1777   :  { %2579 = vsyncpa [#allocation3 + $0x1], 1 }
0x1778   :  { %2580 = vsyncpa [#allocation6], 1 }
0x1779   :  { %2581 = vsyncpa [#allocation9], 1 }
0x177a   :  { %2582 = vsyncpa [#allocation12], 1 }
0x177b   :  { %2583 = vsyncpa [#allocation4], 1 }
0x177c   :  { %2585 = vsyncpa [#allocation4 + $0x1], 1 }

</bundles_post_ra>
